<compile_context>
chip_gen: v6e
topology: v6e:2x2x1
jax: 0.10.0
libtpu: 0.0.40
codegen_flags: <defaults>
</compile_context>

<pallas_src>
import functools

import jax
import jax.numpy as jnp
from jax import lax
from jax.experimental import pallas as pl
from jax.experimental.pallas import tpu as pltpu


ATTN_PROJ = 64    # PyTorch SelfAttention projection width
ATTN_PAD = 128    # lane-dense padded projection width


def _round_up(n, m):
    return ((n + m - 1) // m) * m


def _device_vmem_bytes():
    try:
        return int(pltpu.get_tpu_info().vmem_capacity_bytes)
    except Exception:
        return 64 << 20   # conservative fallback: v7x per-TensorCore VMEM


def _vmem_estimate(tT, tB, E, Hp, Op, mm_itemsize):
    """Generous estimate of the kernel's VMEM working set (bytes)."""
    f32 = 4
    Ep = _round_up(max(E, 1), 128)        # lane-padded footprint of the x block
    Ap = ATTN_PAD
    x_chunk = 2 * tT * tB * Ep * mm_itemsize                          # double-buffered x
    weights = 2 * (4 * Hp * (E + Hp) + Hp * Ap + Hp * Op) * mm_itemsize
    gx = tT * tB * 4 * Hp * f32                                       # pre-activation scratch
    hseq = tT * tB * Hp * mm_itemsize                                 # per-chunk hidden seq
    state = (3 * tB * Hp + 2 * tB * 8) * f32                          # h, c, acc, m, l
    out_blk = 2 * tB * _round_up(Op, 128) * f32
    # temps: projection-matmul result, e, f32 copy of hseq, p*h broadcast, energy, slop
    temps = tT * tB * (4 * Hp + Ap + 2 * Hp + 16) * f32
    return x_chunk + weights + gx + hseq + state + out_blk + temps + (1 << 20)


def _pick_time_chunk(T, tB, E, Hp, Op, mm_itemsize, budget):
    """Largest time-chunk (<=256) whose working set fits the VMEM budget."""
    tT = min(T, 256)
    while tT > 8 and _vmem_estimate(tT, tB, E, Hp, Op, mm_itemsize) > budget:
        tT = max(8, tT // 2)
    # Balance chunk sizes (the ragged tail is masked in-kernel, but less waste is better).
    nt = -(-T // tT)
    tT = min(tT, max(8, _round_up(-(-T // nt), 8)))
    return max(1, min(tT, T))


def _text_attention_kernel(
    T_total,    # static: true (unpadded) sequence length, for ragged-tail masking
    unroll,     # static: fori_loop unroll factor
    # --- inputs ---
    x_ref,      # (tT, tB, E)   time-major input chunk (matmul dtype)
    w_ih_ref,   # (E, 4*Hp)     LSTM input weights (transposed, padded; gate order i,f,g,o)
    w_hh_ref,   # (Hp, 4*Hp)    LSTM recurrent weights (transposed, padded)
    b_ref,      # (1, 4*Hp)     b_ih + b_hh (padded), f32
    w1_ref,     # (Hp, 128)     attention projection 1 (transposed, zero-padded to 128 lanes)
    b1_ref,     # (1, 128)      f32 (zero-padded)
    w2_ref,     # (1, 128)      attention projection 2 (zero-padded), f32
    b2_ref,     # (1, 1)        f32
    wfc_ref,    # (Hp, Op)      final fc (transposed, padded)
    bfc_ref,    # (1, Op)       f32
    # --- output ---
    out_ref,    # (tB, Op)      f32, lane-dense; written on the last time chunk
    # --- scratch (persists across the time-chunk grid axis) ---
    gx_ref,     # (tT*tB, 4*Hp) f32: hoisted input projection, then full pre-activations
    hseq_ref,   # (tT*tB, Hp)   per-chunk hidden sequence (matmul dtype)
    h_ref,      # (tB, Hp)  f32 LSTM hidden state
    c_ref,      # (tB, Hp)  f32 LSTM cell state
    acc_ref,    # (tB, Hp)  f32 online-softmax weighted sum of h_t
    m_ref,      # (tB, 1)   f32 online-softmax running max
    l_ref,      # (tB, 1)   f32 online-softmax running denominator
):
    t_chunk = pl.program_id(1)
    n_chunks = pl.num_programs(1)
    tT, tB, E = x_ref.shape
    Hp = w_hh_ref.shape[0]
    mm_dtype = w_hh_ref.dtype

    @pl.when(t_chunk == 0)
    def _init():
        h_ref[...] = jnp.zeros_like(h_ref)
        c_ref[...] = jnp.zeros_like(c_ref)
        acc_ref[...] = jnp.zeros_like(acc_ref)
        m_ref[...] = jnp.full(m_ref.shape, -jnp.inf, m_ref.dtype)
        l_ref[...] = jnp.zeros_like(l_ref)

    # ---- Hoisted input projection: ONE large MXU matmul for the whole chunk ----
    x_flat = x_ref[...].reshape(tT * tB, E)
    gx_ref[...] = (
        jnp.dot(x_flat, w_ih_ref[...], preferred_element_type=jnp.float32)
        + b_ref[...]
    )

    w_hh = w_hh_ref[...]

    # ---- Serial LSTM recurrence.  Only `h @ w_hh` + gate nonlinearities are on the
    # dependency chain; the (tB, 4Hp) pre-activation block is accumulated in VMEM
    # (gx_ref) and read back as 128-lane slices, so it is never fully vreg-resident.
    def step(t, carry):
        h, c = carry
        row = pl.multiple_of(t * tB, tB)
        gx_ref[pl.ds(row, tB), :] += jnp.dot(
            h.astype(mm_dtype), w_hh, preferred_element_type=jnp.float32)
        i = jax.nn.sigmoid(gx_ref[pl.ds(row, tB), 0 * Hp:1 * Hp])
        f = jax.nn.sigmoid(gx_ref[pl.ds(row, tB), 1 * Hp:2 * Hp])
        g = jnp.tanh(gx_ref[pl.ds(row, tB), 2 * Hp:3 * Hp])
        o = jax.nn.sigmoid(gx_ref[pl.ds(row, tB), 3 * Hp:4 * Hp])
        c_new = f * c + i * g
        h_new = o * jnp.tanh(c_new)
        hseq_ref[pl.ds(row, tB), :] = h_new.astype(hseq_ref.dtype)
        return (h_new, c_new)

    h, c = lax.fori_loop(0, tT, step, (h_ref[...], c_ref[...]), unroll=unroll)
    h_ref[...] = h
    c_ref[...] = c

    # ---- Attention scoring hoisted OFF the serial path: one lane-dense MXU matmul
    # + ReLU + lane reduce over the whole chunk, then an online (flash-style)
    # softmax update of the carried (m, l, acc) state.
    hseq = hseq_ref[...]
    e = jnp.maximum(
        jnp.dot(hseq, w1_ref[...], preferred_element_type=jnp.float32) + b1_ref[...],
        0.0,
    )                                                               # (tT*tB, 128)
    energy = jnp.sum(e * w2_ref[...], axis=-1, keepdims=True) + b2_ref[0, 0]
    energy = energy.reshape(tT, tB, 1)

    if T_total % tT != 0:
        # Ragged tail: steps past the true sequence length are masked out of the
        # softmax (their garbage h never reaches acc / l; carried h/c state is
        # re-initialized at the next batch tile's chunk 0, so it is never reused).
        t_idx = lax.broadcasted_iota(jnp.int32, (tT, tB, 1), 0)
        energy = jnp.where(t_chunk * tT + t_idx < T_total, energy, -jnp.inf)

    m_prev = m_ref[...]                                             # (tB, 1)
    m_new = jnp.maximum(m_prev, jnp.max(energy, axis=0))            # (tB, 1)
    alpha = jnp.exp(m_prev - m_new)                                 # (tB, 1)
    p = jnp.exp(energy - m_new[None])                               # (tT, tB, 1); masked -> 0
    l_ref[...] = alpha * l_ref[...] + jnp.sum(p, axis=0)
    h3 = hseq.reshape(tT, tB, Hp).astype(jnp.float32)
    acc_ref[...] = alpha * acc_ref[...] + jnp.sum(p * h3, axis=0)
    m_ref[...] = m_new

    @pl.when(t_chunk == n_chunks - 1)
    def _finalize():
        l = l_ref[...]
        inv_l = pl.reciprocal(l, approx=True)
        inv_l = inv_l * (2.0 - l * inv_l)       # one Newton step: full f32 accuracy, still EUP
        attended = acc_ref[...] * inv_l                              # (tB, Hp)
        out_ref[...] = (
            jnp.dot(attended.astype(mm_dtype), wfc_ref[...],
                    preferred_element_type=jnp.float32)
            + bfc_ref[...]
        )                                                            # (tB, Op)


def _prep_params(params, Hp, Op, mm_dtype):
    """Transpose to (in, out) layout and zero-pad H -> Hp, 64 -> 128, O -> Op.

    Zero padding keeps the padded hidden lanes exactly 0 through the whole network
    (gates at padded lanes are 0, c starts at 0 -> padded lanes of c and h stay 0),
    and relu(0 + 0) * 0 == 0 for the padded attention columns, so results match the
    unpadded model up to fp associativity."""
    H = params["w_hh"].shape[1]
    E = params["w_ih"].shape[1]
    O = params["w_fc"].shape[0]
    f32 = jnp.float32
    Ap = ATTN_PAD

    w_ih = jnp.zeros((E, 4 * Hp), f32)
    w_hh = jnp.zeros((Hp, 4 * Hp), f32)
    b = jnp.zeros((1, 4 * Hp), f32)
    for k in range(4):  # PyTorch gate order: i, f, g, o
        w_ih = w_ih.at[:, k * Hp:k * Hp + H].set(
            params["w_ih"][k * H:(k + 1) * H, :].T.astype(f32))
        w_hh = w_hh.at[:H, k * Hp:k * Hp + H].set(
            params["w_hh"][k * H:(k + 1) * H, :].T.astype(f32))
        b = b.at[0, k * Hp:k * Hp + H].set(
            (params["b_ih"][k * H:(k + 1) * H]
             + params["b_hh"][k * H:(k + 1) * H]).astype(f32))

    w1 = jnp.zeros((Hp, Ap), f32).at[:H, :ATTN_PROJ].set(params["w1"].T.astype(f32))
    b1 = jnp.zeros((1, Ap), f32).at[0, :ATTN_PROJ].set(params["b1"].astype(f32))
    w2 = jnp.zeros((1, Ap), f32).at[0, :ATTN_PROJ].set(params["w2"][0].astype(f32))
    b2 = params["b2"].reshape(1, 1).astype(f32)
    wfc = jnp.zeros((Hp, Op), f32).at[:H, :O].set(params["w_fc"].T.astype(f32))
    bfc = jnp.zeros((1, Op), f32).at[0, :O].set(params["b_fc"].astype(f32))

    return (w_ih.astype(mm_dtype), w_hh.astype(mm_dtype), b,
            w1.astype(mm_dtype), b1, w2, b2, wfc.astype(mm_dtype), bfc)


def text_attention_forward(x, params, *, time_chunk=None, batch_tile=None,
                           matmul_dtype=jnp.float32,
                           batch_dim_semantics="parallel"):
    """x: (B, T, E) float32 (batch_first, like the PyTorch module). Returns (B, O).

    On v7x with >= 2 batch tiles, pass batch_dim_semantics=pltpu.CORE_PARALLEL to
    shard batch tiles across the two TensorCores; the time axis must stay
    "arbitrary" (carried h/c/m/l/acc scratch state)."""
    B, T, E = x.shape
    H = params["w_hh"].shape[1]
    O = params["w_fc"].shape[0]
    Hp = _round_up(H, 128)          # lane-aligned gate blocks
    Op = _round_up(O, 128)          # lane-dense output block
    mm_itemsize = jnp.dtype(matmul_dtype).itemsize

    if batch_tile is None:
        tB = min(128, _round_up(B, 8))
    else:
        tB = min(_round_up(batch_tile, 8), _round_up(B, 8))
    Bp = _round_up(B, tB)
    nb = Bp // tB

    device_vmem = _device_vmem_bytes()
    budget = int(device_vmem * 0.7)
    if time_chunk is None:
        tT = _pick_time_chunk(T, tB, E, Hp, Op, mm_itemsize, budget)
    else:
        tT = max(1, min(int(time_chunk), T))
    nt = -(-T // tT)
    Tp = nt * tT

    # Unroll the time loop so the LLO scheduler can overlap step t+1's recurrent
    # matmul with step t's gate nonlinearities / stores.
    unroll = next(u for u in (8, 4, 2, 1) if tT % u == 0)

    # Time-major layout so the recurrence indexes contiguous per-step slabs; pad
    # batch to a sublane multiple and time to a whole number of chunks (the padded
    # tail is masked out of the softmax inside the kernel).
    x_tm = jnp.transpose(x.astype(matmul_dtype), (1, 0, 2))             # (T, B, E)
    x_tm = jnp.pad(x_tm, ((0, Tp - T), (0, Bp - B), (0, 0)))

    w_ih, w_hh, b, w1, b1, w2, b2, wfc, bfc = _prep_params(params, Hp, Op, matmul_dtype)

    const2 = lambda i, j: (0, 0)
    # TODO(synk): single-buffer the constant weight operands (pipeline_mode=pl.Buffered(1))
    # once confirmed on the target JAX build; the budget above conservatively assumes
    # they are double-buffered.
    in_specs = [
        pl.BlockSpec((tT, tB, E), lambda i, j: (j, i, 0)),   # x chunk (double-buffered)
        pl.BlockSpec((E, 4 * Hp), const2),                   # w_ih
        pl.BlockSpec((Hp, 4 * Hp), const2),                  # w_hh
        pl.BlockSpec((1, 4 * Hp), const2),                   # b
        pl.BlockSpec((Hp, ATTN_PAD), const2),                # w1
        pl.BlockSpec((1, ATTN_PAD), const2),                 # b1
        pl.BlockSpec((1, ATTN_PAD), const2),                 # w2
        pl.BlockSpec((1, 1), const2),                        # b2
        pl.BlockSpec((Hp, Op), const2),                      # wfc
        pl.BlockSpec((1, Op), const2),                       # bfc
    ]
    out_specs = pl.BlockSpec((tB, Op), lambda i, j: (i, 0))  # resident across time axis

    scratch_shapes = [
        pltpu.VMEM((tT * tB, 4 * Hp), jnp.float32),          # gx / pre-activations
        pltpu.VMEM((tT * tB, Hp), matmul_dtype),             # per-chunk hidden sequence
        pltpu.VMEM((tB, Hp), jnp.float32),                   # h
        pltpu.VMEM((tB, Hp), jnp.float32),                   # c
        pltpu.VMEM((tB, Hp), jnp.float32),                   # acc
        pltpu.VMEM((tB, 1), jnp.float32),                    # m
        pltpu.VMEM((tB, 1), jnp.float32),                    # l
    ]

    vmem_est = _vmem_estimate(tT, tB, E, Hp, Op, mm_itemsize)
    vmem_limit = int(max(vmem_est + (4 << 20), 32 << 20))
    vmem_limit = min(vmem_limit, device_vmem - (2 << 20))    # never exceed physical VMEM

    kernel = functools.partial(_text_attention_kernel, T, unroll)

    out = pl.pallas_call(
        kernel,
        out_shape=jax.ShapeDtypeStruct((Bp, Op), jnp.float32),
        grid=(nb, nt),
        in_specs=in_specs,
        out_specs=out_specs,
        scratch_shapes=scratch_shapes,
        compiler_params=pltpu.CompilerParams(
            dimension_semantics=(batch_dim_semantics, "arbitrary"),
            vmem_limit_bytes=vmem_limit,
        ),
    )(x_tm, w_ih, w_hh, b, w1, b1, w2, b2, wfc, bfc)

    return out[:B, :O]


def reference_forward(x, params):
    """Pure-JAX reference with identical math (for correctness check)."""
    B, T, E = x.shape
    H = params["w_hh"].shape[1]
    w_ih_t = params["w_ih"].T
    w_hh_t = params["w_hh"].T
    b = (params["b_ih"] + params["b_hh"])[None, :]

    def step(carry, x_t):
        h, c = carry
        gates = x_t @ w_ih_t + h @ w_hh_t + b
        i = jax.nn.sigmoid(gates[:, 0 * H:1 * H])
        f = jax.nn.sigmoid(gates[:, 1 * H:2 * H])
        g = jnp.tanh(gates[:, 2 * H:3 * H])
        o = jax.nn.sigmoid(gates[:, 3 * H:4 * H])
        c = f * c + i * g
        h = o * jnp.tanh(c)
        return (h, c), h

    x_tm = jnp.transpose(x, (1, 0, 2))
    (_, _), hseq = lax.scan(step, (jnp.zeros((B, H)), jnp.zeros((B, H))), x_tm)
    lstm_out = jnp.transpose(hseq, (1, 0, 2))                            # (B, T, H)

    e = jnp.maximum(lstm_out @ params["w1"].T + params["b1"], 0.0)       # (B, T, 64)
    energy = (e @ params["w2"].T + params["b2"]).squeeze(-1)             # (B, T)
    w = jax.nn.softmax(energy, axis=1)
    attended = jnp.sum(lstm_out * w[:, :, None], axis=1)                 # (B, H)
    return attended @ params["w_fc"].T + params["b_fc"]


def init_params(key, embedding_dim, hidden_dim, output_dim):
    ks = jax.random.split(key, 10)
    H, E, O = hidden_dim, embedding_dim, output_dim
    k_lstm = 1.0 / jnp.sqrt(H)

    def u(k, shape, bound):
        return jax.random.uniform(k, shape, jnp.float32, -bound, bound)

    return {
        "w_ih": u(ks[0], (4 * H, E), k_lstm),
        "w_hh": u(ks[1], (4 * H, H), k_lstm),
        "b_ih": u(ks[2], (4 * H,), k_lstm),
        "b_hh": u(ks[3], (4 * H,), k_lstm),
        "w1":   u(ks[4], (64, H), 1.0 / jnp.sqrt(H)),
        "b1":   u(ks[5], (64,), 1.0 / jnp.sqrt(H)),
        "w2":   u(ks[6], (1, 64), 1.0 / jnp.sqrt(64.0)),
        "b2":   u(ks[7], (1,), 1.0 / jnp.sqrt(64.0)),
        "w_fc": u(ks[8], (O, H), 1.0 / jnp.sqrt(H)),
        "b_fc": u(ks[9], (O,), 1.0 / jnp.sqrt(H)),
    }


if __name__ == "__main__":
    B, T, E, H, O = 2, 8, 32, 32, 4

    key = jax.random.PRNGKey(0)
    k_x, k_p = jax.random.split(key)
    x = jax.random.normal(k_x, (B, T, E), jnp.float32)
    params = init_params(k_p, E, H, O)

    # 1) Single-chunk f32 path.
    out = jax.block_until_ready(text_attention_forward(x, params))
    ref = reference_forward(x, params)
    assert out.shape == (B, O)
    assert jnp.allclose(out, ref, atol=1e-4, rtol=1e-4), (out, ref)

    # 2) Multi-chunk / multi-batch-tile grid (carried LSTM + online-softmax state).
    B2, T2 = 11, 32
    x2 = jax.random.normal(jax.random.PRNGKey(1), (B2, T2, E), jnp.float32)
    out2 = jax.block_until_ready(
        text_attention_forward(x2, params, time_chunk=8, batch_tile=8))
    ref2 = reference_forward(x2, params)
    assert out2.shape == (B2, O)
    assert jnp.allclose(out2, ref2, atol=1e-4, rtol=1e-4), (out2, ref2)

    # 3) Ragged sequence length (T not a multiple of the time chunk: masked tail).
    B3, T3 = 5, 37
    x3 = jax.random.normal(jax.random.PRNGKey(2), (B3, T3, E), jnp.float32)
    out3 = jax.block_until_ready(text_attention_forward(x3, params, time_chunk=8))
    ref3 = reference_forward(x3, params)
    assert out3.shape == (B3, O)
    assert jnp.allclose(out3, ref3, atol=1e-4, rtol=1e-4), (out3, ref3)

    # 4) bf16 matmul operands (v6e/v7x fast path); f32 state/accumulation, loose tol.
    out4 = jax.block_until_ready(
        text_attention_forward(x2, params, time_chunk=8, batch_tile=8,
                               matmul_dtype=jnp.bfloat16))
    assert out4.shape == (B2, O)
    assert jnp.allclose(out4, ref2, atol=5e-2, rtol=5e-2), (out4, ref2)

    print("KERNEL_OK")
</pallas_src>

<mosaic_0001>
module attributes {stable_mosaic.version = 11 : i64} {
  func.func @_text_attention_kernel(%arg0: i32, %arg1: i32, %arg2: memref<8x8x32xf32, #tpu.memory_space<vmem>>, %arg3: memref<32x512xf32, #tpu.memory_space<vmem>>, %arg4: memref<128x512xf32, #tpu.memory_space<vmem>>, %arg5: memref<1x512xf32, #tpu.memory_space<vmem>>, %arg6: memref<128x128xf32, #tpu.memory_space<vmem>>, %arg7: memref<1x128xf32, #tpu.memory_space<vmem>>, %arg8: memref<1x128xf32, #tpu.memory_space<vmem>>, %arg9: memref<1x1xf32, #tpu.memory_space<vmem>>, %arg10: memref<128x128xf32, #tpu.memory_space<vmem>>, %arg11: memref<1x128xf32, #tpu.memory_space<vmem>>, %arg12: memref<8x128xf32, #tpu.memory_space<vmem>>, %arg13: memref<64x512xf32, #tpu.memory_space<vmem>>, %arg14: memref<64x128xf32, #tpu.memory_space<vmem>>, %arg15: memref<8x128xf32, #tpu.memory_space<vmem>>, %arg16: memref<8x128xf32, #tpu.memory_space<vmem>>, %arg17: memref<8x128xf32, #tpu.memory_space<vmem>>, %arg18: memref<8x1xf32, #tpu.memory_space<vmem>>, %arg19: memref<8x1xf32, #tpu.memory_space<vmem>>) attributes {dimension_semantics = [#tpu.dimension_semantics<parallel>, #tpu.dimension_semantics<arbitrary>], iteration_bounds = array<i64: 1, 1>, scalar_prefetch = 0 : i64, scratch_operands = 7 : i64, tpu.core_type = #tpu.core_type<tc>, window_params = [{transform_indices = @transform_0, window_bounds = array<i64: 8, 8, 32>}, {pipeline_mode = #tpu.pipeline_mode<synchronous>, transform_indices = @transform_1, window_bounds = array<i64: 32, 512>}, {pipeline_mode = #tpu.pipeline_mode<synchronous>, transform_indices = @transform_2, window_bounds = array<i64: 128, 512>}, {pipeline_mode = #tpu.pipeline_mode<synchronous>, transform_indices = @transform_3, window_bounds = array<i64: 1, 512>}, {pipeline_mode = #tpu.pipeline_mode<synchronous>, transform_indices = @transform_4, window_bounds = array<i64: 128, 128>}, {pipeline_mode = #tpu.pipeline_mode<synchronous>, transform_indices = @transform_5, window_bounds = array<i64: 1, 128>}, {pipeline_mode = #tpu.pipeline_mode<synchronous>, transform_indices = @transform_6, window_bounds = array<i64: 1, 128>}, {pipeline_mode = #tpu.pipeline_mode<synchronous>, transform_indices = @transform_7, window_bounds = array<i64: 1, 1>}, {pipeline_mode = #tpu.pipeline_mode<synchronous>, transform_indices = @transform_8, window_bounds = array<i64: 128, 128>}, {pipeline_mode = #tpu.pipeline_mode<synchronous>, transform_indices = @transform_9, window_bounds = array<i64: 1, 128>}, {transform_indices = @transform_10, window_bounds = array<i64: 8, 128>}]} {
    %c0_i32 = arith.constant 0 : i32
    %0 = arith.cmpi eq, %arg1, %c0_i32 : i32
    %1 = arith.extui %0 : i1 to i32
    %c0_i32_0 = arith.constant 0 : i32
    %2 = arith.cmpi ne, %1, %c0_i32_0 : i32
    scf.if %2 {
      %cst_143 = arith.constant 0.000000e+00 : f32
      %373 = vector.broadcast %cst_143 : f32 to vector<8x128xf32>
      %c0_144 = arith.constant 0 : index
      %c0_145 = arith.constant 0 : index
      %374 = vector.load %arg15[%c0_144, %c0_145] : memref<8x128xf32, #tpu.memory_space<vmem>>, vector<8x128xf32>
      tpu.vector_store %arg15[%c0_144, %c0_145], %373 {strides = array<i32>} : memref<8x128xf32, #tpu.memory_space<vmem>>, vector<8x128xf32>,
      %cst_146 = arith.constant 0.000000e+00 : f32
      %375 = vector.broadcast %cst_146 : f32 to vector<8x128xf32>
      %c0_147 = arith.constant 0 : index
      %c0_148 = arith.constant 0 : index
      %376 = vector.load %arg16[%c0_147, %c0_148] : memref<8x128xf32, #tpu.memory_space<vmem>>, vector<8x128xf32>
      tpu.vector_store %arg16[%c0_147, %c0_148], %375 {strides = array<i32>} : memref<8x128xf32, #tpu.memory_space<vmem>>, vector<8x128xf32>,
      %cst_149 = arith.constant 0.000000e+00 : f32
      %377 = vector.broadcast %cst_149 : f32 to vector<8x128xf32>
      %c0_150 = arith.constant 0 : index
      %c0_151 = arith.constant 0 : index
      %378 = vector.load %arg17[%c0_150, %c0_151] : memref<8x128xf32, #tpu.memory_space<vmem>>, vector<8x128xf32>
      tpu.vector_store %arg17[%c0_150, %c0_151], %377 {strides = array<i32>} : memref<8x128xf32, #tpu.memory_space<vmem>>, vector<8x128xf32>,
      %cst_152 = arith.constant 0xFF800000 : f32
      %379 = vector.broadcast %cst_152 : f32 to vector<8x1xf32>
      %c0_153 = arith.constant 0 : index
      %c0_154 = arith.constant 0 : index
      %380 = vector.load %arg18[%c0_153, %c0_154] : memref<8x1xf32, #tpu.memory_space<vmem>>, vector<8x1xf32>
      tpu.vector_store %arg18[%c0_153, %c0_154], %379 {strides = array<i32>} : memref<8x1xf32, #tpu.memory_space<vmem>>, vector<8x1xf32>,
      %cst_155 = arith.constant 0.000000e+00 : f32
      %381 = vector.broadcast %cst_155 : f32 to vector<8x1xf32>
      %c0_156 = arith.constant 0 : index
      %c0_157 = arith.constant 0 : index
      %382 = vector.load %arg19[%c0_156, %c0_157] : memref<8x1xf32, #tpu.memory_space<vmem>>, vector<8x1xf32>
      tpu.vector_store %arg19[%c0_156, %c0_157], %381 {strides = array<i32>} : memref<8x1xf32, #tpu.memory_space<vmem>>, vector<8x1xf32>,
    } else {
    }
    %c0 = arith.constant 0 : index
    %c0_1 = arith.constant 0 : index
    %c0_2 = arith.constant 0 : index
    %3 = vector.load %arg2[%c0, %c0_1, %c0_2] : memref<8x8x32xf32, #tpu.memory_space<vmem>>, vector<8x8x32xf32>
    %4 = vector.shape_cast %3 : vector<8x8x32xf32> to vector<64x32xf32>
    %c0_3 = arith.constant 0 : index
    %c0_4 = arith.constant 0 : index
    %5 = vector.load %arg3[%c0_3, %c0_4] : memref<32x512xf32, #tpu.memory_space<vmem>>, vector<32x512xf32>
    %cst = arith.constant dense<0.000000e+00> : vector<64x512xf32>
    %6 = tpu.matmul %4, %5, %cst {dimension_numbers = #tpu.dot_dimension_numbers<[1], [0], [0], [1], [0, 0, 1, 1], [], []>} : vector<64x32xf32>, vector<32x512xf32>, vector<64x512xf32> -> vector<64x512xf32>
    %c0_5 = arith.constant 0 : index
    %c0_6 = arith.constant 0 : index
    %7 = vector.load %arg5[%c0_5, %c0_6] : memref<1x512xf32, #tpu.memory_space<vmem>>, vector<1x512xf32>
    %8 = vector.broadcast %7 : vector<1x512xf32> to vector<64x512xf32>
    %9 = arith.addf %6, %8 : vector<64x512xf32>
    %c0_7 = arith.constant 0 : index
    %c0_8 = arith.constant 0 : index
    %10 = vector.load %arg13[%c0_7, %c0_8] : memref<64x512xf32, #tpu.memory_space<vmem>>, vector<64x512xf32>
    tpu.vector_store %arg13[%c0_7, %c0_8], %9 {strides = array<i32>} : memref<64x512xf32, #tpu.memory_space<vmem>>, vector<64x512xf32>,
    %c0_9 = arith.constant 0 : index
    %c0_10 = arith.constant 0 : index
    %11 = vector.load %arg4[%c0_9, %c0_10] : memref<128x512xf32, #tpu.memory_space<vmem>>, vector<128x512xf32>
    %c0_11 = arith.constant 0 : index
    %c0_12 = arith.constant 0 : index
    %12 = vector.load %arg15[%c0_11, %c0_12] : memref<8x128xf32, #tpu.memory_space<vmem>>, vector<8x128xf32>
    %c0_13 = arith.constant 0 : index
    %c0_14 = arith.constant 0 : index
    %13 = vector.load %arg16[%c0_13, %c0_14] : memref<8x128xf32, #tpu.memory_space<vmem>>, vector<8x128xf32>
    %c0_i32_15 = arith.constant 0 : i32
    %c8_i32 = arith.constant 8 : i32
    %14 = arith.muli %c0_i32_15, %c8_i32 : i32
    %15 = tpu.assume_multiple %14, 8 : i32
    %16 = arith.index_cast %15 : i32 to index
    %c0_16 = arith.constant 0 : index
    %17 = vector.load %arg13[%16, %c0_16] : memref<64x512xf32, #tpu.memory_space<vmem>>, vector<8x512xf32>
    %cst_17 = arith.constant dense<0.000000e+00> : vector<8x512xf32>
    %18 = tpu.matmul %12, %11, %cst_17 {dimension_numbers = #tpu.dot_dimension_numbers<[1], [0], [0], [1], [0, 0, 1, 1], [], []>} : vector<8x128xf32>, vector<128x512xf32>, vector<8x512xf32> -> vector<8x512xf32>
    %19 = arith.addf %17, %18 : vector<8x512xf32>
    %20 = arith.index_cast %15 : i32 to index
    %c0_18 = arith.constant 0 : index
    %21 = vector.load %arg13[%20, %c0_18] : memref<64x512xf32, #tpu.memory_space<vmem>>, vector<8x512xf32>
    tpu.vector_store %arg13[%20, %c0_18], %19 {strides = array<i32>} : memref<64x512xf32, #tpu.memory_space<vmem>>, vector<8x512xf32>,
    %22 = arith.index_cast %15 : i32 to index
    %c0_19 = arith.constant 0 : index
    %23 = vector.load %arg13[%22, %c0_19] : memref<64x512xf32, #tpu.memory_space<vmem>>, vector<8x128xf32>
    %24 = arith.negf %23 : vector<8x128xf32>
    %25 = math.exp %24 : vector<8x128xf32>
    %cst_20 = arith.constant 1.000000e+00 : f32
    %26 = vector.broadcast %cst_20 : f32 to vector<8x128xf32>
    %27 = arith.addf %26, %25 : vector<8x128xf32>
    %28 = arith.divf %26, %27 : vector<8x128xf32>
    %29 = arith.index_cast %15 : i32 to index
    %c128 = arith.constant 128 : index
    %30 = vector.load %arg13[%29, %c128] : memref<64x512xf32, #tpu.memory_space<vmem>>, vector<8x128xf32>
    %31 = arith.negf %30 : vector<8x128xf32>
    %32 = math.exp %31 : vector<8x128xf32>
    %cst_21 = arith.constant 1.000000e+00 : f32
    %33 = vector.broadcast %cst_21 : f32 to vector<8x128xf32>
    %34 = arith.addf %33, %32 : vector<8x128xf32>
    %35 = arith.divf %33, %34 : vector<8x128xf32>
    %36 = arith.index_cast %15 : i32 to index
    %c256 = arith.constant 256 : index
    %37 = vector.load %arg13[%36, %c256] : memref<64x512xf32, #tpu.memory_space<vmem>>, vector<8x128xf32>
    %38 = math.tanh %37 : vector<8x128xf32>
    %39 = arith.index_cast %15 : i32 to index
    %c384 = arith.constant 384 : index
    %40 = vector.load %arg13[%39, %c384] : memref<64x512xf32, #tpu.memory_space<vmem>>, vector<8x128xf32>
    %41 = arith.negf %40 : vector<8x128xf32>
    %42 = math.exp %41 : vector<8x128xf32>
    %cst_22 = arith.constant 1.000000e+00 : f32
    %43 = vector.broadcast %cst_22 : f32 to vector<8x128xf32>
    %44 = arith.addf %43, %42 : vector<8x128xf32>
    %45 = arith.divf %43, %44 : vector<8x128xf32>
    %46 = arith.mulf %35, %13 : vector<8x128xf32>
    %47 = arith.mulf %28, %38 : vector<8x128xf32>
    %48 = arith.addf %46, %47 : vector<8x128xf32>
    %49 = math.tanh %48 : vector<8x128xf32>
    %50 = arith.mulf %45, %49 : vector<8x128xf32>
    %51 = arith.index_cast %15 : i32 to index
    %c0_23 = arith.constant 0 : index
    %52 = vector.load %arg14[%51, %c0_23] : memref<64x128xf32, #tpu.memory_space<vmem>>, vector<8x128xf32>
    tpu.vector_store %arg14[%51, %c0_23], %50 {strides = array<i32>} : memref<64x128xf32, #tpu.memory_space<vmem>>, vector<8x128xf32>,
    %c1_i32 = arith.constant 1 : i32
    %c8_i32_24 = arith.constant 8 : i32
    %53 = arith.muli %c1_i32, %c8_i32_24 : i32
    %54 = tpu.assume_multiple %53, 8 : i32
    %55 = arith.index_cast %54 : i32 to index
    %c0_25 = arith.constant 0 : index
    %56 = vector.load %arg13[%55, %c0_25] : memref<64x512xf32, #tpu.memory_space<vmem>>, vector<8x512xf32>
    %cst_26 = arith.constant dense<0.000000e+00> : vector<8x512xf32>
    %57 = tpu.matmul %50, %11, %cst_26 {dimension_numbers = #tpu.dot_dimension_numbers<[1], [0], [0], [1], [0, 0, 1, 1], [], []>} : vector<8x128xf32>, vector<128x512xf32>, vector<8x512xf32> -> vector<8x512xf32>
    %58 = arith.addf %56, %57 : vector<8x512xf32>
    %59 = arith.index_cast %54 : i32 to index
    %c0_27 = arith.constant 0 : index
    %60 = vector.load %arg13[%59, %c0_27] : memref<64x512xf32, #tpu.memory_space<vmem>>, vector<8x512xf32>
    tpu.vector_store %arg13[%59, %c0_27], %58 {strides = array<i32>} : memref<64x512xf32, #tpu.memory_space<vmem>>, vector<8x512xf32>,
    %61 = arith.index_cast %54 : i32 to index
    %c0_28 = arith.constant 0 : index
    %62 = vector.load %arg13[%61, %c0_28] : memref<64x512xf32, #tpu.memory_space<vmem>>, vector<8x128xf32>
    %63 = arith.negf %62 : vector<8x128xf32>
    %64 = math.exp %63 : vector<8x128xf32>
    %cst_29 = arith.constant 1.000000e+00 : f32
    %65 = vector.broadcast %cst_29 : f32 to vector<8x128xf32>
    %66 = arith.addf %65, %64 : vector<8x128xf32>
    %67 = arith.divf %65, %66 : vector<8x128xf32>
    %68 = arith.index_cast %54 : i32 to index
    %c128_30 = arith.constant 128 : index
    %69 = vector.load %arg13[%68, %c128_30] : memref<64x512xf32, #tpu.memory_space<vmem>>, vector<8x128xf32>
    %70 = arith.negf %69 : vector<8x128xf32>
    %71 = math.exp %70 : vector<8x128xf32>
    %cst_31 = arith.constant 1.000000e+00 : f32
    %72 = vector.broadcast %cst_31 : f32 to vector<8x128xf32>
    %73 = arith.addf %72, %71 : vector<8x128xf32>
    %74 = arith.divf %72, %73 : vector<8x128xf32>
    %75 = arith.index_cast %54 : i32 to index
    %c256_32 = arith.constant 256 : index
    %76 = vector.load %arg13[%75, %c256_32] : memref<64x512xf32, #tpu.memory_space<vmem>>, vector<8x128xf32>
    %77 = math.tanh %76 : vector<8x128xf32>
    %78 = arith.index_cast %54 : i32 to index
    %c384_33 = arith.constant 384 : index
    %79 = vector.load %arg13[%78, %c384_33] : memref<64x512xf32, #tpu.memory_space<vmem>>, vector<8x128xf32>
    %80 = arith.negf %79 : vector<8x128xf32>
    %81 = math.exp %80 : vector<8x128xf32>
    %cst_34 = arith.constant 1.000000e+00 : f32
    %82 = vector.broadcast %cst_34 : f32 to vector<8x128xf32>
    %83 = arith.addf %82, %81 : vector<8x128xf32>
    %84 = arith.divf %82, %83 : vector<8x128xf32>
    %85 = arith.mulf %74, %48 : vector<8x128xf32>
    %86 = arith.mulf %67, %77 : vector<8x128xf32>
    %87 = arith.addf %85, %86 : vector<8x128xf32>
    %88 = math.tanh %87 : vector<8x128xf32>
    %89 = arith.mulf %84, %88 : vector<8x128xf32>
    %90 = arith.index_cast %54 : i32 to index
    %c0_35 = arith.constant 0 : index
    %91 = vector.load %arg14[%90, %c0_35] : memref<64x128xf32, #tpu.memory_space<vmem>>, vector<8x128xf32>
    tpu.vector_store %arg14[%90, %c0_35], %89 {strides = array<i32>} : memref<64x128xf32, #tpu.memory_space<vmem>>, vector<8x128xf32>,
    %c2_i32 = arith.constant 2 : i32
    %c8_i32_36 = arith.constant 8 : i32
    %92 = arith.muli %c2_i32, %c8_i32_36 : i32
    %93 = tpu.assume_multiple %92, 8 : i32
    %94 = arith.index_cast %93 : i32 to index
    %c0_37 = arith.constant 0 : index
    %95 = vector.load %arg13[%94, %c0_37] : memref<64x512xf32, #tpu.memory_space<vmem>>, vector<8x512xf32>
    %cst_38 = arith.constant dense<0.000000e+00> : vector<8x512xf32>
    %96 = tpu.matmul %89, %11, %cst_38 {dimension_numbers = #tpu.dot_dimension_numbers<[1], [0], [0], [1], [0, 0, 1, 1], [], []>} : vector<8x128xf32>, vector<128x512xf32>, vector<8x512xf32> -> vector<8x512xf32>
    %97 = arith.addf %95, %96 : vector<8x512xf32>
    %98 = arith.index_cast %93 : i32 to index
    %c0_39 = arith.constant 0 : index
    %99 = vector.load %arg13[%98, %c0_39] : memref<64x512xf32, #tpu.memory_space<vmem>>, vector<8x512xf32>
    tpu.vector_store %arg13[%98, %c0_39], %97 {strides = array<i32>} : memref<64x512xf32, #tpu.memory_space<vmem>>, vector<8x512xf32>,
    %100 = arith.index_cast %93 : i32 to index
    %c0_40 = arith.constant 0 : index
    %101 = vector.load %arg13[%100, %c0_40] : memref<64x512xf32, #tpu.memory_space<vmem>>, vector<8x128xf32>
    %102 = arith.negf %101 : vector<8x128xf32>
    %103 = math.exp %102 : vector<8x128xf32>
    %cst_41 = arith.constant 1.000000e+00 : f32
    %104 = vector.broadcast %cst_41 : f32 to vector<8x128xf32>
    %105 = arith.addf %104, %103 : vector<8x128xf32>
    %106 = arith.divf %104, %105 : vector<8x128xf32>
    %107 = arith.index_cast %93 : i32 to index
    %c128_42 = arith.constant 128 : index
    %108 = vector.load %arg13[%107, %c128_42] : memref<64x512xf32, #tpu.memory_space<vmem>>, vector<8x128xf32>
    %109 = arith.negf %108 : vector<8x128xf32>
    %110 = math.exp %109 : vector<8x128xf32>
    %cst_43 = arith.constant 1.000000e+00 : f32
    %111 = vector.broadcast %cst_43 : f32 to vector<8x128xf32>
    %112 = arith.addf %111, %110 : vector<8x128xf32>
    %113 = arith.divf %111, %112 : vector<8x128xf32>
    %114 = arith.index_cast %93 : i32 to index
    %c256_44 = arith.constant 256 : index
    %115 = vector.load %arg13[%114, %c256_44] : memref<64x512xf32, #tpu.memory_space<vmem>>, vector<8x128xf32>
    %116 = math.tanh %115 : vector<8x128xf32>
    %117 = arith.index_cast %93 : i32 to index
    %c384_45 = arith.constant 384 : index
    %118 = vector.load %arg13[%117, %c384_45] : memref<64x512xf32, #tpu.memory_space<vmem>>, vector<8x128xf32>
    %119 = arith.negf %118 : vector<8x128xf32>
    %120 = math.exp %119 : vector<8x128xf32>
    %cst_46 = arith.constant 1.000000e+00 : f32
    %121 = vector.broadcast %cst_46 : f32 to vector<8x128xf32>
    %122 = arith.addf %121, %120 : vector<8x128xf32>
    %123 = arith.divf %121, %122 : vector<8x128xf32>
    %124 = arith.mulf %113, %87 : vector<8x128xf32>
    %125 = arith.mulf %106, %116 : vector<8x128xf32>
    %126 = arith.addf %124, %125 : vector<8x128xf32>
    %127 = math.tanh %126 : vector<8x128xf32>
    %128 = arith.mulf %123, %127 : vector<8x128xf32>
    %129 = arith.index_cast %93 : i32 to index
    %c0_47 = arith.constant 0 : index
    %130 = vector.load %arg14[%129, %c0_47] : memref<64x128xf32, #tpu.memory_space<vmem>>, vector<8x128xf32>
    tpu.vector_store %arg14[%129, %c0_47], %128 {strides = array<i32>} : memref<64x128xf32, #tpu.memory_space<vmem>>, vector<8x128xf32>,
    %c3_i32 = arith.constant 3 : i32
    %c8_i32_48 = arith.constant 8 : i32
    %131 = arith.muli %c3_i32, %c8_i32_48 : i32
    %132 = tpu.assume_multiple %131, 8 : i32
    %133 = arith.index_cast %132 : i32 to index
    %c0_49 = arith.constant 0 : index
    %134 = vector.load %arg13[%133, %c0_49] : memref<64x512xf32, #tpu.memory_space<vmem>>, vector<8x512xf32>
    %cst_50 = arith.constant dense<0.000000e+00> : vector<8x512xf32>
    %135 = tpu.matmul %128, %11, %cst_50 {dimension_numbers = #tpu.dot_dimension_numbers<[1], [0], [0], [1], [0, 0, 1, 1], [], []>} : vector<8x128xf32>, vector<128x512xf32>, vector<8x512xf32> -> vector<8x512xf32>
    %136 = arith.addf %134, %135 : vector<8x512xf32>
    %137 = arith.index_cast %132 : i32 to index
    %c0_51 = arith.constant 0 : index
    %138 = vector.load %arg13[%137, %c0_51] : memref<64x512xf32, #tpu.memory_space<vmem>>, vector<8x512xf32>
    tpu.vector_store %arg13[%137, %c0_51], %136 {strides = array<i32>} : memref<64x512xf32, #tpu.memory_space<vmem>>, vector<8x512xf32>,
    %139 = arith.index_cast %132 : i32 to index
    %c0_52 = arith.constant 0 : index
    %140 = vector.load %arg13[%139, %c0_52] : memref<64x512xf32, #tpu.memory_space<vmem>>, vector<8x128xf32>
    %141 = arith.negf %140 : vector<8x128xf32>
    %142 = math.exp %141 : vector<8x128xf32>
    %cst_53 = arith.constant 1.000000e+00 : f32
    %143 = vector.broadcast %cst_53 : f32 to vector<8x128xf32>
    %144 = arith.addf %143, %142 : vector<8x128xf32>
    %145 = arith.divf %143, %144 : vector<8x128xf32>
    %146 = arith.index_cast %132 : i32 to index
    %c128_54 = arith.constant 128 : index
    %147 = vector.load %arg13[%146, %c128_54] : memref<64x512xf32, #tpu.memory_space<vmem>>, vector<8x128xf32>
    %148 = arith.negf %147 : vector<8x128xf32>
    %149 = math.exp %148 : vector<8x128xf32>
    %cst_55 = arith.constant 1.000000e+00 : f32
    %150 = vector.broadcast %cst_55 : f32 to vector<8x128xf32>
    %151 = arith.addf %150, %149 : vector<8x128xf32>
    %152 = arith.divf %150, %151 : vector<8x128xf32>
    %153 = arith.index_cast %132 : i32 to index
    %c256_56 = arith.constant 256 : index
    %154 = vector.load %arg13[%153, %c256_56] : memref<64x512xf32, #tpu.memory_space<vmem>>, vector<8x128xf32>
    %155 = math.tanh %154 : vector<8x128xf32>
    %156 = arith.index_cast %132 : i32 to index
    %c384_57 = arith.constant 384 : index
    %157 = vector.load %arg13[%156, %c384_57] : memref<64x512xf32, #tpu.memory_space<vmem>>, vector<8x128xf32>
    %158 = arith.negf %157 : vector<8x128xf32>
    %159 = math.exp %158 : vector<8x128xf32>
    %cst_58 = arith.constant 1.000000e+00 : f32
    %160 = vector.broadcast %cst_58 : f32 to vector<8x128xf32>
    %161 = arith.addf %160, %159 : vector<8x128xf32>
    %162 = arith.divf %160, %161 : vector<8x128xf32>
    %163 = arith.mulf %152, %126 : vector<8x128xf32>
    %164 = arith.mulf %145, %155 : vector<8x128xf32>
    %165 = arith.addf %163, %164 : vector<8x128xf32>
    %166 = math.tanh %165 : vector<8x128xf32>
    %167 = arith.mulf %162, %166 : vector<8x128xf32>
    %168 = arith.index_cast %132 : i32 to index
    %c0_59 = arith.constant 0 : index
    %169 = vector.load %arg14[%168, %c0_59] : memref<64x128xf32, #tpu.memory_space<vmem>>, vector<8x128xf32>
    tpu.vector_store %arg14[%168, %c0_59], %167 {strides = array<i32>} : memref<64x128xf32, #tpu.memory_space<vmem>>, vector<8x128xf32>,
    %c4_i32 = arith.constant 4 : i32
    %c8_i32_60 = arith.constant 8 : i32
    %170 = arith.muli %c4_i32, %c8_i32_60 : i32
    %171 = tpu.assume_multiple %170, 8 : i32
    %172 = arith.index_cast %171 : i32 to index
    %c0_61 = arith.constant 0 : index
    %173 = vector.load %arg13[%172, %c0_61] : memref<64x512xf32, #tpu.memory_space<vmem>>, vector<8x512xf32>
    %cst_62 = arith.constant dense<0.000000e+00> : vector<8x512xf32>
    %174 = tpu.matmul %167, %11, %cst_62 {dimension_numbers = #tpu.dot_dimension_numbers<[1], [0], [0], [1], [0, 0, 1, 1], [], []>} : vector<8x128xf32>, vector<128x512xf32>, vector<8x512xf32> -> vector<8x512xf32>
    %175 = arith.addf %173, %174 : vector<8x512xf32>
    %176 = arith.index_cast %171 : i32 to index
    %c0_63 = arith.constant 0 : index
    %177 = vector.load %arg13[%176, %c0_63] : memref<64x512xf32, #tpu.memory_space<vmem>>, vector<8x512xf32>
    tpu.vector_store %arg13[%176, %c0_63], %175 {strides = array<i32>} : memref<64x512xf32, #tpu.memory_space<vmem>>, vector<8x512xf32>,
    %178 = arith.index_cast %171 : i32 to index
    %c0_64 = arith.constant 0 : index
    %179 = vector.load %arg13[%178, %c0_64] : memref<64x512xf32, #tpu.memory_space<vmem>>, vector<8x128xf32>
    %180 = arith.negf %179 : vector<8x128xf32>
    %181 = math.exp %180 : vector<8x128xf32>
    %cst_65 = arith.constant 1.000000e+00 : f32
    %182 = vector.broadcast %cst_65 : f32 to vector<8x128xf32>
    %183 = arith.addf %182, %181 : vector<8x128xf32>
    %184 = arith.divf %182, %183 : vector<8x128xf32>
    %185 = arith.index_cast %171 : i32 to index
    %c128_66 = arith.constant 128 : index
    %186 = vector.load %arg13[%185, %c128_66] : memref<64x512xf32, #tpu.memory_space<vmem>>, vector<8x128xf32>
    %187 = arith.negf %186 : vector<8x128xf32>
    %188 = math.exp %187 : vector<8x128xf32>
    %cst_67 = arith.constant 1.000000e+00 : f32
    %189 = vector.broadcast %cst_67 : f32 to vector<8x128xf32>
    %190 = arith.addf %189, %188 : vector<8x128xf32>
    %191 = arith.divf %189, %190 : vector<8x128xf32>
    %192 = arith.index_cast %171 : i32 to index
    %c256_68 = arith.constant 256 : index
    %193 = vector.load %arg13[%192, %c256_68] : memref<64x512xf32, #tpu.memory_space<vmem>>, vector<8x128xf32>
    %194 = math.tanh %193 : vector<8x128xf32>
    %195 = arith.index_cast %171 : i32 to index
    %c384_69 = arith.constant 384 : index
    %196 = vector.load %arg13[%195, %c384_69] : memref<64x512xf32, #tpu.memory_space<vmem>>, vector<8x128xf32>
    %197 = arith.negf %196 : vector<8x128xf32>
    %198 = math.exp %197 : vector<8x128xf32>
    %cst_70 = arith.constant 1.000000e+00 : f32
    %199 = vector.broadcast %cst_70 : f32 to vector<8x128xf32>
    %200 = arith.addf %199, %198 : vector<8x128xf32>
    %201 = arith.divf %199, %200 : vector<8x128xf32>
    %202 = arith.mulf %191, %165 : vector<8x128xf32>
    %203 = arith.mulf %184, %194 : vector<8x128xf32>
    %204 = arith.addf %202, %203 : vector<8x128xf32>
    %205 = math.tanh %204 : vector<8x128xf32>
    %206 = arith.mulf %201, %205 : vector<8x128xf32>
    %207 = arith.index_cast %171 : i32 to index
    %c0_71 = arith.constant 0 : index
    %208 = vector.load %arg14[%207, %c0_71] : memref<64x128xf32, #tpu.memory_space<vmem>>, vector<8x128xf32>
    tpu.vector_store %arg14[%207, %c0_71], %206 {strides = array<i32>} : memref<64x128xf32, #tpu.memory_space<vmem>>, vector<8x128xf32>,
    %c5_i32 = arith.constant 5 : i32
    %c8_i32_72 = arith.constant 8 : i32
    %209 = arith.muli %c5_i32, %c8_i32_72 : i32
    %210 = tpu.assume_multiple %209, 8 : i32
    %211 = arith.index_cast %210 : i32 to index
    %c0_73 = arith.constant 0 : index
    %212 = vector.load %arg13[%211, %c0_73] : memref<64x512xf32, #tpu.memory_space<vmem>>, vector<8x512xf32>
    %cst_74 = arith.constant dense<0.000000e+00> : vector<8x512xf32>
    %213 = tpu.matmul %206, %11, %cst_74 {dimension_numbers = #tpu.dot_dimension_numbers<[1], [0], [0], [1], [0, 0, 1, 1], [], []>} : vector<8x128xf32>, vector<128x512xf32>, vector<8x512xf32> -> vector<8x512xf32>
    %214 = arith.addf %212, %213 : vector<8x512xf32>
    %215 = arith.index_cast %210 : i32 to index
    %c0_75 = arith.constant 0 : index
    %216 = vector.load %arg13[%215, %c0_75] : memref<64x512xf32, #tpu.memory_space<vmem>>, vector<8x512xf32>
    tpu.vector_store %arg13[%215, %c0_75], %214 {strides = array<i32>} : memref<64x512xf32, #tpu.memory_space<vmem>>, vector<8x512xf32>,
    %217 = arith.index_cast %210 : i32 to index
    %c0_76 = arith.constant 0 : index
    %218 = vector.load %arg13[%217, %c0_76] : memref<64x512xf32, #tpu.memory_space<vmem>>, vector<8x128xf32>
    %219 = arith.negf %218 : vector<8x128xf32>
    %220 = math.exp %219 : vector<8x128xf32>
    %cst_77 = arith.constant 1.000000e+00 : f32
    %221 = vector.broadcast %cst_77 : f32 to vector<8x128xf32>
    %222 = arith.addf %221, %220 : vector<8x128xf32>
    %223 = arith.divf %221, %222 : vector<8x128xf32>
    %224 = arith.index_cast %210 : i32 to index
    %c128_78 = arith.constant 128 : index
    %225 = vector.load %arg13[%224, %c128_78] : memref<64x512xf32, #tpu.memory_space<vmem>>, vector<8x128xf32>
    %226 = arith.negf %225 : vector<8x128xf32>
    %227 = math.exp %226 : vector<8x128xf32>
    %cst_79 = arith.constant 1.000000e+00 : f32
    %228 = vector.broadcast %cst_79 : f32 to vector<8x128xf32>
    %229 = arith.addf %228, %227 : vector<8x128xf32>
    %230 = arith.divf %228, %229 : vector<8x128xf32>
    %231 = arith.index_cast %210 : i32 to index
    %c256_80 = arith.constant 256 : index
    %232 = vector.load %arg13[%231, %c256_80] : memref<64x512xf32, #tpu.memory_space<vmem>>, vector<8x128xf32>
    %233 = math.tanh %232 : vector<8x128xf32>
    %234 = arith.index_cast %210 : i32 to index
    %c384_81 = arith.constant 384 : index
    %235 = vector.load %arg13[%234, %c384_81] : memref<64x512xf32, #tpu.memory_space<vmem>>, vector<8x128xf32>
    %236 = arith.negf %235 : vector<8x128xf32>
    %237 = math.exp %236 : vector<8x128xf32>
    %cst_82 = arith.constant 1.000000e+00 : f32
    %238 = vector.broadcast %cst_82 : f32 to vector<8x128xf32>
    %239 = arith.addf %238, %237 : vector<8x128xf32>
    %240 = arith.divf %238, %239 : vector<8x128xf32>
    %241 = arith.mulf %230, %204 : vector<8x128xf32>
    %242 = arith.mulf %223, %233 : vector<8x128xf32>
    %243 = arith.addf %241, %242 : vector<8x128xf32>
    %244 = math.tanh %243 : vector<8x128xf32>
    %245 = arith.mulf %240, %244 : vector<8x128xf32>
    %246 = arith.index_cast %210 : i32 to index
    %c0_83 = arith.constant 0 : index
    %247 = vector.load %arg14[%246, %c0_83] : memref<64x128xf32, #tpu.memory_space<vmem>>, vector<8x128xf32>
    tpu.vector_store %arg14[%246, %c0_83], %245 {strides = array<i32>} : memref<64x128xf32, #tpu.memory_space<vmem>>, vector<8x128xf32>,
    %c6_i32 = arith.constant 6 : i32
    %c8_i32_84 = arith.constant 8 : i32
    %248 = arith.muli %c6_i32, %c8_i32_84 : i32
    %249 = tpu.assume_multiple %248, 8 : i32
    %250 = arith.index_cast %249 : i32 to index
    %c0_85 = arith.constant 0 : index
    %251 = vector.load %arg13[%250, %c0_85] : memref<64x512xf32, #tpu.memory_space<vmem>>, vector<8x512xf32>
    %cst_86 = arith.constant dense<0.000000e+00> : vector<8x512xf32>
    %252 = tpu.matmul %245, %11, %cst_86 {dimension_numbers = #tpu.dot_dimension_numbers<[1], [0], [0], [1], [0, 0, 1, 1], [], []>} : vector<8x128xf32>, vector<128x512xf32>, vector<8x512xf32> -> vector<8x512xf32>
    %253 = arith.addf %251, %252 : vector<8x512xf32>
    %254 = arith.index_cast %249 : i32 to index
    %c0_87 = arith.constant 0 : index
    %255 = vector.load %arg13[%254, %c0_87] : memref<64x512xf32, #tpu.memory_space<vmem>>, vector<8x512xf32>
    tpu.vector_store %arg13[%254, %c0_87], %253 {strides = array<i32>} : memref<64x512xf32, #tpu.memory_space<vmem>>, vector<8x512xf32>,
    %256 = arith.index_cast %249 : i32 to index
    %c0_88 = arith.constant 0 : index
    %257 = vector.load %arg13[%256, %c0_88] : memref<64x512xf32, #tpu.memory_space<vmem>>, vector<8x128xf32>
    %258 = arith.negf %257 : vector<8x128xf32>
    %259 = math.exp %258 : vector<8x128xf32>
    %cst_89 = arith.constant 1.000000e+00 : f32
    %260 = vector.broadcast %cst_89 : f32 to vector<8x128xf32>
    %261 = arith.addf %260, %259 : vector<8x128xf32>
    %262 = arith.divf %260, %261 : vector<8x128xf32>
    %263 = arith.index_cast %249 : i32 to index
    %c128_90 = arith.constant 128 : index
    %264 = vector.load %arg13[%263, %c128_90] : memref<64x512xf32, #tpu.memory_space<vmem>>, vector<8x128xf32>
    %265 = arith.negf %264 : vector<8x128xf32>
    %266 = math.exp %265 : vector<8x128xf32>
    %cst_91 = arith.constant 1.000000e+00 : f32
    %267 = vector.broadcast %cst_91 : f32 to vector<8x128xf32>
    %268 = arith.addf %267, %266 : vector<8x128xf32>
    %269 = arith.divf %267, %268 : vector<8x128xf32>
    %270 = arith.index_cast %249 : i32 to index
    %c256_92 = arith.constant 256 : index
    %271 = vector.load %arg13[%270, %c256_92] : memref<64x512xf32, #tpu.memory_space<vmem>>, vector<8x128xf32>
    %272 = math.tanh %271 : vector<8x128xf32>
    %273 = arith.index_cast %249 : i32 to index
    %c384_93 = arith.constant 384 : index
    %274 = vector.load %arg13[%273, %c384_93] : memref<64x512xf32, #tpu.memory_space<vmem>>, vector<8x128xf32>
    %275 = arith.negf %274 : vector<8x128xf32>
    %276 = math.exp %275 : vector<8x128xf32>
    %cst_94 = arith.constant 1.000000e+00 : f32
    %277 = vector.broadcast %cst_94 : f32 to vector<8x128xf32>
    %278 = arith.addf %277, %276 : vector<8x128xf32>
    %279 = arith.divf %277, %278 : vector<8x128xf32>
    %280 = arith.mulf %269, %243 : vector<8x128xf32>
    %281 = arith.mulf %262, %272 : vector<8x128xf32>
    %282 = arith.addf %280, %281 : vector<8x128xf32>
    %283 = math.tanh %282 : vector<8x128xf32>
    %284 = arith.mulf %279, %283 : vector<8x128xf32>
    %285 = arith.index_cast %249 : i32 to index
    %c0_95 = arith.constant 0 : index
    %286 = vector.load %arg14[%285, %c0_95] : memref<64x128xf32, #tpu.memory_space<vmem>>, vector<8x128xf32>
    tpu.vector_store %arg14[%285, %c0_95], %284 {strides = array<i32>} : memref<64x128xf32, #tpu.memory_space<vmem>>, vector<8x128xf32>,
    %c7_i32 = arith.constant 7 : i32
    %c8_i32_96 = arith.constant 8 : i32
    %287 = arith.muli %c7_i32, %c8_i32_96 : i32
    %288 = tpu.assume_multiple %287, 8 : i32
    %289 = arith.index_cast %288 : i32 to index
    %c0_97 = arith.constant 0 : index
    %290 = vector.load %arg13[%289, %c0_97] : memref<64x512xf32, #tpu.memory_space<vmem>>, vector<8x512xf32>
    %cst_98 = arith.constant dense<0.000000e+00> : vector<8x512xf32>
    %291 = tpu.matmul %284, %11, %cst_98 {dimension_numbers = #tpu.dot_dimension_numbers<[1], [0], [0], [1], [0, 0, 1, 1], [], []>} : vector<8x128xf32>, vector<128x512xf32>, vector<8x512xf32> -> vector<8x512xf32>
    %292 = arith.addf %290, %291 : vector<8x512xf32>
    %293 = arith.index_cast %288 : i32 to index
    %c0_99 = arith.constant 0 : index
    %294 = vector.load %arg13[%293, %c0_99] : memref<64x512xf32, #tpu.memory_space<vmem>>, vector<8x512xf32>
    tpu.vector_store %arg13[%293, %c0_99], %292 {strides = array<i32>} : memref<64x512xf32, #tpu.memory_space<vmem>>, vector<8x512xf32>,
    %295 = arith.index_cast %288 : i32 to index
    %c0_100 = arith.constant 0 : index
    %296 = vector.load %arg13[%295, %c0_100] : memref<64x512xf32, #tpu.memory_space<vmem>>, vector<8x128xf32>
    %297 = arith.negf %296 : vector<8x128xf32>
    %298 = math.exp %297 : vector<8x128xf32>
    %cst_101 = arith.constant 1.000000e+00 : f32
    %299 = vector.broadcast %cst_101 : f32 to vector<8x128xf32>
    %300 = arith.addf %299, %298 : vector<8x128xf32>
    %301 = arith.divf %299, %300 : vector<8x128xf32>
    %302 = arith.index_cast %288 : i32 to index
    %c128_102 = arith.constant 128 : index
    %303 = vector.load %arg13[%302, %c128_102] : memref<64x512xf32, #tpu.memory_space<vmem>>, vector<8x128xf32>
    %304 = arith.negf %303 : vector<8x128xf32>
    %305 = math.exp %304 : vector<8x128xf32>
    %cst_103 = arith.constant 1.000000e+00 : f32
    %306 = vector.broadcast %cst_103 : f32 to vector<8x128xf32>
    %307 = arith.addf %306, %305 : vector<8x128xf32>
    %308 = arith.divf %306, %307 : vector<8x128xf32>
    %309 = arith.index_cast %288 : i32 to index
    %c256_104 = arith.constant 256 : index
    %310 = vector.load %arg13[%309, %c256_104] : memref<64x512xf32, #tpu.memory_space<vmem>>, vector<8x128xf32>
    %311 = math.tanh %310 : vector<8x128xf32>
    %312 = arith.index_cast %288 : i32 to index
    %c384_105 = arith.constant 384 : index
    %313 = vector.load %arg13[%312, %c384_105] : memref<64x512xf32, #tpu.memory_space<vmem>>, vector<8x128xf32>
    %314 = arith.negf %313 : vector<8x128xf32>
    %315 = math.exp %314 : vector<8x128xf32>
    %cst_106 = arith.constant 1.000000e+00 : f32
    %316 = vector.broadcast %cst_106 : f32 to vector<8x128xf32>
    %317 = arith.addf %316, %315 : vector<8x128xf32>
    %318 = arith.divf %316, %317 : vector<8x128xf32>
    %319 = arith.mulf %308, %282 : vector<8x128xf32>
    %320 = arith.mulf %301, %311 : vector<8x128xf32>
    %321 = arith.addf %319, %320 : vector<8x128xf32>
    %322 = math.tanh %321 : vector<8x128xf32>
    %323 = arith.mulf %318, %322 : vector<8x128xf32>
    %324 = arith.index_cast %288 : i32 to index
    %c0_107 = arith.constant 0 : index
    %325 = vector.load %arg14[%324, %c0_107] : memref<64x128xf32, #tpu.memory_space<vmem>>, vector<8x128xf32>
    tpu.vector_store %arg14[%324, %c0_107], %323 {strides = array<i32>} : memref<64x128xf32, #tpu.memory_space<vmem>>, vector<8x128xf32>,
    %c8_i32_108 = arith.constant 8 : i32
    %c0_109 = arith.constant 0 : index
    %c0_110 = arith.constant 0 : index
    %326 = vector.load %arg15[%c0_109, %c0_110] : memref<8x128xf32, #tpu.memory_space<vmem>>, vector<8x128xf32>
    tpu.vector_store %arg15[%c0_109, %c0_110], %323 {strides = array<i32>} : memref<8x128xf32, #tpu.memory_space<vmem>>, vector<8x128xf32>,
    %c0_111 = arith.constant 0 : index
    %c0_112 = arith.constant 0 : index
    %327 = vector.load %arg16[%c0_111, %c0_112] : memref<8x128xf32, #tpu.memory_space<vmem>>, vector<8x128xf32>
    tpu.vector_store %arg16[%c0_111, %c0_112], %321 {strides = array<i32>} : memref<8x128xf32, #tpu.memory_space<vmem>>, vector<8x128xf32>,
    %c0_113 = arith.constant 0 : index
    %c0_114 = arith.constant 0 : index
    %328 = vector.load %arg14[%c0_113, %c0_114] : memref<64x128xf32, #tpu.memory_space<vmem>>, vector<64x128xf32>
    %c0_115 = arith.constant 0 : index
    %c0_116 = arith.constant 0 : index
    %329 = vector.load %arg6[%c0_115, %c0_116] : memref<128x128xf32, #tpu.memory_space<vmem>>, vector<128x128xf32>
    %cst_117 = arith.constant dense<0.000000e+00> : vector<64x128xf32>
    %330 = tpu.matmul %328, %329, %cst_117 {dimension_numbers = #tpu.dot_dimension_numbers<[1], [0], [0], [1], [0, 0, 1, 1], [], []>} : vector<64x128xf32>, vector<128x128xf32>, vector<64x128xf32> -> vector<64x128xf32>
    %c0_118 = arith.constant 0 : index
    %c0_119 = arith.constant 0 : index
    %331 = vector.load %arg7[%c0_118, %c0_119] : memref<1x128xf32, #tpu.memory_space<vmem>>, vector<1x128xf32>
    %332 = vector.broadcast %331 : vector<1x128xf32> to vector<64x128xf32>
    %333 = arith.addf %330, %332 : vector<64x128xf32>
    %cst_120 = arith.constant 0.000000e+00 : f32
    %334 = vector.broadcast %cst_120 : f32 to vector<64x128xf32>
    %335 = arith.maximumf %333, %334 : vector<64x128xf32>
    %c0_121 = arith.constant 0 : index
    %c0_122 = arith.constant 0 : index
    %336 = vector.load %arg8[%c0_121, %c0_122] : memref<1x128xf32, #tpu.memory_space<vmem>>, vector<1x128xf32>
    %337 = vector.broadcast %336 : vector<1x128xf32> to vector<64x128xf32>
    %338 = arith.mulf %335, %337 : vector<64x128xf32>
    %cst_123 = arith.constant dense<0.000000e+00> : vector<64xf32>
    %339 = vector.multi_reduction <add>, %338, %cst_123 [1] : vector<64x128xf32> to vector<64xf32>
    %340 = vector.shape_cast %339 : vector<64xf32> to vector<64x1xf32>
    %c0_124 = arith.constant 0 : index
    %c0_125 = arith.constant 0 : index
    %341 = vector.load %arg9[%c0_124, %c0_125] : memref<1x1xf32, #tpu.memory_space<vmem>>, vector<1x1xf32>
    %342 = vector.extract %341[0, 0] : f32 from vector<1x1xf32>
    %343 = vector.broadcast %342 : f32 to vector<64x1xf32>
    %344 = arith.addf %340, %343 : vector<64x1xf32>
    %345 = vector.shape_cast %344 : vector<64x1xf32> to vector<8x8x1xf32>
    %c0_126 = arith.constant 0 : index
    %c0_127 = arith.constant 0 : index
    %346 = vector.load %arg18[%c0_126, %c0_127] : memref<8x1xf32, #tpu.memory_space<vmem>>, vector<8x1xf32>
    %cst_128 = arith.constant dense<0xFF800000> : vector<8x1xf32>
    %347 = vector.multi_reduction <maximumf>, %345, %cst_128 [0] : vector<8x8x1xf32> to vector<8x1xf32>
    %348 = arith.maximumf %346, %347 : vector<8x1xf32>
    %349 = arith.subf %346, %348 : vector<8x1xf32>
    %350 = math.exp %349 : vector<8x1xf32>
    %351 = vector.shape_cast %348 : vector<8x1xf32> to vector<1x8x1xf32>
    %352 = vector.broadcast %351 : vector<1x8x1xf32> to vector<8x8x1xf32>
    %353 = arith.subf %345, %352 : vector<8x8x1xf32>
    %354 = math.exp %353 : vector<8x8x1xf32>
    %c0_129 = arith.constant 0 : index
    %c0_130 = arith.constant 0 : index
    %355 = vector.load %arg19[%c0_129, %c0_130] : memref<8x1xf32, #tpu.memory_space<vmem>>, vector<8x1xf32>
    %356 = arith.mulf %350, %355 : vector<8x1xf32>
    %cst_131 = arith.constant dense<0.000000e+00> : vector<8x1xf32>
    %357 = vector.multi_reduction <add>, %354, %cst_131 [0] : vector<8x8x1xf32> to vector<8x1xf32>
    %358 = arith.addf %356, %357 : vector<8x1xf32>
    %c0_132 = arith.constant 0 : index
    %c0_133 = arith.constant 0 : index
    %359 = vector.load %arg19[%c0_132, %c0_133] : memref<8x1xf32, #tpu.memory_space<vmem>>, vector<8x1xf32>
    tpu.vector_store %arg19[%c0_132, %c0_133], %358 {strides = array<i32>} : memref<8x1xf32, #tpu.memory_space<vmem>>, vector<8x1xf32>,
    %360 = vector.shape_cast %328 : vector<64x128xf32> to vector<8x8x128xf32>
    %c0_134 = arith.constant 0 : index
    %c0_135 = arith.constant 0 : index
    %361 = vector.load %arg17[%c0_134, %c0_135] : memref<8x128xf32, #tpu.memory_space<vmem>>, vector<8x128xf32>
    %362 = vector.broadcast %350 : vector<8x1xf32> to vector<8x128xf32>
    %363 = arith.mulf %362, %361 : vector<8x128xf32>
    %364 = vector.broadcast %354 : vector<8x8x1xf32> to vector<8x8x128xf32>
    %365 = arith.mulf %364, %360 : vector<8x8x128xf32>
    %cst_136 = arith.constant dense<0.000000e+00> : vector<8x128xf32>
    %366 = vector.multi_reduction <add>, %365, %cst_136 [0] : vector<8x8x128xf32> to vector<8x128xf32>
    %367 = arith.addf %363, %366 : vector<8x128xf32>
    %c0_137 = arith.constant 0 : index
    %c0_138 = arith.constant 0 : index
    %368 = vector.load %arg17[%c0_137, %c0_138] : memref<8x128xf32, #tpu.memory_space<vmem>>, vector<8x128xf32>
    tpu.vector_store %arg17[%c0_137, %c0_138], %367 {strides = array<i32>} : memref<8x128xf32, #tpu.memory_space<vmem>>, vector<8x128xf32>,
    %c0_139 = arith.constant 0 : index
    %c0_140 = arith.constant 0 : index
    %369 = vector.load %arg18[%c0_139, %c0_140] : memref<8x1xf32, #tpu.memory_space<vmem>>, vector<8x1xf32>
    tpu.vector_store %arg18[%c0_139, %c0_140], %348 {strides = array<i32>} : memref<8x1xf32, #tpu.memory_space<vmem>>, vector<8x1xf32>,
    %c0_i32_141 = arith.constant 0 : i32
    %370 = arith.cmpi eq, %arg1, %c0_i32_141 : i32
    %371 = arith.extui %370 : i1 to i32
    %c0_i32_142 = arith.constant 0 : i32
    %372 = arith.cmpi ne, %371, %c0_i32_142 : i32
    scf.if %372 {
      %c0_143 = arith.constant 0 : index
      %c0_144 = arith.constant 0 : index
      %373 = vector.load %arg19[%c0_143, %c0_144] : memref<8x1xf32, #tpu.memory_space<vmem>>, vector<8x1xf32>
      %374 = tpu.reciprocal %373 {approx = true} : vector<8x1xf32> -> vector<8x1xf32>
      %375 = arith.mulf %373, %374 : vector<8x1xf32>
      %cst_145 = arith.constant 2.000000e+00 : f32
      %376 = vector.broadcast %cst_145 : f32 to vector<8x1xf32>
      %377 = arith.subf %376, %375 : vector<8x1xf32>
      %378 = arith.mulf %374, %377 : vector<8x1xf32>
      %c0_146 = arith.constant 0 : index
      %c0_147 = arith.constant 0 : index
      %379 = vector.load %arg17[%c0_146, %c0_147] : memref<8x128xf32, #tpu.memory_space<vmem>>, vector<8x128xf32>
      %380 = vector.broadcast %378 : vector<8x1xf32> to vector<8x128xf32>
      %381 = arith.mulf %379, %380 : vector<8x128xf32>
      %c0_148 = arith.constant 0 : index
      %c0_149 = arith.constant 0 : index
      %382 = vector.load %arg10[%c0_148, %c0_149] : memref<128x128xf32, #tpu.memory_space<vmem>>, vector<128x128xf32>
      %cst_150 = arith.constant dense<0.000000e+00> : vector<8x128xf32>
      %383 = tpu.matmul %381, %382, %cst_150 {dimension_numbers = #tpu.dot_dimension_numbers<[1], [0], [0], [1], [0, 0, 1, 1], [], []>} : vector<8x128xf32>, vector<128x128xf32>, vector<8x128xf32> -> vector<8x128xf32>
      %c0_151 = arith.constant 0 : index
      %c0_152 = arith.constant 0 : index
      %384 = vector.load %arg11[%c0_151, %c0_152] : memref<1x128xf32, #tpu.memory_space<vmem>>, vector<1x128xf32>
      %385 = vector.broadcast %384 : vector<1x128xf32> to vector<8x128xf32>
      %386 = arith.addf %383, %385 : vector<8x128xf32>
      %c0_153 = arith.constant 0 : index
      %c0_154 = arith.constant 0 : index
      %387 = vector.load %arg12[%c0_153, %c0_154] : memref<8x128xf32, #tpu.memory_space<vmem>>, vector<8x128xf32>
      tpu.vector_store %arg12[%c0_153, %c0_154], %386 {strides = array<i32>} : memref<8x128xf32, #tpu.memory_space<vmem>>, vector<8x128xf32>,
    } else {
    }
    return
  }
  func.func @transform_0(%arg0: i32, %arg1: i32) -> (i32, i32, i32) {
    %c0_i32 = arith.constant 0 : i32
    %c0_i32_0 = arith.constant 0 : i32
    return %arg1, %arg0, %c0_i32 : i32, i32, i32
  }
  func.func @transform_1(%arg0: i32, %arg1: i32) -> (i32, i32) {
    %c0_i32 = arith.constant 0 : i32
    %c0_i32_0 = arith.constant 0 : i32
    %c0_i32_1 = arith.constant 0 : i32
    return %c0_i32, %c0_i32_0 : i32, i32
  }
  func.func @transform_2(%arg0: i32, %arg1: i32) -> (i32, i32) {
    %c0_i32 = arith.constant 0 : i32
    %c0_i32_0 = arith.constant 0 : i32
    %c0_i32_1 = arith.constant 0 : i32
    return %c0_i32, %c0_i32_0 : i32, i32
  }
  func.func @transform_3(%arg0: i32, %arg1: i32) -> (i32, i32) {
    %c0_i32 = arith.constant 0 : i32
    %c0_i32_0 = arith.constant 0 : i32
    %c0_i32_1 = arith.constant 0 : i32
    return %c0_i32, %c0_i32_0 : i32, i32
  }
  func.func @transform_4(%arg0: i32, %arg1: i32) -> (i32, i32) {
    %c0_i32 = arith.constant 0 : i32
    %c0_i32_0 = arith.constant 0 : i32
    %c0_i32_1 = arith.constant 0 : i32
    return %c0_i32, %c0_i32_0 : i32, i32
  }
  func.func @transform_5(%arg0: i32, %arg1: i32) -> (i32, i32) {
    %c0_i32 = arith.constant 0 : i32
    %c0_i32_0 = arith.constant 0 : i32
    %c0_i32_1 = arith.constant 0 : i32
    return %c0_i32, %c0_i32_0 : i32, i32
  }
  func.func @transform_6(%arg0: i32, %arg1: i32) -> (i32, i32) {
    %c0_i32 = arith.constant 0 : i32
    %c0_i32_0 = arith.constant 0 : i32
    %c0_i32_1 = arith.constant 0 : i32
    return %c0_i32, %c0_i32_0 : i32, i32
  }
  func.func @transform_7(%arg0: i32, %arg1: i32) -> (i32, i32) {
    %c0_i32 = arith.constant 0 : i32
    %c0_i32_0 = arith.constant 0 : i32
    %c0_i32_1 = arith.constant 0 : i32
    return %c0_i32, %c0_i32_0 : i32, i32
  }
  func.func @transform_8(%arg0: i32, %arg1: i32) -> (i32, i32) {
    %c0_i32 = arith.constant 0 : i32
    %c0_i32_0 = arith.constant 0 : i32
    %c0_i32_1 = arith.constant 0 : i32
    return %c0_i32, %c0_i32_0 : i32, i32
  }
  func.func @transform_9(%arg0: i32, %arg1: i32) -> (i32, i32) {
    %c0_i32 = arith.constant 0 : i32
    %c0_i32_0 = arith.constant 0 : i32
    %c0_i32_1 = arith.constant 0 : i32
    return %c0_i32, %c0_i32_0 : i32, i32
  }
  func.func @transform_10(%arg0: i32, %arg1: i32) -> (i32, i32) {
    %c0_i32 = arith.constant 0 : i32
    %c0_i32_0 = arith.constant 0 : i32
    return %arg0, %c0_i32 : i32, i32
  }
}

</mosaic_0001>

<bundles_post_ra>
// kernel: tpu_custom_call.1
= control target key start
LH: loop header
LB: loop body
LE: loop exit
PB: predicated region body
PF: predicated region fallthrough
CT: control target
= control target key end

     0   :  { %s4124_s0 = inlined_call_operand.hbm [shape: f32[8,8,32], index: 0, kind: input, shape index: {}]   ;;  %s4125_s1 = inlined_call_operand.hbm [shape: f32[32,512], index: 1, kind: input, shape index: {}]   ;;  %s4126_s2 = inlined_call_operand.hbm [shape: f32[128,512], index: 2, kind: input, shape index: {}]   ;;  %s4127_s3 = inlined_call_operand.vmem [shape: f32[1,512], index: 3, kind: input, shape index: {}]   ;;  %s4128_s4 = inlined_call_operand.hbm [shape: f32[128,128], index: 4, kind: input, shape index: {}]   ;;  %s4129_s5 = inlined_call_operand.vmem [shape: f32[1,128], index: 5, kind: input, shape index: {}]   ;;  %s4130_s6 = inlined_call_operand.vmem [shape: f32[1,128], index: 6, kind: input, shape index: {}]   ;;  %s4131_s7 = inlined_call_operand.<no memory space> [shape: f32[1,1], index: 7, kind: input, shape index: {}]   ;;  %s4132_s8 = inlined_call_operand.hbm [shape: f32[128,128], index: 8, kind: input, shape index: {}]   ;;  %s4133_s9 = inlined_call_operand.vmem [shape: f32[1,128], index: 9, kind: input, shape index: {}]   ;;  %s4134_s10 = inlined_call_operand.hbm [shape: f32[8,128], index: 10, kind: output, shape index: {}]  }
   0x1   :  { %v15_v0 = vstv %s4131_s7 }
   0x2   :  { %16 = vst [vmem:[#allocation9] sm:$0x1] %v15_v0 }
   0x3   :  { %17 = vsyncpa [#allocation11], 0 }
   0x4   :  { %18 = vsyncpa [#allocation14], 0 }
   0x5   :  { %19 = vsyncpa [#allocation17], 0 }
   0x6   :  { %20 = vsyncpa [#allocation12], 0  ;;  %s2969_s15 = smov [#allocation13]  }
   0x7   :  { %s38_s16 = sshll.u32 %s2969_s15, 4  ;;  %s39_s16 = int_to_ptr.vmem [resolvable:$true] %s38_s16 }
   0x8   :  { %s2849_s17 = scalar_lea.vmem %s39_s16, 2048  ;;  %p2854_p1 = scmp.lt.s32.totalorder %s39_s16, %s39_s16 }
   0x9   :  { %p2850_p0 = scmp.ne.s32.totalorder %s39_s16, %s2849_s17  ;;  %p2855_p2 = scmp.lt.s32.totalorder %s2849_s17, %s2849_s17 }
   0xb   :  { %p2856_p3 = por %p2855_p2, %p2854_p1 }
   0xd   :  { %p2857_p4 = pnand %p2856_p3, %p2850_p0 }
   0xf   :  { %2860 = shalt.err (!%p2857_p4)
}
  0x10   :  { %s2970_s18 = smov 512   ;;  %s2971_s19 = smov 32  }
  0x11   :  { %44 = dma.hbm_to_vmem [thread:$0]  %s4125_s1, 2048, %s39_s16, [#allocation14], %s2970_s18, %s2970_s18, %s2971_s19  }
  0x12   :  { %s2972_s21 = smov [#allocation16]   ;;  %s2973_s23 = smov [#allocation10]  }
  0x13   :  { %s64_s22 = sshll.u32 %s2972_s21, 4  ;;  %s26_s24 = sshll.u32 %s2973_s23, 4  ;;  %s65_s22 = int_to_ptr.vmem [resolvable:$true] %s64_s22  ;;  %s27_s24 = int_to_ptr.vmem [resolvable:$true] %s26_s24 }
  0x14   :  { %s2869_s25 = scalar_lea.vmem %s65_s22, 2048  ;;  %p2874_p6 = scmp.lt.s32.totalorder %s65_s22, %s65_s22 }
  0x15   :  { %p2870_p5 = scmp.ne.s32.totalorder %s65_s22, %s2869_s25  ;;  %p2875_p7 = scmp.lt.s32.totalorder %s2869_s25, %s2869_s25 }
  0x17   :  { %p2876_p8 = por %p2875_p7, %p2874_p6 }
  0x19   :  { %p2877_p9 = pnand %p2876_p8, %p2870_p5 }
  0x1b   :  { %2880 = shalt.err (!%p2877_p9)
}
  0x1c   :  { %s2974_s26 = smov 128   ;;  %s2975_s27 = smov 8  }
  0x1d   :  { %70 = dma.hbm_to_vmem [thread:$0]  %s4128_s4, 2048, %s65_s22, [#allocation17], %s2974_s26, %s2974_s26, %s2975_s27  }
  0x1e   :  { %s2889_s1 = scalar_lea.vmem %s27_s24, 1024  ;;  %p2894_p11 = scmp.lt.s32.totalorder %s27_s24, %s27_s24 }
  0x1f   :  { %p2890_p10 = scmp.ne.s32.totalorder %s27_s24, %s2889_s1  ;;  %p2895_p12 = scmp.lt.s32.totalorder %s2889_s1, %s2889_s1 }
  0x21   :  { %p2896_p13 = por %p2895_p12, %p2894_p11 }
  0x23   :  { %p2897_p0 = pnand %p2896_p13, %p2890_p10 }
  0x25   :  { %2900 = shalt.err (!%p2897_p0)
}
  0x26   :  { %32 = dma.hbm_to_vmem [thread:$0]  %s4124_s0, 1024, %s27_s24, [#allocation11], %s2974_s26, %s2974_s26, %s2975_s27  }
  0x27   :  { %s2976_s12 = smov [#allocation15]   ;;  %s2977_s14 = smov [#allocation18]  }
  0x28   :  { %s50_s13 = sshll.u32 %s2976_s12, 4  ;;  %s82_s4 = sshll.u32 %s2977_s14, 4  ;;  %s51_s13 = int_to_ptr.vmem [resolvable:$true] %s50_s13  ;;  %s83_s4 = int_to_ptr.vmem [resolvable:$true] %s82_s4 }
  0x29   :  { %s2909_s15 = scalar_lea.vmem %s51_s13, 8192  ;;  %p2914_p2 = scmp.lt.s32.totalorder %s51_s13, %s51_s13 }
  0x2a   :  { %p2910_p1 = scmp.ne.s32.totalorder %s51_s13, %s2909_s15  ;;  %p2915_p3 = scmp.lt.s32.totalorder %s2909_s15, %s2909_s15 }
  0x2c   :  { %p2916_p4 = por %p2915_p3, %p2914_p2 }
  0x2e   :  { %p2917_p5 = pnand %p2916_p4, %p2910_p1 }
  0x30   :  { %2920 = shalt.err (!%p2917_p5)
}
  0x31   :  { %56 = dma.hbm_to_vmem [thread:$0]  %s4126_s2, 8192, %s51_s13, [#allocation14], %s2970_s18, %s2970_s18, %s2971_s19  }
  0x32   :  { %s2929_s0 = scalar_lea.vmem %s83_s4, 2048  ;;  %p2934_p7 = scmp.lt.s32.totalorder %s83_s4, %s83_s4 }
  0x33   :  { %p2930_p6 = scmp.ne.s32.totalorder %s83_s4, %s2929_s0  ;;  %p2935_p8 = scmp.lt.s32.totalorder %s2929_s0, %s2929_s0 }
  0x35   :  { %p2936_p9 = por %p2935_p8, %p2934_p7 }
  0x37   :  { %p2937_p10 = pnand %p2936_p9, %p2930_p6 }
  0x39   :  { %2940 = shalt.err (!%p2937_p10)
}
  0x3a   :  { %88 = dma.hbm_to_vmem [thread:$0]  %s4132_s8, 2048, %s83_s4, [#allocation17], %s2974_s26, %s2974_s26, %s2975_s27  }
  0x3b   :  { %2961 = dma.done.wait [#allocation11], 1024  }
  0x3c   :  { %2962 = vsyncadd [#allocation11], 4294966272 }
  0x3d   :  { %2963 = dma.done.wait [#allocation14], 10240  }
  0x3e   :  { %2964 = vsyncadd [#allocation14], 4294957056 }
  0x3f   :  { %2965 = dma.done.wait [#allocation17], 4096  }
  0x40   :  { %2966 = vsyncadd [#allocation17], 4294963200  ;;  %v4135_v1 = vmov 0.0   ;;  %v137_v2 = vld [vmem:[#allocation13 + $0x68] sm:$0xff]  ;;  %v139_v3 = vld [vmem:[#allocation13 + $0x78] sm:$0xff]  ;;  %vm162_vm0 = vcmask 261120  }
  0x41   :  { %251 = vmatprep.mubr.f32.mxu0 %v4135_v1  ;;  %364 = vmatprep.mubr.f32.mxu1 %v4135_v1  ;;  %v136_v4 = vld [vmem:[#allocation13 + $0x60] sm:$0xff]  ;;  %v138_v5 = vld [vmem:[#allocation13 + $0x70] sm:$0xff]  ;;  %v133_v6 = vld [vmem:[#allocation13 + $0x48] sm:$0xff]  ;;  %vm113_vm1 = vcmask 7168   ;;  %vm2981_vm2 = vmmov 0   ;;  %s2982_s23 = smov [#allocation19]  }
  0x42   :  { %211 = vmatprep.subr.mxu0 %v137_v2  ;;  %324 = vmatprep.subr.mxu1 %v139_v3  ;;  %v135_v7 = vld [vmem:[#allocation13 + $0x58] sm:$0xff]  ;;  %v132_v8 = vld [vmem:[#allocation13 + $0x40] sm:$0xff]  ;;  %v134_v9 = vld [vmem:[#allocation13 + $0x50] sm:$0xff]  ;;  %s2430_s24 = sshll.u32 %s2982_s23, 4  ;;  %s2431_s24 = int_to_ptr.vmem [resolvable:$true] %s2430_s24 }
  0x43   :  { %212 = vmatpush1.msra.mxu0 %v136_v4  ;;  %325 = vmatpush1.msra.mxu1 %v138_v5  ;;  %v129_v10 = vld [vmem:[#allocation13 + $0x28] sm:$0xff]  ;;  %v131_v11 = vld [vmem:[#allocation13 + $0x38] sm:$0xff]  ;;  %v128_v12 = vld [vmem:[#allocation13 + $0x20] sm:$0xff]  ;;  %s2941_s25 = scalar_lea.vmem %s2431_s24, 128  ;;  %p2946_p12 = scmp.lt.s32.totalorder %s2431_s24, %s2431_s24 }
  0x44   :  { %213 = vmatprep.subr.mxu0 %v133_v6  ;;  %326 = vmatprep.subr.mxu1 %v135_v7  ;;  %v130_v13 = vld [vmem:[#allocation13 + $0x30] sm:$0xff]  ;;  %v125_v14 = vld [vmem:[#allocation13 + $0x8] sm:$0xff]  ;;  %v127_v15 = vld [vmem:[#allocation13 + $0x18] sm:$0xff]  ;;  %p2942_p11 = scmp.ne.s32.totalorder %s2431_s24, %s2941_s25  ;;  %p2947_p13 = scmp.lt.s32.totalorder %s2941_s25, %s2941_s25 }
  0x45   :  { %214 = vmatpush1.msra.mxu0 %v132_v8  ;;  %327 = vmatpush1.msra.mxu1 %v134_v9  ;;  %v124_v16 = vld [vmem:[#allocation13] sm:$0xff]  ;;  %v126_v17 = vld [vmem:[#allocation13 + $0x10] sm:$0xff]  ;;  %v3073_v19 = vld [vmem:[#allocation15 + $0x1e8] sm:$0xff] }
  0x46   :  { %215 = vmatprep.subr.mxu0 %v129_v10  ;;  %328 = vmatprep.subr.mxu1 %v131_v11  ;;  %v116_v18 = vld [vmem:[#allocation10] sm:$0xff]  ;;  %4233 = vst [vmem:[#allocation24_spill] sm:$0xff] %v3073_v19  ;;  %v3075_v20 = vld [vmem:[#allocation15 + $0x1f8] sm:$0xff]  ;;  %v3079_v22 = vld [vmem:[#allocation15 + $0x1f0] sm:$0xff]  ;;  %p2948_p0 = por %p2947_p13, %p2946_p12 }
  0x47   :  { %216 = vmatpush1.msra.mxu0 %v128_v12  ;;  %329 = vmatpush1.msra.mxu1 %v130_v13  ;;  %4234 = vst [vmem:[#allocation25_spill] sm:$0xff] %v3075_v20  ;;  %v3077_v21 = vld [vmem:[#allocation15 + $0x1e0] sm:$0xff]  ;;  %v3083_v23 = vld [vmem:[#allocation15 + $0x1c8] sm:$0xff]  ;;  %v3085_v24 = vld [vmem:[#allocation15 + $0x1d8] sm:$0xff] }
  0x48   :  { %217 = vmatprep.subr.mxu0 %v125_v14  ;;  %330 = vmatprep.subr.mxu1 %v127_v15  ;;  %v3091_v25 = vld [vmem:[#allocation15 + $0x1c0] sm:$0xff]  ;;  %v3093_v26 = vld [vmem:[#allocation15 + $0x1d0] sm:$0xff]  ;;  %v117_v27 = vld [vmem:[#allocation10 + $0x8] sm:$0xff]  ;;  %p2949_p1 = pnand %p2948_p0, %p2942_p11 }
  0x49   :  { %218 = vmatpush1.msra.mxu0 %v124_v16  ;;  %331 = vmatpush1.msra.mxu1 %v126_v17  ;;  %v3099_v28 = vld [vmem:[#allocation15 + $0x1a8] sm:$0xff]  ;;  %v3101_v29 = vld [vmem:[#allocation15 + $0x1b8] sm:$0xff]  ;;  %v3105_v30 = vld [vmem:[#allocation15 + $0x1a0] sm:$0xff] }
  0x4a   :  { %2448 = vmatmul.mubr.msk.f32.vlgmr.msra.gmra.mxu0 %vm162_vm0, %v116_v18  ;;  %2456 = vmatmul.mubr.msk.f32.vlgmr.msra.gmra.mxu1 %vm162_vm0, %v116_v18  ;;  %v3107_v31 = vld [vmem:[#allocation15 + $0x1b0] sm:$0xff]  ;;  %v3111_v32 = vld [vmem:[#allocation15 + $0x188] sm:$0xff]  ;;  %v3113_v33 = vld [vmem:[#allocation15 + $0x198] sm:$0xff] }
  0x4b   :  { %518 = vmatprep.subr.mxu0 %v3073_v19  ;;  %589 = vmatprep.subr.mxu1 %v3075_v20  ;;  %v3119_v34 = vld [vmem:[#allocation15 + $0x180] sm:$0xff]  ;;  %v3121_v35 = vld [vmem:[#allocation15 + $0x190] sm:$0xff]  ;;  %v3127_v37 = vld [vmem:[#allocation15 + $0x168] sm:$0xff] }
  0x4c   :  { %519 = vmatpush1.msra.mxu0 %v3077_v21  ;;  %590 = vmatpush1.msra.mxu1 %v3079_v22  ;;  %v118_v36 = vld [vmem:[#allocation10 + $0x10] sm:$0xff]  ;;  %v3129_v38 = vld [vmem:[#allocation15 + $0x178] sm:$0xff]  ;;  %v3133_v39 = vld [vmem:[#allocation15 + $0x160] sm:$0xff] }
  0x4d   :  { %520 = vmatprep.subr.mxu0 %v3083_v23  ;;  %591 = vmatprep.subr.mxu1 %v3085_v24  ;;  %v3135_v40 = vld [vmem:[#allocation15 + $0x170] sm:$0xff]  ;;  %v3139_v41 = vld [vmem:[#allocation15 + $0x148] sm:$0xff]  ;;  %v3141_v42 = vld [vmem:[#allocation15 + $0x158] sm:$0xff] }
  0x4e   :  { %257 = vmatprep.mubr.f32.mxu0 %v4135_v1  ;;  %370 = vmatprep.mubr.f32.mxu1 %v4135_v1  ;;  %v3147_v43 = vld [vmem:[#allocation15 + $0x140] sm:$0xff]  ;;  %v3149_v44 = vld [vmem:[#allocation15 + $0x150] sm:$0xff]  ;;  %v119_v45 = vld [vmem:[#allocation10 + $0x18] sm:$0xff] }
  0x4f   :  { %521 = vmatpush1.msra.mxu0 %v3091_v25  ;;  %592 = vmatpush1.msra.mxu1 %v3093_v26  ;;  %v3155_v46 = vld [vmem:[#allocation15 + $0x128] sm:$0xff]  ;;  %v3157_v47 = vld [vmem:[#allocation15 + $0x138] sm:$0xff]  ;;  %v3161_v48 = vld [vmem:[#allocation15 + $0x120] sm:$0xff] }
  0x50   :  { %2449 = vmatmul.mubr.msk.f32.gmra.mxu0 %vm162_vm0, %v117_v27  ;;  %2457 = vmatmul.mubr.msk.f32.gmra.mxu1 %vm162_vm0, %v117_v27  ;;  %v3163_v49 = vld [vmem:[#allocation15 + $0x130] sm:$0xff]  ;;  %v3167_v50 = vld [vmem:[#allocation15 + $0x108] sm:$0xff]  ;;  %v3169_v51 = vld [vmem:[#allocation15 + $0x118] sm:$0xff] }
  0x51   :  { %522 = vmatprep.subr.mxu0 %v3099_v28  ;;  %593 = vmatprep.subr.mxu1 %v3101_v29  ;;  %v3175_v52 = vld [vmem:[#allocation15 + $0x100] sm:$0xff]  ;;  %v3177_v53 = vld [vmem:[#allocation15 + $0x110] sm:$0xff]  ;;  %v3183_v55 = vld [vmem:[#allocation15 + $0xe8] sm:$0xff] }
  0x52   :  { %523 = vmatpush1.msra.mxu0 %v3105_v30  ;;  %594 = vmatpush1.msra.mxu1 %v3107_v31  ;;  %v120_v54 = vld [vmem:[#allocation10 + $0x20] sm:$0xff]  ;;  %v3185_v56 = vld [vmem:[#allocation15 + $0xf8] sm:$0xff]  ;;  %v3191_v58 = vld [vmem:[#allocation15 + $0xf0] sm:$0xff] }
  0x53   :  { %524 = vmatprep.subr.mxu0 %v3111_v32  ;;  %595 = vmatprep.subr.mxu1 %v3113_v33  ;;  %v3189_v57 = vld [vmem:[#allocation15 + $0xe0] sm:$0xff]  ;;  %v3195_v59 = vld [vmem:[#allocation15 + $0xc8] sm:$0xff]  ;;  %v3197_v60 = vld [vmem:[#allocation15 + $0xd8] sm:$0xff] }
  0x54   :  { %263 = vmatprep.mubr.f32.mxu0 %v4135_v1  ;;  %376 = vmatprep.mubr.f32.mxu1 %v4135_v1  ;;  %v3203_v61 = vld [vmem:[#allocation15 + $0xc0] sm:$0xff]  ;;  %v3205_v62 = vld [vmem:[#allocation15 + $0xd0] sm:$0xff]  ;;  %v121_v63 = vld [vmem:[#allocation10 + $0x28] sm:$0xff] }
  0x55   :  { %525 = vmatpush1.msra.mxu0 %v3119_v34  ;;  %596 = vmatpush1.msra.mxu1 %v3121_v35  ;;  %v3211_v0 = vld [vmem:[#allocation15 + $0xa8] sm:$0xff]  ;;  %v3213_v2 = vld [vmem:[#allocation15 + $0xb8] sm:$0xff]  ;;  %v3217_v3 = vld [vmem:[#allocation15 + $0xa0] sm:$0xff] }
  0x56   :  { %2450 = vmatmul.mubr.msk.f32.gmra.mxu0 %vm162_vm0, %v118_v36  ;;  %2458 = vmatmul.mubr.msk.f32.gmra.mxu1 %vm162_vm0, %v118_v36  ;;  %v3219_v4 = vld [vmem:[#allocation15 + $0xb0] sm:$0xff]  ;;  %v3223_v5 = vld [vmem:[#allocation15 + $0x88] sm:$0xff]  ;;  %v3225_v6 = vld [vmem:[#allocation15 + $0x98] sm:$0xff] }
  0x57   :  { %526 = vmatprep.subr.mxu0 %v3127_v37  ;;  %597 = vmatprep.subr.mxu1 %v3129_v38  ;;  %4235 = vst [vmem:[#allocation26_spill] sm:$0xff] %v3223_v5  ;;  %4236 = vst [vmem:[#allocation27_spill] sm:$0xff] %v3225_v6  ;;  %v3231_v7 = vld [vmem:[#allocation15 + $0x80] sm:$0xff]  ;;  %v3233_v8 = vld [vmem:[#allocation15 + $0x90] sm:$0xff] }
  0x58   :  { %527 = vmatpush1.msra.mxu0 %v3133_v39  ;;  %598 = vmatpush1.msra.mxu1 %v3135_v40  ;;  %4237 = vst [vmem:[#allocation28_spill] sm:$0xff] %v3231_v7  ;;  %4238 = vst [vmem:[#allocation29_spill] sm:$0xff] %v3233_v8  ;;  %v122_v9 = vld [vmem:[#allocation10 + $0x30] sm:$0xff]  ;;  %v3239_v10 = vld [vmem:[#allocation15 + $0x68] sm:$0xff] }
  0x59   :  { %528 = vmatprep.subr.mxu0 %v3139_v41  ;;  %599 = vmatprep.subr.mxu1 %v3141_v42  ;;  %4239 = vst [vmem:[#allocation30_spill] sm:$0xff] %v3239_v10  ;;  %v3241_v11 = vld [vmem:[#allocation15 + $0x78] sm:$0xff]  ;;  %v3245_v12 = vld [vmem:[#allocation15 + $0x60] sm:$0xff]  ;;  %v3247_v13 = vld [vmem:[#allocation15 + $0x70] sm:$0xff] }
  0x5a   :  { %269 = vmatprep.mubr.f32.mxu0 %v4135_v1  ;;  %382 = vmatprep.mubr.f32.mxu1 %v4135_v1  ;;  %4240 = vst [vmem:[#allocation31_spill] sm:$0xff] %v3241_v11  ;;  %4241 = vst [vmem:[#allocation32_spill] sm:$0xff] %v3245_v12  ;;  %v3251_v14 = vld [vmem:[#allocation15 + $0x48] sm:$0xff]  ;;  %v3253_v15 = vld [vmem:[#allocation15 + $0x58] sm:$0xff] }
  0x5b   :  { %529 = vmatpush1.msra.mxu0 %v3147_v43  ;;  %600 = vmatpush1.msra.mxu1 %v3149_v44  ;;  %4242 = vst [vmem:[#allocation33_spill] sm:$0xff] %v3247_v13  ;;  %4243 = vst [vmem:[#allocation34_spill] sm:$0xff] %v3251_v14  ;;  %v3259_v16 = vld [vmem:[#allocation15 + $0x40] sm:$0xff]  ;;  %v3261_v17 = vld [vmem:[#allocation15 + $0x50] sm:$0xff] }
  0x5c   :  { %2451 = vmatmul.mubr.msk.f32.gmra.mxu0 %vm162_vm0, %v119_v45  ;;  %2459 = vmatmul.mubr.msk.f32.gmra.mxu1 %vm162_vm0, %v119_v45  ;;  %4244 = vst [vmem:[#allocation35_spill] sm:$0xff] %v3253_v15  ;;  %4245 = vst [vmem:[#allocation36_spill] sm:$0xff] %v3259_v16  ;;  %v123_v18 = vld [vmem:[#allocation10 + $0x38] sm:$0xff]  ;;  %v3267_v27 = vld [vmem:[#allocation15 + $0x28] sm:$0xff] }
  0x5d   :  { %530 = vmatprep.subr.mxu0 %v3155_v46  ;;  %601 = vmatprep.subr.mxu1 %v3157_v47  ;;  %4246 = vst [vmem:[#allocation37_spill] sm:$0xff] %v3261_v17  ;;  %4247 = vst [vmem:[#allocation38_spill] sm:$0xff] %v3267_v27  ;;  %v3269_v36 = vld [vmem:[#allocation15 + $0x38] sm:$0xff]  ;;  %v3273_v45 = vld [vmem:[#allocation15 + $0x20] sm:$0xff] }
  0x5e   :  { %531 = vmatpush1.msra.mxu0 %v3161_v48  ;;  %602 = vmatpush1.msra.mxu1 %v3163_v49  ;;  %4248 = vst [vmem:[#allocation39_spill] sm:$0xff] %v3269_v36  ;;  %4249 = vst [vmem:[#allocation40_spill] sm:$0xff] %v3273_v45 }
  0x5f   :  { %532 = vmatprep.subr.mxu0 %v3167_v50  ;;  %603 = vmatprep.subr.mxu1 %v3169_v51 }
  0x60   :  { %275 = vmatprep.mubr.f32.mxu0 %v4135_v1  ;;  %388 = vmatprep.mubr.f32.mxu1 %v4135_v1 }
  0x61   :  { %533 = vmatpush1.msra.mxu0 %v3175_v52  ;;  %604 = vmatpush1.msra.mxu1 %v3177_v53 }
  0x62   :  { %2452 = vmatmul.mubr.msk.f32.gmra.mxu0 %vm162_vm0, %v120_v54  ;;  %2460 = vmatmul.mubr.msk.f32.gmra.mxu1 %vm162_vm0, %v120_v54  ;;  %v3275_v54 = vld [vmem:[#allocation15 + $0x30] sm:$0xff] }
  0x63   :  { %534 = vmatprep.subr.mxu0 %v3183_v55  ;;  %605 = vmatprep.subr.mxu1 %v3185_v56  ;;  %4250 = vst [vmem:[#allocation41_spill] sm:$0xff] %v3275_v54 }
  0x64   :  { %535 = vmatpush1.msra.mxu0 %v3189_v57  ;;  %606 = vmatpush1.msra.mxu1 %v3191_v58 }
  0x65   :  { %536 = vmatprep.subr.mxu0 %v3195_v59  ;;  %607 = vmatprep.subr.mxu1 %v3197_v60 }
  0x66   :  { %281 = vmatprep.mubr.f32.mxu0 %v4135_v1  ;;  %394 = vmatprep.mubr.f32.mxu1 %v4135_v1 }
  0x67   :  { %537 = vmatpush1.msra.mxu0 %v3203_v61  ;;  %608 = vmatpush1.msra.mxu1 %v3205_v62 }
  0x68   :  { %2453 = vmatmul.mubr.msk.f32.gmra.mxu0 %vm162_vm0, %v121_v63  ;;  %2461 = vmatmul.mubr.msk.f32.gmra.mxu1 %vm162_vm0, %v121_v63  ;;  %v3279_v63 = vld [vmem:[#allocation15 + $0x8] sm:$0xff] }
  0x69   :  { %538 = vmatprep.subr.mxu0 %v3211_v0  ;;  %609 = vmatprep.subr.mxu1 %v3213_v2  ;;  %4251 = vst [vmem:[#allocation42_spill] sm:$0xff] %v3279_v63 }
  0x6a   :  { %539 = vmatpush1.msra.mxu0 %v3217_v3  ;;  %610 = vmatpush1.msra.mxu1 %v3219_v4 }
  0x6b   :  { %540 = vmatprep.subr.mxu0 %v3223_v5  ;;  %611 = vmatprep.subr.mxu1 %v3225_v6 }
  0x6c   :  { %287 = vmatprep.mubr.f32.mxu0 %v4135_v1  ;;  %400 = vmatprep.mubr.f32.mxu1 %v4135_v1 }
  0x6d   :  { %541 = vmatpush1.msra.mxu0 %v3231_v7  ;;  %612 = vmatpush1.msra.mxu1 %v3233_v8 }
  0x6e   :  { %2454 = vmatmul.mubr.msk.f32.gmra.mxu0 %vm162_vm0, %v122_v9  ;;  %2462 = vmatmul.mubr.msk.f32.gmra.mxu1 %vm162_vm0, %v122_v9  ;;  %v3281_v9 = vld [vmem:[#allocation15 + $0x18] sm:$0xff] }
  0x6f   :  { %542 = vmatprep.subr.mxu0 %v3239_v10  ;;  %613 = vmatprep.subr.mxu1 %v3241_v11  ;;  %4252 = vst [vmem:[#allocation43_spill] sm:$0xff] %v3281_v9 }
  0x70   :  { %543 = vmatpush1.msra.mxu0 %v3245_v12  ;;  %614 = vmatpush1.msra.mxu1 %v3247_v13 }
  0x71   :  { %544 = vmatprep.subr.mxu0 %v3251_v14  ;;  %615 = vmatprep.subr.mxu1 %v3253_v15 }
  0x72   :  { %293 = vmatprep.mubr.f32.mxu0 %v4135_v1  ;;  %406 = vmatprep.mubr.f32.mxu1 %v4135_v1  ;;  %v3285_v1 = vld [vmem:[#allocation15] sm:$0xff] }
  0x73   :  { %545 = vmatpush1.msra.mxu0 %v3259_v16  ;;  %616 = vmatpush1.msra.mxu1 %v3261_v17  ;;  %4253 = vst [vmem:[#allocation44_spill] sm:$0xff] %v3285_v1  ;;  %v3289_v17 = vld [vmem:[#allocation15 + $0x10] sm:$0xff] }
  0x74   :  { %2455 = vmatmul.mubr.msk.f32.gmra.mxu0 %vm162_vm0, %v123_v18  ;;  %2463 = vmatmul.mubr.msk.f32.gmra.mxu1 %vm162_vm0, %v123_v18  ;;  %4254 = vst [vmem:[#allocation45_spill] sm:$0xff] %v3289_v17  ;;  %v4255_v18 = vmov 0.0  }
  0x75   :  { %546 = vmatprep.subr.mxu0 %v3267_v27  ;;  %617 = vmatprep.subr.mxu1 %v3269_v36 }
  0x76   :  { %547 = vmatpush1.msra.mxu0 %v3273_v45  ;;  %618 = vmatpush1.msra.mxu1 %v3275_v54 }
  0x77   :  { %548 = vmatprep.subr.mxu0 %v3279_v63  ;;  %619 = vmatprep.subr.mxu1 %v3281_v9 }
  0x78   :  { %549 = vmatpush1.msra.mxu0 %v3285_v1  ;;  %582 = vmatprep.mubr.f32.mxu0 %v4255_v18 }
  0x79   :  { %620 = vmatpush1.msra.mxu1 %v3289_v17  ;;  %653 = vmatprep.mubr.f32.mxu1 %v4255_v18 }
  0x7a   :  { %583 = vmatmul.mubr.f32.vlgmr.msra.gmra.mxu0 %v4255_v18  ;;  %654 = vmatmul.mubr.f32.vlgmr.msra.gmra.mxu1 %v4255_v18 }
  0x7b   :  { %704 = vmatprep.subr.mxu0 %v3073_v19  ;;  %775 = vmatprep.subr.mxu1 %v3075_v20 }
  0x7c   :  { %705 = vmatpush1.msra.mxu0 %v3077_v21  ;;  %776 = vmatpush1.msra.mxu1 %v3079_v22 }
  0x7d   :  { %706 = vmatprep.subr.mxu0 %v3083_v23  ;;  %777 = vmatprep.subr.mxu1 %v3085_v24 }
  0x7e   :  { %707 = vmatpush1.msra.mxu0 %v3091_v25  ;;  %778 = vmatpush1.msra.mxu1 %v3093_v26 }
  0x7f   :  { %708 = vmatprep.subr.mxu0 %v3099_v28  ;;  %779 = vmatprep.subr.mxu1 %v3101_v29 }
  0x80   :  { %709 = vmatpush1.msra.mxu0 %v3105_v30  ;;  %780 = vmatpush1.msra.mxu1 %v3107_v31 }
  0x81   :  { %710 = vmatprep.subr.mxu0 %v3111_v32  ;;  %781 = vmatprep.subr.mxu1 %v3113_v33 }
  0x82   :  { %711 = vmatpush1.msra.mxu0 %v3119_v34  ;;  %782 = vmatpush1.msra.mxu1 %v3121_v35 }
  0x83   :  { %712 = vmatprep.subr.mxu0 %v3127_v37  ;;  %783 = vmatprep.subr.mxu1 %v3129_v38 }
  0x84   :  { %713 = vmatpush1.msra.mxu0 %v3133_v39  ;;  %784 = vmatpush1.msra.mxu1 %v3135_v40 }
  0x85   :  { %714 = vmatprep.subr.mxu0 %v3139_v41  ;;  %785 = vmatprep.subr.mxu1 %v3141_v42 }
  0x86   :  { %715 = vmatpush1.msra.mxu0 %v3147_v43  ;;  %786 = vmatpush1.msra.mxu1 %v3149_v44 }
  0x87   :  { %716 = vmatprep.subr.mxu0 %v3155_v46  ;;  %787 = vmatprep.subr.mxu1 %v3157_v47 }
  0x88   :  { %717 = vmatpush1.msra.mxu0 %v3161_v48  ;;  %788 = vmatpush1.msra.mxu1 %v3163_v49 }
  0x89   :  { %718 = vmatprep.subr.mxu0 %v3167_v50  ;;  %789 = vmatprep.subr.mxu1 %v3169_v51 }
  0x8a   :  { %719 = vmatpush1.msra.mxu0 %v3175_v52  ;;  %790 = vmatpush1.msra.mxu1 %v3177_v53 }
  0x8b   :  { %720 = vmatprep.subr.mxu0 %v3183_v55  ;;  %791 = vmatprep.subr.mxu1 %v3185_v56 }
  0x8c   :  { %721 = vmatpush1.msra.mxu0 %v3189_v57  ;;  %792 = vmatpush1.msra.mxu1 %v3191_v58 }
  0x8d   :  { %722 = vmatprep.subr.mxu0 %v3195_v59  ;;  %793 = vmatprep.subr.mxu1 %v3197_v60 }
  0x8e   :  { %723 = vmatpush1.msra.mxu0 %v3203_v61  ;;  %794 = vmatpush1.msra.mxu1 %v3205_v62 }
  0x8f   :  { %724 = vmatprep.subr.mxu0 %v3211_v0  ;;  %795 = vmatprep.subr.mxu1 %v3213_v2 }
  0x90   :  { %725 = vmatpush1.msra.mxu0 %v3217_v3  ;;  %796 = vmatpush1.msra.mxu1 %v3219_v4 }
  0x91   :  { %726 = vmatprep.subr.mxu0 %v3223_v5  ;;  %797 = vmatprep.subr.mxu1 %v3225_v6  ;;  %v4256_v5 = vld [vmem:[#allocation37_spill] sm:$0xff] }
  0x92   :  { %727 = vmatpush1.msra.mxu0 %v3231_v7  ;;  %798 = vmatpush1.msra.mxu1 %v3233_v8 }
  0x93   :  { %728 = vmatprep.subr.mxu0 %v3239_v10  ;;  %799 = vmatprep.subr.mxu1 %v3241_v11 }
  0x94   :  { %729 = vmatpush1.msra.mxu0 %v3245_v12  ;;  %800 = vmatpush1.msra.mxu1 %v3247_v13 }
  0x95   :  { %730 = vmatprep.subr.mxu0 %v3251_v14  ;;  %801 = vmatprep.subr.mxu1 %v3253_v15 }
  0x96   :  { %731 = vmatpush1.msra.mxu0 %v3259_v16  ;;  %802 = vmatpush1.msra.mxu1 %v4256_v5 }
  0x97   :  { %732 = vmatprep.subr.mxu0 %v3267_v27  ;;  %803 = vmatprep.subr.mxu1 %v3269_v36  ;;  %v142_v36 = vlaneseq }
  0x98   :  { %733 = vmatpush1.msra.mxu0 %v3273_v45  ;;  %804 = vmatpush1.msra.mxu1 %v3275_v54 }
  0x99   :  { %734 = vmatprep.subr.mxu0 %v3279_v63  ;;  %805 = vmatprep.subr.mxu1 %v3281_v9  ;;  %v143_v45 = vshrl.u32 %v142_v36, 7 }
  0x9a   :  { %735 = vmatpush1.msra.mxu0 %v3285_v1  ;;  %768 = vmatprep.mubr.f32.mxu0 %v4255_v18  ;;  %v140_v1 = vld [vmem:[%s4127_s3] sm:$0xf] }
  0x9b   :  { %806 = vmatpush1.msra.mxu1 %v3289_v17  ;;  %839 = vmatprep.mubr.f32.mxu1 %v4255_v18  ;;  %v144_v63 = vsub.s32 0, %v143_v45  ;;  %v152_v9 = vsub.s32 2, %v143_v45  ;;  %v148_v18 = vsub.s32 1, %v143_v45 }
  0x9c   :  { %891 = vmatprep.subr.mxu0 %v3073_v19  ;;  %962 = vmatprep.subr.mxu1 %v3075_v20  ;;  %v156_v19 = vsub.s32 3, %v143_v45 }
  0x9d   :  { %v145_v16 = vrot.slane %v140_v1, %v144_v63  ;;  %v3378_v20 = vrot.slane %v140_v1, %v152_v9  ;;  %v149_v14 = vrot.slane %v140_v1, %v148_v18 }
  0x9e   :  { %v3380_v13 = vrot.slane %v140_v1, %v156_v19 }
 0x10a   :  { %v3367_v27 = vpop.f32.mrf.mxu0  ;;  %v3369_v54 = vpop.f32.mrf.mxu1 }
 0x10c   :  { %v3374_v5 = vpop.f32.mrf.mxu0  ;;  %v3376_v17 = vpop.f32.mrf.mxu1 }
 0x110   :  { %v259_v36 = vpop.f32.mrf.mxu0  ;;  %v372_v15 = vpop.f32.mrf.mxu1 }
 0x111   :  { %v3382_v12 = vadd.f32 %v259_v36, %v145_v16  ;;  %v3385_v11 = vadd.f32 %v372_v15, %v3378_v20 }
 0x112   :  { %v261_v10 = vpop.f32.mrf.mxu0  ;;  %v374_v8 = vpop.f32.mrf.mxu1 }
 0x113   :  { %4257 = vst [vmem:[#allocation46_spill] sm:$0xff] %v3382_v12  ;;  %4258 = vst [vmem:[#allocation47_spill] sm:$0xff] %v3385_v11  ;;  %v3387_v7 = vadd.f32 %v261_v10, %v149_v14  ;;  %v3390_v6 = vadd.f32 %v374_v8, %v3380_v13 }
 0x115   :  { %4259 = vst [vmem:[#allocation48_spill] sm:$0xff] %v3387_v7  ;;  %4260 = vst [vmem:[#allocation49_spill] sm:$0xff] %v3390_v6 }
 0x116   :  { %v265_v45 = vpop.f32.mrf.mxu0  ;;  %v378_v63 = vpop.f32.mrf.mxu1 }
 0x117   :  { %v3392_v9 = vadd.f32 %v265_v45, %v145_v16  ;;  %v3395_v18 = vadd.f32 %v378_v63, %v3378_v20 }
 0x118   :  { %v267_v1 = vpop.f32.mrf.mxu0  ;;  %v380_v19 = vpop.f32.mrf.mxu1 }
 0x119   :  { %4261 = vst [vmem:[#allocation50_spill] sm:$0xff] %v3392_v9  ;;  %4262 = vst [vmem:[#allocation51_spill] sm:$0xff] %v3395_v18  ;;  %v3397_v36 = vadd.f32 %v267_v1, %v149_v14  ;;  %v3400_v15 = vadd.f32 %v380_v19, %v3380_v13 }
 0x11b   :  { %4263 = vst [vmem:[#allocation52_spill] sm:$0xff] %v3397_v36  ;;  %4264 = vst [vmem:[#allocation53_spill] sm:$0xff] %v3400_v15 }
 0x11c   :  { %v271_v11 = vpop.f32.mrf.mxu0  ;;  %v384_v10 = vpop.f32.mrf.mxu1 }
 0x11d   :  { %v3402_v7 = vadd.f32 %v271_v11, %v145_v16  ;;  %v3405_v8 = vadd.f32 %v384_v10, %v3378_v20 }
 0x11e   :  { %v273_v6 = vpop.f32.mrf.mxu0  ;;  %v386_v45 = vpop.f32.mrf.mxu1 }
 0x11f   :  { %4265 = vst [vmem:[#allocation54_spill] sm:$0xff] %v3402_v7  ;;  %4266 = vst [vmem:[#allocation55_spill] sm:$0xff] %v3405_v8  ;;  %v3407_v9 = vadd.f32 %v273_v6, %v149_v14  ;;  %v3410_v63 = vadd.f32 %v386_v45, %v3380_v13 }
 0x121   :  { %4267 = vst [vmem:[#allocation56_spill] sm:$0xff] %v3407_v9  ;;  %4268 = vst [vmem:[#allocation57_spill] sm:$0xff] %v3410_v63 }
 0x122   :  { %v277_v18 = vpop.f32.mrf.mxu0  ;;  %v390_v1 = vpop.f32.mrf.mxu1 }
 0x123   :  { %v3412_v36 = vadd.f32 %v277_v18, %v145_v16  ;;  %v3415_v19 = vadd.f32 %v390_v1, %v3378_v20 }
 0x124   :  { %v279_v15 = vpop.f32.mrf.mxu0  ;;  %v392_v11 = vpop.f32.mrf.mxu1 }
 0x125   :  { %4269 = vst [vmem:[#allocation58_spill] sm:$0xff] %v3412_v36  ;;  %4270 = vst [vmem:[#allocation59_spill] sm:$0xff] %v3415_v19  ;;  %v3417_v7 = vadd.f32 %v279_v15, %v149_v14  ;;  %v3420_v10 = vadd.f32 %v392_v11, %v3380_v13 }
 0x127   :  { %4271 = vst [vmem:[#allocation60_spill] sm:$0xff] %v3417_v7  ;;  %4272 = vst [vmem:[#allocation61_spill] sm:$0xff] %v3420_v10 }
 0x128   :  { %v283_v8 = vpop.f32.mrf.mxu0  ;;  %v396_v6 = vpop.f32.mrf.mxu1 }
 0x129   :  { %v3422_v9 = vadd.f32 %v283_v8, %v145_v16  ;;  %v3425_v45 = vadd.f32 %v396_v6, %v3378_v20 }
 0x12a   :  { %v285_v63 = vpop.f32.mrf.mxu0  ;;  %v398_v18 = vpop.f32.mrf.mxu1 }
 0x12b   :  { %4273 = vst [vmem:[#allocation62_spill] sm:$0xff] %v3422_v9  ;;  %4274 = vst [vmem:[#allocation63_spill] sm:$0xff] %v3425_v45  ;;  %v3427_v36 = vadd.f32 %v285_v63, %v149_v14  ;;  %v3430_v1 = vadd.f32 %v398_v18, %v3380_v13 }
 0x12d   :  { %4275 = vst [vmem:[#allocation64_spill] sm:$0xff] %v3427_v36  ;;  %4276 = vst [vmem:[#allocation65_spill] sm:$0xff] %v3430_v1 }
 0x12e   :  { %v289_v19 = vpop.f32.mrf.mxu0  ;;  %v402_v15 = vpop.f32.mrf.mxu1 }
 0x12f   :  { %v3432_v7 = vadd.f32 %v289_v19, %v145_v16  ;;  %v3435_v11 = vadd.f32 %v402_v15, %v3378_v20 }
 0x130   :  { %v291_v10 = vpop.f32.mrf.mxu0  ;;  %v404_v8 = vpop.f32.mrf.mxu1 }
 0x131   :  { %4277 = vst [vmem:[#allocation66_spill] sm:$0xff] %v3432_v7  ;;  %4278 = vst [vmem:[#allocation67_spill] sm:$0xff] %v3435_v11  ;;  %v3437_v9 = vadd.f32 %v291_v10, %v149_v14  ;;  %v3440_v6 = vadd.f32 %v404_v8, %v3380_v13  ;;  %v254_v10 = vadd.f32 %v3367_v27, %v145_v16 }
 0x132   :  { %v256_v8 = vadd.f32 %v3374_v5, %v149_v14 }
 0x133   :  { %4279 = vst [vmem:[#allocation68_spill] sm:$0xff] %v3437_v9  ;;  %4280 = vst [vmem:[#allocation69_spill] sm:$0xff] %v3440_v6 }
 0x134   :  { %v295_v45 = vpop.f32.mrf.mxu0  ;;  %v408_v63 = vpop.f32.mrf.mxu1 }
 0x135   :  { %v3442_v36 = vadd.f32 %v295_v45, %v145_v16  ;;  %v3445_v18 = vadd.f32 %v408_v63, %v3378_v20 }
 0x136   :  { %v297_v1 = vpop.f32.mrf.mxu0  ;;  %v410_v19 = vpop.f32.mrf.mxu1 }
 0x137   :  { %4281 = vst [vmem:[#allocation70_spill] sm:$0xff] %v3442_v36  ;;  %4282 = vst [vmem:[#allocation71_spill] sm:$0xff] %v3445_v18  ;;  %v3447_v7 = vadd.f32 %v297_v1, %v149_v14  ;;  %v3450_v15 = vadd.f32 %v410_v19, %v3380_v13  ;;  %v369_v1 = vadd.f32 %v3376_v17, %v3380_v13 }
 0x138   :  { %v367_v19 = vadd.f32 %v3369_v54, %v3378_v20 }
 0x139   :  { %4283 = vst [vmem:[#allocation72_spill] sm:$0xff] %v3447_v7  ;;  %4284 = vst [vmem:[#allocation73_spill] sm:$0xff] %v3450_v15 }
 0x13a   :  { %v584_v11 = vpop.f32.mrf.mxu0  ;;  %v655_v36 = vpop.f32.mrf.mxu1 }
 0x13b   :  { %v660_v6 = vadd.f32 %v584_v11, %v254_v10  ;;  %v662_v15 = vadd.f32 %v655_v36, %v367_v19  ;;  %v4286_v36 = vld [vmem:[#allocation26_spill] sm:$0xff]  ;;  %v4291_v19 = vld [vmem:[#allocation31_spill] sm:$0xff] }
 0x13c   :  { %v586_v9 = vpop.f32.mrf.mxu0  ;;  %v657_v18 = vpop.f32.mrf.mxu1 }
 0x13d   :  { %v2464_v12 = vmul.f32 -1.442695, %v660_v6  ;;  %v661_v45 = vadd.f32 %v586_v9, %v256_v8  ;;  %v663_v7 = vadd.f32 %v657_v18, %v369_v1  ;;  %v4290_v1 = vld [vmem:[#allocation30_spill] sm:$0xff] }
 0x13f   :  { %2629 = vpow2.f32 %v2464_v12  ;;  %v2465_v63 = vmul.f32 -1.442695, %v661_v45  ;;  %v2466_v16 = vmul.f32 -1.442695, %v663_v7  ;;  %v4288_v45 = vld [vmem:[#allocation28_spill] sm:$0xff] }
 0x141   :  { %2631 = vpow2.f32 %v2465_v63  ;;  %v4289_v63 = vld [vmem:[#allocation29_spill] sm:$0xff] }
 0x142   :  { %2633 = vpow2.f32 %v2466_v16  ;;  %v4292_v16 = vld [vmem:[#allocation32_spill] sm:$0xff] }
 0x14c   :  { %v2630_v27 = vpop.eup %2629 }
 0x14d   :  { %v672_v5 = vadd.f32 1.0, %v2630_v27  ;;  %v4293_v27 = vld [vmem:[#allocation33_spill] sm:$0xff] }
 0x14e   :  { %v2632_v14 = vpop.eup %2631 }
 0x14f   :  { %2635 = vrcp.f32 %v672_v5  ;;  %v679_v9 = vadd.f32 1.0, %v2632_v14  ;;  %v2634_v12 = vpop.eup %2633  ;;  %v4294_v5 = vld [vmem:[#allocation34_spill] sm:$0xff]  ;;  %v4295_v14 = vld [vmem:[#allocation35_spill] sm:$0xff] }
 0x150   :  { %2637 = vtanh.f32 %v662_v15  ;;  %v688_v8 = vadd.f32 1.0, %v2634_v12  ;;  %v4287_v15 = vld [vmem:[#allocation27_spill] sm:$0xff]  ;;  %v4297_v12 = vld [vmem:[#allocation37_spill] sm:$0xff] }
 0x151   :  { %2639 = vrcp.f32 %v679_v9  ;;  %v4296_v9 = vld [vmem:[#allocation36_spill] sm:$0xff] }
 0x152   :  { %2641 = vrcp.f32 %v688_v8  ;;  %v4301_v8 = vld [vmem:[#allocation41_spill] sm:$0xff] }
 0x15c   :  { %v2636_v11 = vpop.eup %2635 }
 0x15d   :  { %v2638_v6 = vpop.eup %2637 }
 0x15e   :  { %v2640_v10 = vpop.eup %2639  ;;  %v692_v17 = vmul.f32 %v2638_v6, %v2636_v11  ;;  %v4298_v11 = vld [vmem:[#allocation38_spill] sm:$0xff]  ;;  %v4299_v6 = vld [vmem:[#allocation39_spill] sm:$0xff] }
 0x15f   :  { %v691_v13 = vmul.f32 0.0, %v2640_v10  ;;  %v2642_v20 = vpop.eup %2641  ;;  %v4300_v10 = vld [vmem:[#allocation40_spill] sm:$0xff] }
 0x161   :  { %v3458_v18 = vadd.f32 %v692_v17, %v691_v13  ;;  %v4302_v13 = vld [vmem:[#allocation42_spill] sm:$0xff]  ;;  %v4303_v17 = vld [vmem:[#allocation43_spill] sm:$0xff] }
 0x163   :  { %2643 = vtanh.f32 %v3458_v18 }
 0x170   :  { %v2644_v7 = vpop.eup %2643 }
 0x171   :  { %v3461_v54 = vmul.f32 %v2644_v7, %v2642_v20  ;;  %v4304_v20 = vld [vmem:[#allocation44_spill] sm:$0xff]  ;;  %v4305_v7 = vmov 0.0  }
 0x173   :  { %4285 = vst [vmem:[#allocation74_spill] sm:$0xff] %v3461_v54  ;;  %769 = vmatmul.mubr.f32.vlgmr.msra.gmra.mxu0 %v3461_v54  ;;  %840 = vmatmul.mubr.f32.vlgmr.msra.gmra.mxu1 %v3461_v54  ;;  %v4306_v54 = vld [vmem:[#allocation45_spill] sm:$0xff] }
 0x174   :  { %892 = vmatpush1.msra.mxu0 %v3077_v21  ;;  %963 = vmatpush1.msra.mxu1 %v3079_v22 }
 0x175   :  { %893 = vmatprep.subr.mxu0 %v3083_v23  ;;  %964 = vmatprep.subr.mxu1 %v3085_v24 }
 0x176   :  { %894 = vmatpush1.msra.mxu0 %v3091_v25  ;;  %965 = vmatpush1.msra.mxu1 %v3093_v26 }
 0x177   :  { %895 = vmatprep.subr.mxu0 %v3099_v28  ;;  %966 = vmatprep.subr.mxu1 %v3101_v29 }
 0x178   :  { %896 = vmatpush1.msra.mxu0 %v3105_v30  ;;  %967 = vmatpush1.msra.mxu1 %v3107_v31 }
 0x179   :  { %897 = vmatprep.subr.mxu0 %v3111_v32  ;;  %968 = vmatprep.subr.mxu1 %v3113_v33 }
 0x17a   :  { %898 = vmatpush1.msra.mxu0 %v3119_v34  ;;  %969 = vmatpush1.msra.mxu1 %v3121_v35 }
 0x17b   :  { %899 = vmatprep.subr.mxu0 %v3127_v37  ;;  %970 = vmatprep.subr.mxu1 %v3129_v38 }
 0x17c   :  { %900 = vmatpush1.msra.mxu0 %v3133_v39  ;;  %971 = vmatpush1.msra.mxu1 %v3135_v40 }
 0x17d   :  { %901 = vmatprep.subr.mxu0 %v3139_v41  ;;  %972 = vmatprep.subr.mxu1 %v3141_v42 }
 0x17e   :  { %902 = vmatpush1.msra.mxu0 %v3147_v43  ;;  %973 = vmatpush1.msra.mxu1 %v3149_v44 }
 0x17f   :  { %903 = vmatprep.subr.mxu0 %v3155_v46  ;;  %974 = vmatprep.subr.mxu1 %v3157_v47 }
 0x180   :  { %904 = vmatpush1.msra.mxu0 %v3161_v48  ;;  %975 = vmatpush1.msra.mxu1 %v3163_v49 }
 0x181   :  { %905 = vmatprep.subr.mxu0 %v3167_v50  ;;  %976 = vmatprep.subr.mxu1 %v3169_v51 }
 0x182   :  { %906 = vmatpush1.msra.mxu0 %v3175_v52  ;;  %977 = vmatpush1.msra.mxu1 %v3177_v53 }
 0x183   :  { %907 = vmatprep.subr.mxu0 %v3183_v55  ;;  %978 = vmatprep.subr.mxu1 %v3185_v56 }
 0x184   :  { %908 = vmatpush1.msra.mxu0 %v3189_v57  ;;  %979 = vmatpush1.msra.mxu1 %v3191_v58 }
 0x185   :  { %909 = vmatprep.subr.mxu0 %v3195_v59  ;;  %980 = vmatprep.subr.mxu1 %v3197_v60 }
 0x186   :  { %910 = vmatpush1.msra.mxu0 %v3203_v61  ;;  %981 = vmatpush1.msra.mxu1 %v3205_v62 }
 0x187   :  { %911 = vmatprep.subr.mxu0 %v3211_v0  ;;  %982 = vmatprep.subr.mxu1 %v3213_v2 }
 0x188   :  { %912 = vmatpush1.msra.mxu0 %v3217_v3  ;;  %983 = vmatpush1.msra.mxu1 %v3219_v4 }
 0x189   :  { %913 = vmatprep.subr.mxu0 %v4286_v36  ;;  %984 = vmatprep.subr.mxu1 %v4287_v15 }
 0x18a   :  { %914 = vmatpush1.msra.mxu0 %v4288_v45  ;;  %985 = vmatpush1.msra.mxu1 %v4289_v63 }
 0x18b   :  { %915 = vmatprep.subr.mxu0 %v4290_v1  ;;  %986 = vmatprep.subr.mxu1 %v4291_v19  ;;  %v4312_v19 = vld [vmem:[#allocation47_spill] sm:$0xff] }
 0x18c   :  { %916 = vmatpush1.msra.mxu0 %v4292_v16  ;;  %987 = vmatpush1.msra.mxu1 %v4293_v27  ;;  %v4311_v16 = vld [vmem:[#allocation49_spill] sm:$0xff] }
 0x18d   :  { %917 = vmatprep.subr.mxu0 %v4294_v5  ;;  %988 = vmatprep.subr.mxu1 %v4295_v14 }
 0x18e   :  { %918 = vmatpush1.msra.mxu0 %v4296_v9  ;;  %989 = vmatpush1.msra.mxu1 %v4297_v12  ;;  %v4307_v12 = vld [vmem:[#allocation24_spill] sm:$0xff] }
 0x18f   :  { %919 = vmatprep.subr.mxu0 %v4298_v11  ;;  %990 = vmatprep.subr.mxu1 %v4299_v6  ;;  %v4308_v11 = vld [vmem:[#allocation25_spill] sm:$0xff] }
 0x190   :  { %920 = vmatpush1.msra.mxu0 %v4300_v10  ;;  %991 = vmatpush1.msra.mxu1 %v4301_v8  ;;  %v4309_v10 = vld [vmem:[#allocation46_spill] sm:$0xff] }
 0x191   :  { %921 = vmatprep.subr.mxu0 %v4302_v13  ;;  %992 = vmatprep.subr.mxu1 %v4303_v17  ;;  %v4310_v13 = vld [vmem:[#allocation48_spill] sm:$0xff] }
 0x192   :  { %922 = vmatpush1.msra.mxu0 %v4304_v20  ;;  %955 = vmatprep.mubr.f32.mxu0 %v4305_v7 }
 0x193   :  { %993 = vmatpush1.msra.mxu1 %v4306_v54  ;;  %1026 = vmatprep.mubr.f32.mxu1 %v4305_v7 }
 0x194   :  { %1078 = vmatprep.subr.mxu0 %v4307_v12  ;;  %1149 = vmatprep.subr.mxu1 %v4308_v11 }
 0x233   :  { %v770_v6 = vpop.f32.mrf.mxu0  ;;  %v841_v17 = vpop.f32.mrf.mxu1 }
 0x234   :  { %v846_v9 = vadd.f32 %v770_v6, %v4309_v10  ;;  %v848_v7 = vadd.f32 %v841_v17, %v4312_v19 }
 0x235   :  { %v772_v8 = vpop.f32.mrf.mxu0  ;;  %v843_v27 = vpop.f32.mrf.mxu1 }
 0x236   :  { %v2467_v14 = vmul.f32 -1.442695, %v846_v9  ;;  %v847_v5 = vadd.f32 %v772_v8, %v4310_v13  ;;  %v849_v54 = vadd.f32 %v843_v27, %v4311_v16 }
 0x238   :  { %2645 = vpow2.f32 %v2467_v14  ;;  %v2468_v20 = vmul.f32 -1.442695, %v847_v5  ;;  %v2469_v1 = vmul.f32 -1.442695, %v849_v54 }
 0x23a   :  { %2647 = vpow2.f32 %v2468_v20 }
 0x23b   :  { %2649 = vtanh.f32 %v848_v7 }
 0x23c   :  { %2651 = vpow2.f32 %v2469_v1 }
 0x245   :  { %v2646_v12 = vpop.eup %2645 }
 0x246   :  { %v858_v63 = vadd.f32 1.0, %v2646_v12 }
 0x247   :  { %v2648_v11 = vpop.eup %2647 }
 0x248   :  { %2653 = vrcp.f32 %v858_v63  ;;  %v865_v6 = vadd.f32 1.0, %v2648_v11  ;;  %v2650_v9 = vpop.eup %2649  ;;  %v4335_v63 = vld [vmem:[#allocation52_spill] sm:$0xff]  ;;  %v4336_v11 = vld [vmem:[#allocation53_spill] sm:$0xff] }
 0x249   :  { %v2652_v10 = vpop.eup %2651 }
 0x24a   :  { %2655 = vrcp.f32 %v865_v6  ;;  %v874_v13 = vadd.f32 1.0, %v2652_v10 }
 0x24c   :  { %2657 = vrcp.f32 %v874_v13 }
 0x255   :  { %v2654_v14 = vpop.eup %2653 }
 0x256   :  { %v878_v8 = vmul.f32 %v2654_v14, %v2650_v9  ;;  %v4337_v9 = vld [vmem:[#allocation51_spill] sm:$0xff] }
 0x257   :  { %v2656_v5 = vpop.eup %2655 }
 0x258   :  { %v877_v20 = vmul.f32 %v2656_v5, %v3458_v18 }
 0x259   :  { %v2658_v54 = vpop.eup %2657 }
 0x25a   :  { %v3536_v16 = vadd.f32 %v878_v8, %v877_v20 }
 0x25c   :  { %2659 = vtanh.f32 %v3536_v16 }
 0x269   :  { %v2660_v19 = vpop.eup %2659 }
 0x26a   :  { %v3539_v27 = vmul.f32 %v2660_v19, %v2658_v54 }
 0x26c   :  { %4313 = vst [vmem:[#allocation26_spill] sm:$0xff] %v3539_v27  ;;  %956 = vmatmul.mubr.f32.vlgmr.msra.gmra.mxu0 %v3539_v27  ;;  %1027 = vmatmul.mubr.f32.vlgmr.msra.gmra.mxu1 %v3539_v27  ;;  %v3688_v27 = vld [vmem:[#allocation15 + $0x150] sm:$0xff] }
 0x26d   :  { %1079 = vmatpush1.msra.mxu0 %v3077_v21  ;;  %1150 = vmatpush1.msra.mxu1 %v3079_v22  ;;  %v4314_v21 = vld [vmem:[#allocation29_spill] sm:$0xff]  ;;  %v4315_v22 = vld [vmem:[#allocation30_spill] sm:$0xff] }
 0x26e   :  { %1080 = vmatprep.subr.mxu0 %v3083_v23  ;;  %1151 = vmatprep.subr.mxu1 %v3085_v24  ;;  %v4316_v23 = vld [vmem:[#allocation31_spill] sm:$0xff]  ;;  %v4317_v24 = vld [vmem:[#allocation32_spill] sm:$0xff] }
 0x26f   :  { %1081 = vmatpush1.msra.mxu0 %v3091_v25  ;;  %1152 = vmatpush1.msra.mxu1 %v3093_v26  ;;  %v4318_v25 = vld [vmem:[#allocation33_spill] sm:$0xff]  ;;  %v4319_v26 = vld [vmem:[#allocation34_spill] sm:$0xff] }
 0x270   :  { %1082 = vmatprep.subr.mxu0 %v3099_v28  ;;  %1153 = vmatprep.subr.mxu1 %v3101_v29  ;;  %v4320_v28 = vld [vmem:[#allocation35_spill] sm:$0xff]  ;;  %v4321_v29 = vld [vmem:[#allocation36_spill] sm:$0xff] }
 0x271   :  { %1083 = vmatpush1.msra.mxu0 %v3105_v30  ;;  %1154 = vmatpush1.msra.mxu1 %v3107_v31  ;;  %v4322_v30 = vld [vmem:[#allocation37_spill] sm:$0xff]  ;;  %v4323_v31 = vld [vmem:[#allocation38_spill] sm:$0xff] }
 0x272   :  { %1084 = vmatprep.subr.mxu0 %v3111_v32  ;;  %1155 = vmatprep.subr.mxu1 %v3113_v33  ;;  %v4324_v32 = vld [vmem:[#allocation39_spill] sm:$0xff]  ;;  %v4325_v33 = vld [vmem:[#allocation40_spill] sm:$0xff] }
 0x273   :  { %1085 = vmatpush1.msra.mxu0 %v3119_v34  ;;  %1156 = vmatpush1.msra.mxu1 %v3121_v35  ;;  %v4326_v34 = vld [vmem:[#allocation41_spill] sm:$0xff]  ;;  %v4327_v35 = vld [vmem:[#allocation42_spill] sm:$0xff] }
 0x274   :  { %1086 = vmatprep.subr.mxu0 %v3127_v37  ;;  %1157 = vmatprep.subr.mxu1 %v3129_v38  ;;  %v4328_v37 = vld [vmem:[#allocation43_spill] sm:$0xff]  ;;  %v4329_v38 = vld [vmem:[#allocation44_spill] sm:$0xff] }
 0x275   :  { %1087 = vmatpush1.msra.mxu0 %v3133_v39  ;;  %1158 = vmatpush1.msra.mxu1 %v3135_v40  ;;  %v4330_v39 = vmov 0.0   ;;  %v4331_v40 = vld [vmem:[#allocation45_spill] sm:$0xff] }
 0x276   :  { %1088 = vmatprep.subr.mxu0 %v3139_v41  ;;  %1159 = vmatprep.subr.mxu1 %v3141_v42  ;;  %v3607_v41 = vld [vmem:[#allocation15 + $0x1e8] sm:$0xff]  ;;  %v3610_v42 = vld [vmem:[#allocation15 + $0x1f8] sm:$0xff] }
 0x277   :  { %1089 = vmatpush1.msra.mxu0 %v3147_v43  ;;  %1160 = vmatpush1.msra.mxu1 %v3149_v44  ;;  %4332 = vst [vmem:[#allocation27_spill] sm:$0xff] %v3607_v41  ;;  %4333 = vst [vmem:[#allocation28_spill] sm:$0xff] %v3610_v42  ;;  %v4334_v44 = vld [vmem:[#allocation50_spill] sm:$0xff] }
 0x278   :  { %1090 = vmatprep.subr.mxu0 %v3155_v46  ;;  %1161 = vmatprep.subr.mxu1 %v3157_v47 }
 0x279   :  { %1091 = vmatpush1.msra.mxu0 %v3161_v48  ;;  %1162 = vmatpush1.msra.mxu1 %v3163_v49 }
 0x27a   :  { %1092 = vmatprep.subr.mxu0 %v3167_v50  ;;  %1163 = vmatprep.subr.mxu1 %v3169_v51 }
 0x27b   :  { %1093 = vmatpush1.msra.mxu0 %v3175_v52  ;;  %1164 = vmatpush1.msra.mxu1 %v3177_v53 }
 0x27c   :  { %1094 = vmatprep.subr.mxu0 %v3183_v55  ;;  %1165 = vmatprep.subr.mxu1 %v3185_v56 }
 0x27d   :  { %1095 = vmatpush1.msra.mxu0 %v3189_v57  ;;  %1166 = vmatpush1.msra.mxu1 %v3191_v58 }
 0x27e   :  { %1096 = vmatprep.subr.mxu0 %v3195_v59  ;;  %1167 = vmatprep.subr.mxu1 %v3197_v60 }
 0x27f   :  { %1097 = vmatpush1.msra.mxu0 %v3203_v61  ;;  %1168 = vmatpush1.msra.mxu1 %v3205_v62 }
 0x280   :  { %1098 = vmatprep.subr.mxu0 %v3211_v0  ;;  %1169 = vmatprep.subr.mxu1 %v3213_v2 }
 0x281   :  { %1099 = vmatpush1.msra.mxu0 %v3217_v3  ;;  %1170 = vmatpush1.msra.mxu1 %v3219_v4 }
 0x282   :  { %1100 = vmatprep.subr.mxu0 %v4286_v36  ;;  %1171 = vmatprep.subr.mxu1 %v4287_v15 }
 0x283   :  { %1101 = vmatpush1.msra.mxu0 %v4288_v45  ;;  %1172 = vmatpush1.msra.mxu1 %v4314_v21 }
 0x284   :  { %1102 = vmatprep.subr.mxu0 %v4315_v22  ;;  %1173 = vmatprep.subr.mxu1 %v4316_v23 }
 0x285   :  { %1103 = vmatpush1.msra.mxu0 %v4317_v24  ;;  %1174 = vmatpush1.msra.mxu1 %v4318_v25 }
 0x286   :  { %1104 = vmatprep.subr.mxu0 %v4319_v26  ;;  %1175 = vmatprep.subr.mxu1 %v4320_v28 }
 0x287   :  { %1105 = vmatpush1.msra.mxu0 %v4321_v29  ;;  %1176 = vmatpush1.msra.mxu1 %v4322_v30 }
 0x288   :  { %1106 = vmatprep.subr.mxu0 %v4323_v31  ;;  %1177 = vmatprep.subr.mxu1 %v4324_v32 }
 0x289   :  { %1107 = vmatpush1.msra.mxu0 %v4325_v33  ;;  %1178 = vmatpush1.msra.mxu1 %v4326_v34 }
 0x28a   :  { %1108 = vmatprep.subr.mxu0 %v4327_v35  ;;  %1179 = vmatprep.subr.mxu1 %v4328_v37 }
 0x28b   :  { %1109 = vmatpush1.msra.mxu0 %v4329_v38  ;;  %1142 = vmatprep.mubr.f32.mxu0 %v4330_v39 }
 0x28c   :  { %1180 = vmatpush1.msra.mxu1 %v4331_v40  ;;  %1213 = vmatprep.mubr.f32.mxu1 %v4330_v39 }
 0x28d   :  { %1265 = vmatprep.subr.mxu0 %v3607_v41  ;;  %1336 = vmatprep.subr.mxu1 %v3610_v42 }
 0x32c   :  { %v957_v43 = vpop.f32.mrf.mxu0  ;;  %v1028_v17 = vpop.f32.mrf.mxu1 }
 0x32d   :  { %v1033_v46 = vadd.f32 %v957_v43, %v4334_v44  ;;  %v1035_v10 = vadd.f32 %v1028_v17, %v4337_v9  ;;  %v3637_v9 = vld [vmem:[#allocation15 + $0x1c0] sm:$0xff] }
 0x32e   :  { %v959_v47 = vpop.f32.mrf.mxu0  ;;  %v1030_v12 = vpop.f32.mrf.mxu1 }
 0x32f   :  { %v2470_v18 = vmul.f32 -1.442695, %v1033_v46  ;;  %v1034_v1 = vadd.f32 %v959_v47, %v4335_v63  ;;  %v1036_v6 = vadd.f32 %v1030_v12, %v4336_v11  ;;  %v3625_v12 = vld [vmem:[#allocation15 + $0x1e0] sm:$0xff]  ;;  %v3628_v11 = vld [vmem:[#allocation15 + $0x1f0] sm:$0xff] }
 0x331   :  { %2661 = vpow2.f32 %v2470_v18  ;;  %v2471_v7 = vmul.f32 -1.442695, %v1034_v1  ;;  %v2472_v14 = vmul.f32 -1.442695, %v1036_v6  ;;  %v3634_v6 = vld [vmem:[#allocation15 + $0x1d8] sm:$0xff] }
 0x333   :  { %2663 = vpow2.f32 %v2471_v7 }
 0x334   :  { %2665 = vtanh.f32 %v1035_v10  ;;  %v3640_v10 = vld [vmem:[#allocation15 + $0x1d0] sm:$0xff] }
 0x335   :  { %2667 = vpow2.f32 %v2472_v14  ;;  %v3643_v14 = vld [vmem:[#allocation15 + $0x1a8] sm:$0xff] }
 0x33e   :  { %v2662_v8 = vpop.eup %2661 }
 0x33f   :  { %v1045_v5 = vadd.f32 1.0, %v2662_v8  ;;  %v3646_v8 = vld [vmem:[#allocation15 + $0x1b8] sm:$0xff] }
 0x340   :  { %v2664_v13 = vpop.eup %2663 }
 0x341   :  { %2669 = vrcp.f32 %v1045_v5  ;;  %v1052_v20 = vadd.f32 1.0, %v2664_v13  ;;  %v2666_v54 = vpop.eup %2665  ;;  %v3649_v5 = vld [vmem:[#allocation15 + $0x1a0] sm:$0xff]  ;;  %v3652_v13 = vld [vmem:[#allocation15 + $0x1b0] sm:$0xff] }
 0x342   :  { %v2668_v19 = vpop.eup %2667 }
 0x343   :  { %2671 = vrcp.f32 %v1052_v20  ;;  %v1061_v47 = vadd.f32 1.0, %v2668_v19  ;;  %v3655_v20 = vld [vmem:[#allocation15 + $0x188] sm:$0xff]  ;;  %v3661_v19 = vld [vmem:[#allocation15 + $0x180] sm:$0xff] }
 0x345   :  { %2673 = vrcp.f32 %v1061_v47  ;;  %v3673_v47 = vld [vmem:[#allocation15 + $0x160] sm:$0xff] }
 0x346   :  { %4339 = vst [vmem:[#allocation25_spill] sm:$0xff] %v3673_v47 }
 0x34e   :  { %v2670_v43 = vpop.eup %2669 }
 0x34f   :  { %v1065_v44 = vmul.f32 %v2670_v43, %v2666_v54  ;;  %v3658_v54 = vld [vmem:[#allocation15 + $0x198] sm:$0xff]  ;;  %v3664_v43 = vld [vmem:[#allocation15 + $0x190] sm:$0xff] }
 0x350   :  { %v2672_v46 = vpop.eup %2671 }
 0x351   :  { %v1064_v18 = vmul.f32 %v2672_v46, %v3536_v16  ;;  %v3631_v16 = vld [vmem:[#allocation15 + $0x1c8] sm:$0xff]  ;;  %v3670_v46 = vld [vmem:[#allocation15 + $0x178] sm:$0xff] }
 0x352   :  { %v2674_v1 = vpop.eup %2673 }
 0x353   :  { %v3618_v63 = vadd.f32 %v1065_v44, %v1064_v18  ;;  %v3667_v44 = vld [vmem:[#allocation15 + $0x168] sm:$0xff]  ;;  %v3676_v18 = vld [vmem:[#allocation15 + $0x170] sm:$0xff] }
 0x354   :  { %4340 = vst [vmem:[#allocation46_spill] sm:$0xff] %v3676_v18 }
 0x355   :  { %2675 = vtanh.f32 %v3618_v63 }
 0x362   :  { %v2676_v17 = vpop.eup %2675 }
 0x363   :  { %v3621_v7 = vmul.f32 %v2676_v17, %v2674_v1  ;;  %v3679_v1 = vld [vmem:[#allocation15 + $0x148] sm:$0xff]  ;;  %v3682_v17 = vld [vmem:[#allocation15 + $0x158] sm:$0xff] }
 0x365   :  { %4338 = vst [vmem:[#allocation24_spill] sm:$0xff] %v3621_v7  ;;  %1143 = vmatmul.mubr.f32.vlgmr.msra.gmra.mxu0 %v3621_v7  ;;  %1214 = vmatmul.mubr.f32.vlgmr.msra.gmra.mxu1 %v3621_v7  ;;  %v3685_v7 = vld [vmem:[#allocation15 + $0x140] sm:$0xff] }
 0x366   :  { %1266 = vmatpush1.msra.mxu0 %v3625_v12  ;;  %1337 = vmatpush1.msra.mxu1 %v3628_v11 }
 0x367   :  { %1267 = vmatprep.subr.mxu0 %v3631_v16  ;;  %1338 = vmatprep.subr.mxu1 %v3634_v6 }
 0x368   :  { %1268 = vmatpush1.msra.mxu0 %v3637_v9  ;;  %1339 = vmatpush1.msra.mxu1 %v3640_v10 }
 0x369   :  { %1269 = vmatprep.subr.mxu0 %v3643_v14  ;;  %1340 = vmatprep.subr.mxu1 %v3646_v8 }
 0x36a   :  { %1270 = vmatpush1.msra.mxu0 %v3649_v5  ;;  %1341 = vmatpush1.msra.mxu1 %v3652_v13 }
 0x36b   :  { %1271 = vmatprep.subr.mxu0 %v3655_v20  ;;  %1342 = vmatprep.subr.mxu1 %v3658_v54 }
 0x36c   :  { %1272 = vmatpush1.msra.mxu0 %v3661_v19  ;;  %1343 = vmatpush1.msra.mxu1 %v3664_v43 }
 0x36d   :  { %1273 = vmatprep.subr.mxu0 %v3667_v44  ;;  %1344 = vmatprep.subr.mxu1 %v3670_v46 }
 0x36e   :  { %1274 = vmatpush1.msra.mxu0 %v3673_v47  ;;  %1345 = vmatpush1.msra.mxu1 %v3676_v18  ;;  %v3691_v47 = vld [vmem:[#allocation15 + $0x128] sm:$0xff]  ;;  %v3694_v18 = vld [vmem:[#allocation15 + $0x138] sm:$0xff] }
 0x36f   :  { %1275 = vmatprep.subr.mxu0 %v3679_v1  ;;  %1346 = vmatprep.subr.mxu1 %v3682_v17 }
 0x370   :  { %1276 = vmatpush1.msra.mxu0 %v3685_v7  ;;  %1347 = vmatpush1.msra.mxu1 %v3688_v27 }
 0x371   :  { %1277 = vmatprep.subr.mxu0 %v3691_v47  ;;  %1348 = vmatprep.subr.mxu1 %v3694_v18 }
 0x372   :  { %1278 = vmatpush1.msra.mxu0 %v3161_v48  ;;  %1349 = vmatpush1.msra.mxu1 %v3163_v49  ;;  %v4341_v49 = vld [vmem:[#allocation54_spill] sm:$0xff] }
 0x373   :  { %1279 = vmatprep.subr.mxu0 %v3167_v50  ;;  %1350 = vmatprep.subr.mxu1 %v3169_v51 }
 0x374   :  { %1280 = vmatpush1.msra.mxu0 %v3175_v52  ;;  %1351 = vmatpush1.msra.mxu1 %v3177_v53  ;;  %v4342_v53 = vld [vmem:[#allocation56_spill] sm:$0xff] }
 0x375   :  { %1281 = vmatprep.subr.mxu0 %v3183_v55  ;;  %1352 = vmatprep.subr.mxu1 %v3185_v56 }
 0x376   :  { %1282 = vmatpush1.msra.mxu0 %v3189_v57  ;;  %1353 = vmatpush1.msra.mxu1 %v3191_v58 }
 0x377   :  { %1283 = vmatprep.subr.mxu0 %v3195_v59  ;;  %1354 = vmatprep.subr.mxu1 %v3197_v60  ;;  %v4343_v59 = vld [vmem:[#allocation57_spill] sm:$0xff] }
 0x378   :  { %1284 = vmatpush1.msra.mxu0 %v3203_v61  ;;  %1355 = vmatpush1.msra.mxu1 %v3205_v62  ;;  %v4344_v61 = vld [vmem:[#allocation55_spill] sm:$0xff] }
 0x379   :  { %1285 = vmatprep.subr.mxu0 %v3211_v0  ;;  %1356 = vmatprep.subr.mxu1 %v3213_v2 }
 0x37a   :  { %1286 = vmatpush1.msra.mxu0 %v3217_v3  ;;  %1357 = vmatpush1.msra.mxu1 %v3219_v4 }
 0x37b   :  { %1287 = vmatprep.subr.mxu0 %v4286_v36  ;;  %1358 = vmatprep.subr.mxu1 %v4287_v15 }
 0x37c   :  { %1288 = vmatpush1.msra.mxu0 %v4288_v45  ;;  %1359 = vmatpush1.msra.mxu1 %v4314_v21 }
 0x37d   :  { %1289 = vmatprep.subr.mxu0 %v4315_v22  ;;  %1360 = vmatprep.subr.mxu1 %v4316_v23 }
 0x37e   :  { %1290 = vmatpush1.msra.mxu0 %v4317_v24  ;;  %1361 = vmatpush1.msra.mxu1 %v4318_v25 }
 0x37f   :  { %1291 = vmatprep.subr.mxu0 %v4319_v26  ;;  %1362 = vmatprep.subr.mxu1 %v4320_v28 }
 0x380   :  { %1292 = vmatpush1.msra.mxu0 %v4321_v29  ;;  %1363 = vmatpush1.msra.mxu1 %v4322_v30 }
 0x381   :  { %1293 = vmatprep.subr.mxu0 %v4323_v31  ;;  %1364 = vmatprep.subr.mxu1 %v4324_v32  ;;  %v4346_v31 = vld [vmem:[#allocation25_spill] sm:$0xff]  ;;  %v4347_v32 = vld [vmem:[#allocation46_spill] sm:$0xff] }
 0x382   :  { %1294 = vmatpush1.msra.mxu0 %v4325_v33  ;;  %1365 = vmatpush1.msra.mxu1 %v4326_v34  ;;  %v3775_v33 = vld [vmem:[#allocation15 + $0x120] sm:$0xff]  ;;  %v3778_v34 = vld [vmem:[#allocation15 + $0x130] sm:$0xff] }
 0x383   :  { %1295 = vmatprep.subr.mxu0 %v4327_v35  ;;  %1366 = vmatprep.subr.mxu1 %v4328_v37  ;;  %v3781_v35 = vld [vmem:[#allocation15 + $0x108] sm:$0xff]  ;;  %v3784_v37 = vld [vmem:[#allocation15 + $0x118] sm:$0xff] }
 0x384   :  { %1296 = vmatpush1.msra.mxu0 %v4329_v38  ;;  %1329 = vmatprep.mubr.f32.mxu0 %v4330_v39  ;;  %v3787_v38 = vld [vmem:[#allocation15 + $0x100] sm:$0xff] }
 0x385   :  { %1367 = vmatpush1.msra.mxu1 %v4331_v40  ;;  %1400 = vmatprep.mubr.f32.mxu1 %v4330_v39  ;;  %v3790_v40 = vld [vmem:[#allocation15 + $0x110] sm:$0xff] }
 0x386   :  { %1452 = vmatprep.subr.mxu0 %v3607_v41  ;;  %1523 = vmatprep.subr.mxu1 %v3610_v42 }
 0x425   :  { %v1144_v48 = vpop.f32.mrf.mxu0  ;;  %v1215_v56 = vpop.f32.mrf.mxu1 }
 0x426   :  { %v1220_v50 = vadd.f32 %v1144_v48, %v4341_v49  ;;  %v1222_v62 = vadd.f32 %v1215_v56, %v4344_v61  ;;  %v3796_v48 = vld [vmem:[#allocation15 + $0xf8] sm:$0xff]  ;;  %v3799_v49 = vld [vmem:[#allocation15 + $0xe0] sm:$0xff]  ;;  %v3817_v56 = vld [vmem:[#allocation15 + $0xa8] sm:$0xff] }
 0x427   :  { %v1146_v51 = vpop.f32.mrf.mxu0  ;;  %v1217_v58 = vpop.f32.mrf.mxu1  ;;  %v3832_v61 = vld [vmem:[#allocation15 + $0x98] sm:$0xff] }
 0x428   :  { %v2473_v52 = vmul.f32 -1.442695, %v1220_v50  ;;  %v1221_v55 = vadd.f32 %v1146_v51, %v4342_v53  ;;  %v1223_v60 = vadd.f32 %v1217_v58, %v4343_v59  ;;  %v3802_v50 = vld [vmem:[#allocation15 + $0xf0] sm:$0xff]  ;;  %v3805_v51 = vld [vmem:[#allocation15 + $0xc8] sm:$0xff]  ;;  %v3811_v53 = vld [vmem:[#allocation15 + $0xc0] sm:$0xff] }
 0x429   :  { %v3823_v58 = vld [vmem:[#allocation15 + $0xa0] sm:$0xff]  ;;  %v3826_v59 = vld [vmem:[#allocation15 + $0xb0] sm:$0xff] }
 0x42a   :  { %2677 = vpow2.f32 %v2473_v52  ;;  %v2474_v57 = vmul.f32 -1.442695, %v1221_v55  ;;  %v2475_v0 = vmul.f32 -1.442695, %v1223_v60  ;;  %v3808_v52 = vld [vmem:[#allocation15 + $0xd8] sm:$0xff]  ;;  %v3814_v55 = vld [vmem:[#allocation15 + $0xd0] sm:$0xff] }
 0x42b   :  { %v3829_v60 = vld [vmem:[#allocation15 + $0x88] sm:$0xff] }
 0x42c   :  { %2679 = vpow2.f32 %v2474_v57  ;;  %v3820_v57 = vld [vmem:[#allocation15 + $0xb8] sm:$0xff] }
 0x42d   :  { %2681 = vtanh.f32 %v1222_v62  ;;  %v3835_v62 = vld [vmem:[#allocation15 + $0x80] sm:$0xff] }
 0x42e   :  { %2683 = vpow2.f32 %v2475_v0  ;;  %v3838_v0 = vld [vmem:[#allocation15 + $0x90] sm:$0xff] }
 0x42f   :  { %4348 = vst [vmem:[#allocation49_spill] sm:$0xff] %v3838_v0 }
 0x437   :  { %v2678_v2 = vpop.eup %2677 }
 0x438   :  { %v1232_v3 = vadd.f32 1.0, %v2678_v2  ;;  %v3841_v2 = vld [vmem:[#allocation15 + $0x68] sm:$0xff] }
 0x439   :  { %v2680_v4 = vpop.eup %2679  ;;  %4349 = vst [vmem:[#allocation47_spill] sm:$0xff] %v3841_v2 }
 0x43a   :  { %2685 = vrcp.f32 %v1232_v3  ;;  %v1239_v36 = vadd.f32 1.0, %v2680_v4  ;;  %v2682_v15 = vpop.eup %2681  ;;  %v3844_v3 = vld [vmem:[#allocation15 + $0x78] sm:$0xff]  ;;  %v3847_v4 = vld [vmem:[#allocation15 + $0x60] sm:$0xff] }
 0x43b   :  { %v2684_v45 = vpop.eup %2683  ;;  %4350 = vst [vmem:[#allocation29_spill] sm:$0xff] %v3844_v3  ;;  %4351 = vst [vmem:[#allocation30_spill] sm:$0xff] %v3847_v4 }
 0x43c   :  { %2687 = vrcp.f32 %v1239_v36  ;;  %v1248_v24 = vadd.f32 1.0, %v2684_v45  ;;  %v3850_v36 = vld [vmem:[#allocation15 + $0x70] sm:$0xff]  ;;  %v3856_v45 = vld [vmem:[#allocation15 + $0x58] sm:$0xff] }
 0x43d   :  { %4352 = vst [vmem:[#allocation31_spill] sm:$0xff] %v3850_v36  ;;  %4354 = vst [vmem:[#allocation33_spill] sm:$0xff] %v3856_v45 }
 0x43e   :  { %2689 = vrcp.f32 %v1248_v24  ;;  %v3868_v24 = vld [vmem:[#allocation15 + $0x38] sm:$0xff] }
 0x43f   :  { %4358 = vst [vmem:[#allocation37_spill] sm:$0xff] %v3868_v24 }
 0x447   :  { %v2686_v21 = vpop.eup %2685 }
 0x448   :  { %v1252_v22 = vmul.f32 %v2686_v21, %v2682_v15  ;;  %v3853_v15 = vld [vmem:[#allocation15 + $0x48] sm:$0xff]  ;;  %v3859_v21 = vld [vmem:[#allocation15 + $0x40] sm:$0xff] }
 0x449   :  { %v2688_v23 = vpop.eup %2687  ;;  %4353 = vst [vmem:[#allocation32_spill] sm:$0xff] %v3853_v15  ;;  %4355 = vst [vmem:[#allocation34_spill] sm:$0xff] %v3859_v21 }
 0x44a   :  { %v1251_v25 = vmul.f32 %v2688_v23, %v3618_v63  ;;  %v3793_v63 = vld [vmem:[#allocation15 + $0xe8] sm:$0xff] }
 0x44b   :  { %v2690_v28 = vpop.eup %2689  ;;  %v3865_v23 = vld [vmem:[#allocation15 + $0x28] sm:$0xff] }
 0x44c   :  { %v3744_v26 = vadd.f32 %v1252_v22, %v1251_v25  ;;  %v3862_v22 = vld [vmem:[#allocation15 + $0x50] sm:$0xff]  ;;  %4357 = vst [vmem:[#allocation36_spill] sm:$0xff] %v3865_v23  ;;  %v3871_v25 = vld [vmem:[#allocation15 + $0x20] sm:$0xff] }
 0x44d   :  { %4356 = vst [vmem:[#allocation35_spill] sm:$0xff] %v3862_v22  ;;  %4359 = vst [vmem:[#allocation38_spill] sm:$0xff] %v3871_v25 }
 0x44e   :  { %2691 = vtanh.f32 %v3744_v26 }
 0x45b   :  { %v2692_v29 = vpop.eup %2691 }
 0x45c   :  { %v3747_v30 = vmul.f32 %v2692_v29, %v2690_v28  ;;  %v3874_v28 = vld [vmem:[#allocation15 + $0x30] sm:$0xff]  ;;  %v3877_v29 = vld [vmem:[#allocation15 + $0x8] sm:$0xff] }
 0x45d   :  { %4360 = vst [vmem:[#allocation39_spill] sm:$0xff] %v3874_v28  ;;  %4361 = vst [vmem:[#allocation40_spill] sm:$0xff] %v3877_v29 }
 0x45e   :  { %4345 = vst [vmem:[#allocation48_spill] sm:$0xff] %v3747_v30  ;;  %1330 = vmatmul.mubr.f32.vlgmr.msra.gmra.mxu0 %v3747_v30  ;;  %1401 = vmatmul.mubr.f32.vlgmr.msra.gmra.mxu1 %v3747_v30  ;;  %v3880_v30 = vld [vmem:[#allocation15 + $0x18] sm:$0xff] }
 0x45f   :  { %1453 = vmatpush1.msra.mxu0 %v3625_v12  ;;  %1524 = vmatpush1.msra.mxu1 %v3628_v11  ;;  %4362 = vst [vmem:[#allocation41_spill] sm:$0xff] %v3880_v30 }
 0x460   :  { %1454 = vmatprep.subr.mxu0 %v3631_v16  ;;  %1525 = vmatprep.subr.mxu1 %v3634_v6 }
 0x461   :  { %1455 = vmatpush1.msra.mxu0 %v3637_v9  ;;  %1526 = vmatpush1.msra.mxu1 %v3640_v10 }
 0x462   :  { %1456 = vmatprep.subr.mxu0 %v3643_v14  ;;  %1527 = vmatprep.subr.mxu1 %v3646_v8 }
 0x463   :  { %1457 = vmatpush1.msra.mxu0 %v3649_v5  ;;  %1528 = vmatpush1.msra.mxu1 %v3652_v13 }
 0x464   :  { %1458 = vmatprep.subr.mxu0 %v3655_v20  ;;  %1529 = vmatprep.subr.mxu1 %v3658_v54 }
 0x465   :  { %1459 = vmatpush1.msra.mxu0 %v3661_v19  ;;  %1530 = vmatpush1.msra.mxu1 %v3664_v43 }
 0x466   :  { %1460 = vmatprep.subr.mxu0 %v3667_v44  ;;  %1531 = vmatprep.subr.mxu1 %v3670_v46 }
 0x467   :  { %1461 = vmatpush1.msra.mxu0 %v4346_v31  ;;  %1532 = vmatpush1.msra.mxu1 %v4347_v32 }
 0x468   :  { %1462 = vmatprep.subr.mxu0 %v3679_v1  ;;  %1533 = vmatprep.subr.mxu1 %v3682_v17 }
 0x469   :  { %1463 = vmatpush1.msra.mxu0 %v3685_v7  ;;  %1534 = vmatpush1.msra.mxu1 %v3688_v27 }
 0x46a   :  { %1464 = vmatprep.subr.mxu0 %v3691_v47  ;;  %1535 = vmatprep.subr.mxu1 %v3694_v18 }
 0x46b   :  { %1465 = vmatpush1.msra.mxu0 %v3775_v33  ;;  %1536 = vmatpush1.msra.mxu1 %v3778_v34 }
 0x46c   :  { %1466 = vmatprep.subr.mxu0 %v3781_v35  ;;  %1537 = vmatprep.subr.mxu1 %v3784_v37 }
 0x46d   :  { %1467 = vmatpush1.msra.mxu0 %v3787_v38  ;;  %1538 = vmatpush1.msra.mxu1 %v3790_v40 }
 0x46e   :  { %1468 = vmatprep.subr.mxu0 %v3793_v63  ;;  %1539 = vmatprep.subr.mxu1 %v3796_v48 }
 0x46f   :  { %1469 = vmatpush1.msra.mxu0 %v3799_v49  ;;  %1540 = vmatpush1.msra.mxu1 %v3802_v50 }
 0x470   :  { %1470 = vmatprep.subr.mxu0 %v3805_v51  ;;  %1541 = vmatprep.subr.mxu1 %v3808_v52 }
 0x471   :  { %1471 = vmatpush1.msra.mxu0 %v3811_v53  ;;  %1542 = vmatpush1.msra.mxu1 %v3814_v55 }
 0x472   :  { %1472 = vmatprep.subr.mxu0 %v3817_v56  ;;  %1543 = vmatprep.subr.mxu1 %v3820_v57 }
 0x473   :  { %1473 = vmatpush1.msra.mxu0 %v3823_v58  ;;  %1544 = vmatpush1.msra.mxu1 %v3826_v59 }
 0x474   :  { %1474 = vmatprep.subr.mxu0 %v3829_v60  ;;  %1545 = vmatprep.subr.mxu1 %v3832_v61 }
 0x475   :  { %1475 = vmatpush1.msra.mxu0 %v3835_v62  ;;  %1546 = vmatpush1.msra.mxu1 %v3838_v0 }
 0x476   :  { %1476 = vmatprep.subr.mxu0 %v3841_v2  ;;  %1547 = vmatprep.subr.mxu1 %v3844_v3  ;;  %v4368_v3 = vld [vmem:[#allocation59_spill] sm:$0xff] }
 0x477   :  { %1477 = vmatpush1.msra.mxu0 %v3847_v4  ;;  %1548 = vmatpush1.msra.mxu1 %v3850_v36  ;;  %v4367_v4 = vld [vmem:[#allocation61_spill] sm:$0xff] }
 0x478   :  { %1478 = vmatprep.subr.mxu0 %v3853_v15  ;;  %1549 = vmatprep.subr.mxu1 %v3856_v45 }
 0x479   :  { %1479 = vmatpush1.msra.mxu0 %v3859_v21  ;;  %1550 = vmatpush1.msra.mxu1 %v3862_v22  ;;  %v4366_v21 = vld [vmem:[#allocation60_spill] sm:$0xff] }
 0x47a   :  { %1480 = vmatprep.subr.mxu0 %v3865_v23  ;;  %1551 = vmatprep.subr.mxu1 %v3868_v24  ;;  %v3883_v23 = vld [vmem:[#allocation15] sm:$0xff]  ;;  %v3887_v24 = vld [vmem:[#allocation15 + $0x10] sm:$0xff] }
 0x47b   :  { %1481 = vmatpush1.msra.mxu0 %v3871_v25  ;;  %1552 = vmatpush1.msra.mxu1 %v3874_v28  ;;  %4363 = vst [vmem:[#allocation42_spill] sm:$0xff] %v3883_v23  ;;  %4364 = vst [vmem:[#allocation43_spill] sm:$0xff] %v3887_v24  ;;  %v4365_v28 = vld [vmem:[#allocation58_spill] sm:$0xff] }
 0x47c   :  { %1482 = vmatprep.subr.mxu0 %v3877_v29  ;;  %1553 = vmatprep.subr.mxu1 %v3880_v30 }
 0x47d   :  { %1483 = vmatpush1.msra.mxu0 %v3883_v23  ;;  %1516 = vmatprep.mubr.f32.mxu0 %v4330_v39 }
 0x47e   :  { %1554 = vmatpush1.msra.mxu1 %v3887_v24  ;;  %1587 = vmatprep.mubr.f32.mxu1 %v4330_v39 }
 0x47f   :  { %1639 = vmatprep.subr.mxu0 %v3607_v41  ;;  %1710 = vmatprep.subr.mxu1 %v3610_v42 }
 0x51e   :  { %v1331_v29 = vpop.f32.mrf.mxu0  ;;  %v1402_v23 = vpop.f32.mrf.mxu1 }
 0x51f   :  { %v1407_v25 = vadd.f32 %v1331_v29, %v4365_v28  ;;  %v1409_v39 = vadd.f32 %v1402_v23, %v4368_v3  ;;  %v4375_v23 = vld [vmem:[#allocation32_spill] sm:$0xff] }
 0x520   :  { %v1333_v30 = vpop.f32.mrf.mxu0  ;;  %v1404_v36 = vpop.f32.mrf.mxu1 }
 0x521   :  { %v2476_v22 = vmul.f32 -1.442695, %v1407_v25  ;;  %v1408_v45 = vadd.f32 %v1333_v30, %v4366_v21  ;;  %v1410_v24 = vadd.f32 %v1404_v36, %v4367_v4  ;;  %v4374_v36 = vld [vmem:[#allocation31_spill] sm:$0xff] }
 0x523   :  { %2693 = vpow2.f32 %v2476_v22  ;;  %v2477_v15 = vmul.f32 -1.442695, %v1408_v45  ;;  %v2478_v2 = vmul.f32 -1.442695, %v1410_v24  ;;  %v4376_v24 = vld [vmem:[#allocation33_spill] sm:$0xff] }
 0x525   :  { %2695 = vpow2.f32 %v2477_v15 }
 0x526   :  { %2697 = vtanh.f32 %v1409_v39 }
 0x527   :  { %2699 = vpow2.f32 %v2478_v2  ;;  %v4373_v2 = vld [vmem:[#allocation30_spill] sm:$0xff] }
 0x530   :  { %v2694_v41 = vpop.eup %2693 }
 0x531   :  { %v1419_v0 = vadd.f32 1.0, %v2694_v41 }
 0x532   :  { %v2696_v42 = vpop.eup %2695 }
 0x533   :  { %2701 = vrcp.f32 %v1419_v0  ;;  %v1426_v28 = vadd.f32 1.0, %v2696_v42  ;;  %v2698_v25 = vpop.eup %2697  ;;  %v4370_v42 = vld [vmem:[#allocation49_spill] sm:$0xff] }
 0x534   :  { %v2700_v30 = vpop.eup %2699  ;;  %v4372_v0 = vld [vmem:[#allocation29_spill] sm:$0xff] }
 0x535   :  { %2703 = vrcp.f32 %v1426_v28  ;;  %v1435_v15 = vadd.f32 1.0, %v2700_v30  ;;  %v4377_v28 = vld [vmem:[#allocation34_spill] sm:$0xff]  ;;  %v4379_v30 = vld [vmem:[#allocation36_spill] sm:$0xff] }
 0x537   :  { %2705 = vrcp.f32 %v1435_v15  ;;  %v4383_v15 = vld [vmem:[#allocation40_spill] sm:$0xff] }
 0x540   :  { %v2702_v21 = vpop.eup %2701 }
 0x541   :  { %v1439_v22 = vmul.f32 %v2702_v21, %v2698_v25  ;;  %v4378_v25 = vld [vmem:[#allocation35_spill] sm:$0xff]  ;;  %v4380_v21 = vld [vmem:[#allocation37_spill] sm:$0xff] }
 0x542   :  { %v2704_v45 = vpop.eup %2703 }
 0x543   :  { %v1438_v29 = vmul.f32 %v2704_v45, %v3744_v26  ;;  %v4371_v26 = vld [vmem:[#allocation47_spill] sm:$0xff] }
 0x544   :  { %v2706_v41 = vpop.eup %2705  ;;  %v4382_v45 = vld [vmem:[#allocation39_spill] sm:$0xff] }
 0x545   :  { %v3898_v4 = vadd.f32 %v1439_v22, %v1438_v29  ;;  %v4381_v22 = vld [vmem:[#allocation38_spill] sm:$0xff]  ;;  %v4384_v29 = vld [vmem:[#allocation41_spill] sm:$0xff] }
 0x547   :  { %2707 = vtanh.f32 %v3898_v4 }
 0x554   :  { %v2708_v39 = vpop.eup %2707 }
 0x555   :  { %v3901_v3 = vmul.f32 %v2708_v39, %v2706_v41  ;;  %v4385_v41 = vld [vmem:[#allocation42_spill] sm:$0xff]  ;;  %v4386_v39 = vmov 0.0  }
 0x557   :  { %4369 = vst [vmem:[#allocation44_spill] sm:$0xff] %v3901_v3  ;;  %1517 = vmatmul.mubr.f32.vlgmr.msra.gmra.mxu0 %v3901_v3  ;;  %1588 = vmatmul.mubr.f32.vlgmr.msra.gmra.mxu1 %v3901_v3  ;;  %v4387_v3 = vld [vmem:[#allocation43_spill] sm:$0xff] }
 0x558   :  { %1640 = vmatpush1.msra.mxu0 %v3625_v12  ;;  %1711 = vmatpush1.msra.mxu1 %v3628_v11 }
 0x559   :  { %1641 = vmatprep.subr.mxu0 %v3631_v16  ;;  %1712 = vmatprep.subr.mxu1 %v3634_v6 }
 0x55a   :  { %1642 = vmatpush1.msra.mxu0 %v3637_v9  ;;  %1713 = vmatpush1.msra.mxu1 %v3640_v10 }
 0x55b   :  { %1643 = vmatprep.subr.mxu0 %v3643_v14  ;;  %1714 = vmatprep.subr.mxu1 %v3646_v8 }
 0x55c   :  { %1644 = vmatpush1.msra.mxu0 %v3649_v5  ;;  %1715 = vmatpush1.msra.mxu1 %v3652_v13 }
 0x55d   :  { %1645 = vmatprep.subr.mxu0 %v3655_v20  ;;  %1716 = vmatprep.subr.mxu1 %v3658_v54 }
 0x55e   :  { %1646 = vmatpush1.msra.mxu0 %v3661_v19  ;;  %1717 = vmatpush1.msra.mxu1 %v3664_v43 }
 0x55f   :  { %1647 = vmatprep.subr.mxu0 %v3667_v44  ;;  %1718 = vmatprep.subr.mxu1 %v3670_v46 }
 0x560   :  { %1648 = vmatpush1.msra.mxu0 %v4346_v31  ;;  %1719 = vmatpush1.msra.mxu1 %v4347_v32 }
 0x561   :  { %1649 = vmatprep.subr.mxu0 %v3679_v1  ;;  %1720 = vmatprep.subr.mxu1 %v3682_v17 }
 0x562   :  { %1650 = vmatpush1.msra.mxu0 %v3685_v7  ;;  %1721 = vmatpush1.msra.mxu1 %v3688_v27 }
 0x563   :  { %1651 = vmatprep.subr.mxu0 %v3691_v47  ;;  %1722 = vmatprep.subr.mxu1 %v3694_v18 }
 0x564   :  { %1652 = vmatpush1.msra.mxu0 %v3775_v33  ;;  %1723 = vmatpush1.msra.mxu1 %v3778_v34 }
 0x565   :  { %1653 = vmatprep.subr.mxu0 %v3781_v35  ;;  %1724 = vmatprep.subr.mxu1 %v3784_v37 }
 0x566   :  { %1654 = vmatpush1.msra.mxu0 %v3787_v38  ;;  %1725 = vmatpush1.msra.mxu1 %v3790_v40 }
 0x567   :  { %1655 = vmatprep.subr.mxu0 %v3793_v63  ;;  %1726 = vmatprep.subr.mxu1 %v3796_v48 }
 0x568   :  { %1656 = vmatpush1.msra.mxu0 %v3799_v49  ;;  %1727 = vmatpush1.msra.mxu1 %v3802_v50 }
 0x569   :  { %1657 = vmatprep.subr.mxu0 %v3805_v51  ;;  %1728 = vmatprep.subr.mxu1 %v3808_v52 }
 0x56a   :  { %1658 = vmatpush1.msra.mxu0 %v3811_v53  ;;  %1729 = vmatpush1.msra.mxu1 %v3814_v55 }
 0x56b   :  { %1659 = vmatprep.subr.mxu0 %v3817_v56  ;;  %1730 = vmatprep.subr.mxu1 %v3820_v57 }
 0x56c   :  { %1660 = vmatpush1.msra.mxu0 %v3823_v58  ;;  %1731 = vmatpush1.msra.mxu1 %v3826_v59 }
 0x56d   :  { %1661 = vmatprep.subr.mxu0 %v3829_v60  ;;  %1732 = vmatprep.subr.mxu1 %v3832_v61 }
 0x56e   :  { %1662 = vmatpush1.msra.mxu0 %v3835_v62  ;;  %1733 = vmatpush1.msra.mxu1 %v4370_v42 }
 0x56f   :  { %1663 = vmatprep.subr.mxu0 %v4371_v26  ;;  %1734 = vmatprep.subr.mxu1 %v4372_v0  ;;  %v4393_v0 = vld [vmem:[#allocation63_spill] sm:$0xff] }
 0x570   :  { %1664 = vmatpush1.msra.mxu0 %v4373_v2  ;;  %1735 = vmatpush1.msra.mxu1 %v4374_v36  ;;  %v4392_v2 = vld [vmem:[#allocation65_spill] sm:$0xff] }
 0x571   :  { %1665 = vmatprep.subr.mxu0 %v4375_v23  ;;  %1736 = vmatprep.subr.mxu1 %v4376_v24 }
 0x572   :  { %1666 = vmatpush1.msra.mxu0 %v4377_v28  ;;  %1737 = vmatpush1.msra.mxu1 %v4378_v25  ;;  %v4388_v25 = vld [vmem:[#allocation27_spill] sm:$0xff] }
 0x573   :  { %1667 = vmatprep.subr.mxu0 %v4379_v30  ;;  %1738 = vmatprep.subr.mxu1 %v4380_v21  ;;  %v4389_v30 = vld [vmem:[#allocation28_spill] sm:$0xff] }
 0x574   :  { %1668 = vmatpush1.msra.mxu0 %v4381_v22  ;;  %1739 = vmatpush1.msra.mxu1 %v4382_v45  ;;  %v4390_v22 = vld [vmem:[#allocation62_spill] sm:$0xff] }
 0x575   :  { %1669 = vmatprep.subr.mxu0 %v4383_v15  ;;  %1740 = vmatprep.subr.mxu1 %v4384_v29  ;;  %v4391_v15 = vld [vmem:[#allocation64_spill] sm:$0xff] }
 0x576   :  { %1670 = vmatpush1.msra.mxu0 %v4385_v41  ;;  %1703 = vmatprep.mubr.f32.mxu0 %v4386_v39 }
 0x577   :  { %1741 = vmatpush1.msra.mxu1 %v4387_v3  ;;  %1774 = vmatprep.mubr.f32.mxu1 %v4386_v39 }
 0x578   :  { %1826 = vmatprep.subr.mxu0 %v4388_v25  ;;  %1897 = vmatprep.subr.mxu1 %v4389_v30 }
 0x617   :  { %v1518_v21 = vpop.f32.mrf.mxu0  ;;  %v1589_v29 = vpop.f32.mrf.mxu1 }
 0x618   :  { %v1594_v28 = vadd.f32 %v1518_v21, %v4390_v22  ;;  %v1596_v39 = vadd.f32 %v1589_v29, %v4393_v0 }
 0x619   :  { %v1520_v45 = vpop.f32.mrf.mxu0  ;;  %v1591_v36 = vpop.f32.mrf.mxu1 }
 0x61a   :  { %v2479_v24 = vmul.f32 -1.442695, %v1594_v28  ;;  %v1595_v23 = vadd.f32 %v1520_v45, %v4391_v15  ;;  %v1597_v3 = vadd.f32 %v1591_v36, %v4392_v2 }
 0x61c   :  { %2709 = vpow2.f32 %v2479_v24  ;;  %v2480_v41 = vmul.f32 -1.442695, %v1595_v23  ;;  %v2481_v26 = vmul.f32 -1.442695, %v1597_v3 }
 0x61e   :  { %2711 = vpow2.f32 %v2480_v41 }
 0x61f   :  { %2713 = vtanh.f32 %v1596_v39  ;;  %v2030_v39 = vld [vmem:[#allocation16 + $0x70] sm:$0xff] }
 0x620   :  { %2715 = vpow2.f32 %v2481_v26 }
 0x629   :  { %v2710_v25 = vpop.eup %2709 }
 0x62a   :  { %v1606_v42 = vadd.f32 1.0, %v2710_v25  ;;  %v4416_v25 = vld [vmem:[#allocation74_spill] sm:$0xff] }
 0x62b   :  { %v2712_v30 = vpop.eup %2711 }
 0x62c   :  { %2717 = vrcp.f32 %v1606_v42  ;;  %v1613_v21 = vadd.f32 1.0, %v2712_v30  ;;  %v2714_v28 = vpop.eup %2713  ;;  %v2029_v30 = vld [vmem:[#allocation16 + $0x68] sm:$0xff] }
 0x62d   :  { %v2716_v22 = vpop.eup %2715 }
 0x62e   :  { %2719 = vrcp.f32 %v1613_v21  ;;  %v1622_v15 = vadd.f32 1.0, %v2716_v22  ;;  %v2028_v21 = vld [vmem:[#allocation16 + $0x60] sm:$0xff]  ;;  %v2026_v22 = vld [vmem:[#allocation16 + $0x50] sm:$0xff] }
 0x630   :  { %2721 = vrcp.f32 %v1622_v15  ;;  %v2022_v15 = vld [vmem:[#allocation16 + $0x30] sm:$0xff] }
 0x639   :  { %v2718_v24 = vpop.eup %2717 }
 0x63a   :  { %v1626_v45 = vmul.f32 %v2718_v24, %v2714_v28  ;;  %v2027_v28 = vld [vmem:[#allocation16 + $0x58] sm:$0xff]  ;;  %v2025_v24 = vld [vmem:[#allocation16 + $0x48] sm:$0xff] }
 0x63b   :  { %v2720_v23 = vpop.eup %2719 }
 0x63c   :  { %v1625_v41 = vmul.f32 %v2720_v23, %v3898_v4  ;;  %v2023_v23 = vld [vmem:[#allocation16 + $0x38] sm:$0xff] }
 0x63d   :  { %v2722_v3 = vpop.eup %2721 }
 0x63e   :  { %v3976_v2 = vadd.f32 %v1626_v45, %v1625_v41  ;;  %v2024_v45 = vld [vmem:[#allocation16 + $0x40] sm:$0xff]  ;;  %v2021_v41 = vld [vmem:[#allocation16 + $0x28] sm:$0xff] }
 0x640   :  { %2723 = vtanh.f32 %v3976_v2 }
 0x64d   :  { %v2724_v0 = vpop.eup %2723 }
 0x64e   :  { %v3979_v36 = vmul.f32 %v2724_v0, %v2722_v3  ;;  %v2019_v3 = vld [vmem:[#allocation16 + $0x18] sm:$0xff]  ;;  %v2018_v0 = vld [vmem:[#allocation16 + $0x10] sm:$0xff] }
 0x650   :  { %1704 = vmatmul.mubr.f32.vlgmr.msra.gmra.mxu0 %v3979_v36  ;;  %1775 = vmatmul.mubr.f32.vlgmr.msra.gmra.mxu1 %v3979_v36 }
 0x651   :  { %1827 = vmatpush1.msra.mxu0 %v3625_v12  ;;  %1898 = vmatpush1.msra.mxu1 %v3628_v11  ;;  %v4396_v12 = vld [vmem:[#allocation29_spill] sm:$0xff]  ;;  %v4397_v11 = vld [vmem:[#allocation30_spill] sm:$0xff] }
 0x652   :  { %1828 = vmatprep.subr.mxu0 %v3631_v16  ;;  %1899 = vmatprep.subr.mxu1 %v3634_v6  ;;  %v4398_v16 = vld [vmem:[#allocation31_spill] sm:$0xff]  ;;  %v4399_v6 = vld [vmem:[#allocation32_spill] sm:$0xff] }
 0x653   :  { %1829 = vmatpush1.msra.mxu0 %v3637_v9  ;;  %1900 = vmatpush1.msra.mxu1 %v3640_v10  ;;  %v4400_v9 = vld [vmem:[#allocation33_spill] sm:$0xff]  ;;  %v4401_v10 = vld [vmem:[#allocation34_spill] sm:$0xff] }
 0x654   :  { %1830 = vmatprep.subr.mxu0 %v3643_v14  ;;  %1901 = vmatprep.subr.mxu1 %v3646_v8  ;;  %v4402_v14 = vld [vmem:[#allocation35_spill] sm:$0xff]  ;;  %v4403_v8 = vld [vmem:[#allocation36_spill] sm:$0xff] }
 0x655   :  { %1831 = vmatpush1.msra.mxu0 %v3649_v5  ;;  %1902 = vmatpush1.msra.mxu1 %v3652_v13  ;;  %v4404_v5 = vld [vmem:[#allocation37_spill] sm:$0xff]  ;;  %v4405_v13 = vld [vmem:[#allocation38_spill] sm:$0xff] }
 0x656   :  { %1832 = vmatprep.subr.mxu0 %v3655_v20  ;;  %1903 = vmatprep.subr.mxu1 %v3658_v54  ;;  %v4406_v20 = vld [vmem:[#allocation39_spill] sm:$0xff]  ;;  %v4407_v54 = vld [vmem:[#allocation40_spill] sm:$0xff] }
 0x657   :  { %1833 = vmatpush1.msra.mxu0 %v3661_v19  ;;  %1904 = vmatpush1.msra.mxu1 %v3664_v43  ;;  %v4408_v19 = vld [vmem:[#allocation41_spill] sm:$0xff]  ;;  %v4409_v43 = vld [vmem:[#allocation42_spill] sm:$0xff] }
 0x658   :  { %1834 = vmatprep.subr.mxu0 %v3667_v44  ;;  %1905 = vmatprep.subr.mxu1 %v3670_v46  ;;  %v4410_v44 = vmov 0.0   ;;  %v4411_v46 = vld [vmem:[#allocation43_spill] sm:$0xff] }
 0x659   :  { %1835 = vmatpush1.msra.mxu0 %v4346_v31  ;;  %1906 = vmatpush1.msra.mxu1 %v4347_v32  ;;  %115 = vst.msk [vmem:[#allocation8] sm:$0xff] %vm113_vm1, %v4410_v44 }
 0x65a   :  { %1836 = vmatprep.subr.mxu0 %v3679_v1  ;;  %1907 = vmatprep.subr.mxu1 %v3682_v17  ;;  %v4412_v1 = vld [vmem:[#allocation66_spill] sm:$0xff] }
 0x65b   :  { %1837 = vmatpush1.msra.mxu0 %v3685_v7  ;;  %1908 = vmatpush1.msra.mxu1 %v3688_v27  ;;  %v4394_v27 = vld [vmem:[#allocation49_spill] sm:$0xff]  ;;  %v4395_v7 = vld [vmem:[#allocation47_spill] sm:$0xff] }
 0x65c   :  { %1838 = vmatprep.subr.mxu0 %v3691_v47  ;;  %1909 = vmatprep.subr.mxu1 %v3694_v18  ;;  %v2031_v47 = vld [vmem:[#allocation16 + $0x78] sm:$0xff] }
 0x65d   :  { %1839 = vmatpush1.msra.mxu0 %v3775_v33  ;;  %1910 = vmatpush1.msra.mxu1 %v3778_v34  ;;  %v4413_v33 = vld [vmem:[#allocation68_spill] sm:$0xff] }
 0x65e   :  { %1840 = vmatprep.subr.mxu0 %v3781_v35  ;;  %1911 = vmatprep.subr.mxu1 %v3784_v37 }
 0x65f   :  { %1841 = vmatpush1.msra.mxu0 %v3787_v38  ;;  %1912 = vmatpush1.msra.mxu1 %v3790_v40  ;;  %v4414_v40 = vld [vmem:[#allocation69_spill] sm:$0xff] }
 0x660   :  { %1842 = vmatprep.subr.mxu0 %v3793_v63  ;;  %1913 = vmatprep.subr.mxu1 %v3796_v48  ;;  %v4415_v48 = vld [vmem:[#allocation67_spill] sm:$0xff] }
 0x661   :  { %1843 = vmatpush1.msra.mxu0 %v3799_v49  ;;  %1914 = vmatpush1.msra.mxu1 %v3802_v50 }
 0x662   :  { %1844 = vmatprep.subr.mxu0 %v3805_v51  ;;  %1915 = vmatprep.subr.mxu1 %v3808_v52 }
 0x663   :  { %1845 = vmatpush1.msra.mxu0 %v3811_v53  ;;  %1916 = vmatpush1.msra.mxu1 %v3814_v55 }
 0x664   :  { %1846 = vmatprep.subr.mxu0 %v3817_v56  ;;  %1917 = vmatprep.subr.mxu1 %v3820_v57 }
 0x665   :  { %1847 = vmatpush1.msra.mxu0 %v3823_v58  ;;  %1918 = vmatpush1.msra.mxu1 %v3826_v59 }
 0x666   :  { %1848 = vmatprep.subr.mxu0 %v3829_v60  ;;  %1919 = vmatprep.subr.mxu1 %v3832_v61 }
 0x667   :  { %1849 = vmatpush1.msra.mxu0 %v3835_v62  ;;  %1920 = vmatpush1.msra.mxu1 %v4394_v27  ;;  %v2017_v27 = vld [vmem:[#allocation16 + $0x8] sm:$0xff] }
 0x668   :  { %1850 = vmatprep.subr.mxu0 %v4395_v7  ;;  %1921 = vmatprep.subr.mxu1 %v4396_v12  ;;  %v2016_v7 = vld [vmem:[#allocation16] sm:$0xff]  ;;  %v4417_v12 = vld [vmem:[#allocation26_spill] sm:$0xff] }
 0x669   :  { %1851 = vmatpush1.msra.mxu0 %v4397_v11  ;;  %1922 = vmatpush1.msra.mxu1 %v4398_v16  ;;  %v4418_v11 = vld [vmem:[#allocation24_spill] sm:$0xff] }
 0x66a   :  { %1852 = vmatprep.subr.mxu0 %v4399_v6  ;;  %1923 = vmatprep.subr.mxu1 %v4400_v9  ;;  %v4419_v16 = vld [vmem:[#allocation48_spill] sm:$0xff]  ;;  %v2183_v9 = vld [vmem:[#allocation9] sm:$0x1] }
 0x66b   :  { %1853 = vmatpush1.msra.mxu0 %v4401_v10  ;;  %1924 = vmatpush1.msra.mxu1 %v4402_v14  ;;  %v4420_v6 = vld [vmem:[#allocation44_spill] sm:$0xff]  ;;  %2611 = vpush %v2183_v9  ;;  %v4421_v14 = vld [vmem:[#allocation70_spill] sm:$0xff] }
 0x66c   :  { %1854 = vmatprep.subr.mxu0 %v4403_v8  ;;  %1925 = vmatprep.subr.mxu1 %v4404_v5 }
 0x66d   :  { %1855 = vmatpush1.msra.mxu0 %v4405_v13  ;;  %1926 = vmatpush1.msra.mxu1 %v4406_v20  ;;  %v4422_v20 = vld [vmem:[#allocation72_spill] sm:$0xff] }
 0x66e   :  { %1856 = vmatprep.subr.mxu0 %v4407_v54  ;;  %1927 = vmatprep.subr.mxu1 %v4408_v19 }
 0x66f   :  { %1857 = vmatpush1.msra.mxu0 %v4409_v43  ;;  %1890 = vmatprep.mubr.f32.mxu0 %v4410_v44 }
 0x670   :  { %1928 = vmatpush1.msra.mxu1 %v4411_v46  ;;  %1961 = vmatprep.mubr.f32.mxu1 %v4410_v44 }
 0x671   :  { %2576 = vmatprep.subr.mxu1 %v4410_v44  ;;  %2532 = vmatprep.subr.mxu0 %v2031_v47 }
 0x710   :  { %v1705_v18 = vpop.f32.mrf.mxu0  ;;  %v1776_v35 = vpop.f32.mrf.mxu1 }
 0x711   :  { %v1781_v17 = vadd.f32 %v1705_v18, %v4412_v1  ;;  %v1783_v49 = vadd.f32 %v1776_v35, %v4415_v48  ;;  %v4424_v1 = vld [vmem:[#allocation71_spill] sm:$0xff] }
 0x712   :  { %v1707_v31 = vpop.f32.mrf.mxu0  ;;  %v1778_v38 = vpop.f32.mrf.mxu1 }
 0x713   :  { %v2482_v32 = vmul.f32 -1.442695, %v1781_v17  ;;  %v1782_v34 = vadd.f32 %v1707_v31, %v4413_v33  ;;  %v1784_v63 = vadd.f32 %v1778_v38, %v4414_v40 }
 0x715   :  { %2725 = vpow2.f32 %v2482_v32  ;;  %v2483_v37 = vmul.f32 -1.442695, %v1782_v34  ;;  %v2484_v50 = vmul.f32 -1.442695, %v1784_v63 }
 0x717   :  { %2727 = vpow2.f32 %v2483_v37  ;;  %v2488_v37 = vld [vmem:[%s4129_s5] ss:$0 sm:$0xff]  ;;  %s2612_s5 = spop %2611 }
 0x718   :  { %2729 = vtanh.f32 %v1783_v49 }
 0x719   :  { %2731 = vpow2.f32 %v2484_v50 }
 0x722   :  { %v2726_v51 = vpop.eup %2725 }
 0x723   :  { %v1793_v52 = vadd.f32 1.0, %v2726_v51  ;;  %v2489_v51 = vld [vmem:[%s4130_s6] ss:$0 sm:$0xff] }
 0x724   :  { %v2728_v53 = vpop.eup %2727 }
 0x725   :  { %2733 = vrcp.f32 %v1793_v52  ;;  %v1800_v55 = vadd.f32 1.0, %v2728_v53  ;;  %v2730_v56 = vpop.eup %2729 }
 0x726   :  { %v2732_v57 = vpop.eup %2731 }
 0x727   :  { %2735 = vrcp.f32 %v1800_v55  ;;  %v1809_v61 = vadd.f32 1.0, %v2732_v57 }
 0x729   :  { %2737 = vrcp.f32 %v1809_v61 }
 0x732   :  { %v2734_v58 = vpop.eup %2733 }
 0x733   :  { %v1813_v59 = vmul.f32 %v2734_v58, %v2730_v56 }
 0x734   :  { %v2736_v60 = vpop.eup %2735 }
 0x735   :  { %v1812_v62 = vmul.f32 %v2736_v60, %v3976_v2  ;;  %v2020_v2 = vld [vmem:[#allocation16 + $0x20] sm:$0xff] }
 0x736   :  { %v2738_v42 = vpop.eup %2737 }
 0x737   :  { %v4053_v4 = vadd.f32 %v1813_v59, %v1812_v62 }
 0x739   :  { %2739 = vtanh.f32 %v4053_v4 }
 0x746   :  { %v2740_v26 = vpop.eup %2739 }
 0x747   :  { %v4056_v29 = vmul.f32 %v2740_v26, %v2738_v42 }
 0x749   :  { %1891 = vmatmul.mubr.f32.vlgmr.msra.gmra.mxu0 %v4056_v29  ;;  %1962 = vmatmul.mubr.f32.vlgmr.msra.gmra.mxu1 %v4056_v29 }
 0x74a   :  { %2533 = vmatpush3.msra.mxu0 %v2031_v47  ;;  %2564 = vmatprep.mubr.f32.mxu0 %v4416_v25  ;;  %v4423_v47 = vld [vmem:[#allocation73_spill] sm:$0xff] }
 0x74b   :  { %2534 = vmatprep.subr.mxu0 %v2030_v39  ;;  %2608 = vmatprep.mubr.msk.f32.mxu1 %vm2981_vm2, %v4410_v44 }
 0x74c   :  { %2535 = vmatpush3.msra.mxu0 %v2030_v39 }
 0x74d   :  { %2536 = vmatprep.subr.mxu0 %v2029_v30 }
 0x74e   :  { %2537 = vmatpush3.msra.mxu0 %v2029_v30 }
 0x74f   :  { %2538 = vmatprep.subr.mxu0 %v2028_v21 }
 0x750   :  { %2539 = vmatpush3.msra.mxu0 %v2028_v21 }
 0x751   :  { %2540 = vmatprep.subr.mxu0 %v2027_v28 }
 0x752   :  { %2541 = vmatpush3.msra.mxu0 %v2027_v28 }
 0x753   :  { %2542 = vmatprep.subr.mxu0 %v2026_v22 }
 0x754   :  { %2543 = vmatpush3.msra.mxu0 %v2026_v22 }
 0x755   :  { %2544 = vmatprep.subr.mxu0 %v2025_v24 }
 0x756   :  { %2545 = vmatpush3.msra.mxu0 %v2025_v24 }
 0x757   :  { %2546 = vmatprep.subr.mxu0 %v2024_v45 }
 0x758   :  { %2547 = vmatpush3.msra.mxu0 %v2024_v45 }
 0x759   :  { %2548 = vmatprep.subr.mxu0 %v2023_v23 }
 0x75a   :  { %2549 = vmatpush3.msra.mxu0 %v2023_v23 }
 0x75b   :  { %2550 = vmatprep.subr.mxu0 %v2022_v15 }
 0x75c   :  { %2551 = vmatpush3.msra.mxu0 %v2022_v15 }
 0x75d   :  { %2552 = vmatprep.subr.mxu0 %v2021_v41 }
 0x75e   :  { %2553 = vmatpush3.msra.mxu0 %v2021_v41 }
 0x75f   :  { %2554 = vmatprep.subr.mxu0 %v2020_v2 }
 0x760   :  { %2555 = vmatpush3.msra.mxu0 %v2020_v2 }
 0x761   :  { %2556 = vmatprep.subr.mxu0 %v2019_v3 }
 0x762   :  { %2557 = vmatpush3.msra.mxu0 %v2019_v3 }
 0x763   :  { %2558 = vmatprep.subr.mxu0 %v2018_v0 }
 0x764   :  { %2559 = vmatpush3.msra.mxu0 %v2018_v0 }
 0x765   :  { %2560 = vmatprep.subr.mxu0 %v2017_v27 }
 0x766   :  { %2561 = vmatpush3.msra.mxu0 %v2017_v27 }
 0x767   :  { %2562 = vmatprep.subr.mxu0 %v2016_v7 }
 0x768   :  { %2563 = vmatpush3.msra.mxu0 %v2016_v7 }
 0x769   :  { %2565 = vmatmul.mubr.f32.vlgmr.msra.gmra.mxu0 %v4417_v12 }
 0x76a   :  { %2567 = vmatprep.mubr.f32.mxu0 %v4418_v11 }
 0x76d   :  { %2568 = vmatmul.mubr.f32.gmra.mxu0 %v4419_v16 }
 0x76e   :  { %2570 = vmatprep.mubr.f32.mxu0 %v4420_v6 }
 0x771   :  { %2571 = vmatmul.mubr.f32.gmra.mxu0 %v3979_v36 }
 0x772   :  { %2573 = vmatprep.mubr.f32.mxu0 %v4056_v29 }
 0x809   :  { %v1892_v10 = vpop.f32.mrf.mxu0  ;;  %v1963_v19 = vpop.f32.mrf.mxu1 }
 0x80a   :  { %v1968_v8 = vadd.f32 %v1892_v10, %v4421_v14  ;;  %v1970_v17 = vadd.f32 %v1963_v19, %v4424_v1 }
 0x80b   :  { %v1894_v5 = vpop.f32.mrf.mxu0  ;;  %v1965_v46 = vpop.f32.mrf.mxu1 }
 0x80c   :  { %v2485_v13 = vmul.f32 -1.442695, %v1968_v8  ;;  %v1969_v54 = vadd.f32 %v1894_v5, %v4422_v20  ;;  %v1971_v18 = vadd.f32 %v1965_v46, %v4423_v47  ;;  %v2980_v46 = vmov 0  }
 0x80d   :  { %2628 = vset.pattern.permute.xlu1 %v2980_v46  ;;  %2627 = vset.pattern.permute.xlu0 %v2980_v46 }
 0x80e   :  { %2741 = vpow2.f32 %v2485_v13  ;;  %v2486_v43 = vmul.f32 -1.442695, %v1969_v54  ;;  %v2487_v31 = vmul.f32 -1.442695, %v1971_v18 }
 0x810   :  { %2743 = vpow2.f32 %v2486_v43  ;;  %v2979_v43 = vmov -inf  }
 0x811   :  { %2745 = vtanh.f32 %v1970_v17  ;;  %114 = vst.msk [vmem:[#allocation7] sm:$0xff] %vm113_vm1, %v2979_v43 }
 0x812   :  { %2747 = vpow2.f32 %v2487_v31 }
 0x81b   :  { %v2742_v32 = vpop.eup %2741 }
 0x81c   :  { %v1980_v33 = vadd.f32 1.0, %v2742_v32  ;;  %v2185_v32 = vstv %s2612_s5 }
 0x81d   :  { %v2744_v34 = vpop.eup %2743 }
 0x81e   :  { %2749 = vrcp.f32 %v1980_v33  ;;  %v1987_v35 = vadd.f32 1.0, %v2744_v34  ;;  %v2746_v38 = vpop.eup %2745 }
 0x81f   :  { %v2748_v63 = vpop.eup %2747 }
 0x820   :  { %2751 = vrcp.f32 %v1987_v35  ;;  %v1996_v57 = vadd.f32 1.0, %v2748_v63 }
 0x822   :  { %2753 = vrcp.f32 %v1996_v57 }
 0x829   :  { %v2566_v40 = vpop.f32.mrf.mxu0 }
 0x82a   :  { %v2111_v48 = vadd.f32 %v2566_v40, %v2488_v37 }
 0x82b   :  { %v2750_v49 = vpop.eup %2749  ;;  %v2105_v50 = vpop.f32.mrf.mxu0 }
 0x82c   :  { %v2000_v52 = vmul.f32 %v2750_v49, %v2746_v38  ;;  %v2145_v53 = vmax.f32 %v2111_v48, 0.0  ;;  %v2106_v55 = vadd.f32 %v2488_v37, %v2105_v50 }
 0x82d   :  { %v2752_v56 = vpop.eup %2751  ;;  %v2569_v58 = vpop.f32.mrf.mxu0 }
 0x82e   :  { %v1999_v59 = vmul.f32 %v2752_v56, %v4053_v4  ;;  %v2144_v60 = vmax.f32 %v2106_v55, 0.0  ;;  %v2121_v61 = vadd.f32 %v2569_v58, %v2488_v37  ;;  %v2160_v62 = vmul.f32 %v2489_v51, %v2145_v53 }
 0x82f   :  { %v2115_v42 = vpop.f32.mrf.mxu0  ;;  %v2754_v27 = vpop.eup %2753 }
 0x830   :  { %v2147_v26 = vmax.f32 %v2121_v61, 0.0  ;;  %v2116_v39 = vadd.f32 %v2488_v37, %v2115_v42  ;;  %2169 = vadd.xlane.f32.xlu0 %v2160_v62  ;;  %v2001_v30 = vadd.f32 %v2000_v52, %v1999_v59  ;;  %v2159_v28 = vmul.f32 %v2489_v51, %v2144_v60  ;;  %v2194_v59 = vld [vmem:[#allocation7] sm:$0xff] }
 0x831   :  { %v2572_v21 = vpop.f32.mrf.mxu0 }
 0x832   :  { %v2146_v22 = vmax.f32 %v2116_v39, 0.0  ;;  %v2131_v24 = vadd.f32 %v2572_v21, %v2488_v37  ;;  %v2162_v45 = vmul.f32 %v2489_v51, %v2147_v26  ;;  %2755 = vtanh.f32 %v2001_v30 }
 0x833   :  { %v2125_v23 = vpop.f32.mrf.mxu0 }
 0x834   :  { %v2126_v15 = vadd.f32 %v2488_v37, %v2125_v23  ;;  %2173 = vadd.xlane.f32.xlu1 %v2162_v45  ;;  %2167 = vadd.xlane.f32.xlu0 %v2159_v28  ;;  %v2149_v4 = vmax.f32 %v2131_v24, 0.0  ;;  %v2161_v2 = vmul.f32 %v2489_v51, %v2146_v22 }
 0x836   :  { %v2148_v41 = vmax.f32 %v2126_v15, 0.0  ;;  %v2164_v0 = vmul.f32 %v2489_v51, %v2149_v4 }
 0x838   :  { %2171 = vadd.xlane.f32.xlu1 %v2161_v2  ;;  %v2163_v3 = vmul.f32 %v2489_v51, %v2148_v41 }
 0x83a   :  { %2175 = vadd.xlane.f32.xlu0 %v2163_v3 }
 0x83c   :  { %2177 = vadd.xlane.f32.xlu1 %v2164_v0 }
 0x83f   :  { %v2756_v7 = vpop.eup %2755 }
 0x840   :  { %v4078_v9 = vmul.f32 %v2756_v7, %v2754_v27 }
 0x842   :  { %2574 = vmatmul.mubr.f32.gmra.mxu0 %v4078_v9 }
 0x8b9   :  { %v2170_v18 = vpop.xlane.xlu0 %2169 }
 0x8bd   :  { %v2174_v47 = vpop.xlane.xlu1 %2173  ;;  %v2168_v17 = vpop.xlane.xlu0 %2167 }
 0x8be   :  { %v2189_v63 = vadd.f32 %v2185_v32, %v2174_v47  ;;  %v2186_v49 = vadd.f32 %v2185_v32, %v2168_v17 }
 0x8c1   :  { %v2172_v1 = vpop.xlane.xlu1 %2171 }
 0x8c2   :  { %v2188_v50 = vadd.f32 %v2185_v32, %v2172_v1 }
 0x8c3   :  { %v2176_v33 = vpop.xlane.xlu0 %2175 }
 0x8c4   :  { %v2190_v38 = vadd.f32 %v2185_v32, %v2176_v33 }
 0x8c5   :  { %v2178_v31 = vpop.xlane.xlu1 %2177 }
 0x8c6   :  { %v2191_v34 = vadd.f32 %v2185_v32, %v2178_v31  ;;  %v2195_v53 = vmax.f32 %v2186_v49, %v2190_v38 }
 0x902   :  { %v2575_v10 = vpop.f32.mrf.mxu0 }
 0x903   :  { %v2141_v14 = vadd.f32 %v2575_v10, %v2488_v37 }
 0x904   :  { %v2135_v8 = vpop.f32.mrf.mxu0 }
 0x905   :  { %v2151_v5 = vmax.f32 %v2141_v14, 0.0  ;;  %v2136_v13 = vadd.f32 %v2488_v37, %v2135_v8  ;;  %v2187_v37 = vadd.f32 %v2185_v32, %v2170_v18 }
 0x907   :  { %v2150_v20 = vmax.f32 %v2136_v13, 0.0  ;;  %v2166_v54 = vmul.f32 %v2489_v51, %v2151_v5 }
 0x909   :  { %2181 = vadd.xlane.f32.xlu1 %v2166_v54  ;;  %v2165_v19 = vmul.f32 %v2489_v51, %v2150_v20  ;;  %v2196_v51 = vmax.f32 %v2187_v37, %v2191_v34 }
 0x90b   :  { %2179 = vadd.xlane.f32.xlu0 %v2165_v19  ;;  %v2199_v57 = vmax.f32 %v2195_v53, %v2196_v51  ;;  %v2344_v51 = vld [vmem:[#allocation18 + $0x70] sm:$0xff]  ;;  %v2343_v53 = vld [vmem:[#allocation18 + $0x68] sm:$0xff] }
 0x992   :  { %v2182_v35 = vpop.xlane.xlu1 %2181 }
 0x993   :  { %v2193_v40 = vadd.f32 %v2185_v32, %v2182_v35 }
 0x994   :  { %v2180_v48 = vpop.xlane.xlu0 %2179 }
 0x995   :  { %v2192_v52 = vadd.f32 %v2185_v32, %v2180_v48  ;;  %v2198_v55 = vmax.f32 %v2189_v63, %v2193_v40 }
 0x997   :  { %v2197_v56 = vmax.f32 %v2188_v50, %v2192_v52 }
 0x999   :  { %v2200_v58 = vmax.f32 %v2197_v56, %v2198_v55  ;;  %v2342_v55 = vld [vmem:[#allocation18 + $0x60] sm:$0xff]  ;;  %v2341_v56 = vld [vmem:[#allocation18 + $0x58] sm:$0xff] }
 0x99b   :  { %v2201_v60 = vmax.f32 %v2199_v57, %v2200_v58  ;;  %v2340_v57 = vld [vmem:[#allocation18 + $0x50] sm:$0xff] }
 0x99d   :  { %v2202_v61 = vmax.f32 %v2194_v59, %v2201_v60  ;;  %v2338_v60 = vld [vmem:[#allocation18 + $0x40] sm:$0xff] }
 0x99f   :  { %v2206_v62 = vsub.f32 %v2186_v49, %v2202_v61  ;;  %v2207_v42 = vsub.f32 %v2187_v37, %v2202_v61  ;;  %v2208_v26 = vsub.f32 %v2188_v50, %v2202_v61  ;;  %2314 = vst.msk [vmem:[#allocation7] sm:$0xff] %vm113_vm1, %v2202_v61  ;;  %v2209_v39 = vsub.f32 %v2189_v63, %v2202_v61  ;;  %v2230_v37 = vld [vmem:[#allocation8] sm:$0xff] }
 0x9a0   :  { %v2210_v30 = vsub.f32 %v2190_v38, %v2202_v61  ;;  %v2211_v24 = vsub.f32 %v2191_v34, %v2202_v61  ;;  %v2212_v23 = vsub.f32 %v2192_v52, %v2202_v61  ;;  %v2213_v4 = vsub.f32 %v2193_v40, %v2202_v61  ;;  %v2345_v50 = vld [vmem:[#allocation18 + $0x78] sm:$0xff] }
 0x9a1   :  { %v2214_v21 = vmul.f32 1.442695, %v2206_v62  ;;  %v2216_v28 = vmul.f32 1.442695, %v2207_v42  ;;  %v2218_v22 = vmul.f32 1.442695, %v2208_v26  ;;  %v2203_v2 = vsub.f32 %v2194_v59, %v2202_v61  ;;  %2577 = vmatpush3.msra.mxu1 %v2345_v50 }
 0x9a2   :  { %v2220_v45 = vmul.f32 1.442695, %v2209_v39  ;;  %v2222_v15 = vmul.f32 1.442695, %v2210_v30  ;;  %v2224_v41 = vmul.f32 1.442695, %v2211_v24  ;;  %2578 = vmatprep.subr.mxu1 %v4410_v44 }
 0x9a3   :  { %2757 = vpow2.f32 %v2214_v21  ;;  %v2226_v3 = vmul.f32 1.442695, %v2212_v23  ;;  %v2228_v0 = vmul.f32 1.442695, %v2213_v4  ;;  %v2204_v27 = vmul.f32 1.442695, %v2203_v2  ;;  %2579 = vmatpush3.msra.mxu1 %v2344_v51 }
 0x9a4   :  { %2759 = vpow2.f32 %v2216_v28  ;;  %2580 = vmatprep.subr.mxu1 %v4410_v44  ;;  %v2339_v59 = vld [vmem:[#allocation18 + $0x48] sm:$0xff]  ;;  %v2337_v61 = vld [vmem:[#allocation18 + $0x38] sm:$0xff]  ;;  %v2336_v62 = vld [vmem:[#allocation18 + $0x30] sm:$0xff] }
 0x9a5   :  { %2761 = vpow2.f32 %v2218_v22  ;;  %2581 = vmatpush3.msra.mxu1 %v2343_v53  ;;  %v2335_v42 = vld [vmem:[#allocation18 + $0x28] sm:$0xff]  ;;  %v2334_v26 = vld [vmem:[#allocation18 + $0x20] sm:$0xff]  ;;  %v2333_v39 = vld [vmem:[#allocation18 + $0x18] sm:$0xff] }
 0x9a6   :  { %2763 = vpow2.f32 %v2220_v45  ;;  %2582 = vmatprep.subr.mxu1 %v4410_v44  ;;  %v2332_v21 = vld [vmem:[#allocation18 + $0x10] sm:$0xff]  ;;  %v2331_v22 = vld [vmem:[#allocation18 + $0x8] sm:$0xff]  ;;  %v2330_v45 = vld [vmem:[#allocation18] sm:$0xff] }
 0x9a7   :  { %2765 = vpow2.f32 %v2222_v15  ;;  %2583 = vmatpush3.msra.mxu1 %v2342_v55 }
 0x9a8   :  { %2767 = vpow2.f32 %v2224_v41  ;;  %2584 = vmatprep.subr.mxu1 %v4410_v44 }
 0x9a9   :  { %2769 = vpow2.f32 %v2226_v3  ;;  %2585 = vmatpush3.msra.mxu1 %v2341_v56 }
 0x9aa   :  { %2771 = vpow2.f32 %v2228_v0  ;;  %2586 = vmatprep.subr.mxu1 %v4410_v44 }
 0x9ab   :  { %2773 = vpow2.f32 %v2204_v27  ;;  %2587 = vmatpush3.msra.mxu1 %v2340_v57 }
 0x9ac   :  { %2588 = vmatprep.subr.mxu1 %v4410_v44 }
 0x9ad   :  { %2589 = vmatpush3.msra.mxu1 %v2339_v59 }
 0x9ae   :  { %2590 = vmatprep.subr.mxu1 %v4410_v44 }
 0x9af   :  { %2591 = vmatpush3.msra.mxu1 %v2338_v60 }
 0x9b0   :  { %v2758_v7 = vpop.eup %2757  ;;  %2592 = vmatprep.subr.mxu1 %v4410_v44 }
 0x9b1   :  { %v2760_v10 = vpop.eup %2759  ;;  %v2233_v14 = vsel %vm113_vm1, %v2758_v7, 0.0  ;;  %2259 = vperm.xlu0 %2627, %v2758_v7   ;;  %2593 = vmatpush3.msra.mxu1 %v2337_v61 }
 0x9b2   :  { %v2762_v8 = vpop.eup %2761  ;;  %v2234_v5 = vsel %vm113_vm1, %v2760_v10, 0.0  ;;  %2264 = vperm.xlu1 %2628, %v2760_v10   ;;  %2594 = vmatprep.subr.mxu1 %v4410_v44 }
 0x9b3   :  { %v2764_v13 = vpop.eup %2763  ;;  %v2235_v20 = vadd.f32 %v2234_v5, %v2233_v14  ;;  %v2236_v54 = vsel %vm113_vm1, %v2762_v8, 0.0  ;;  %2595 = vmatpush3.msra.mxu1 %v2336_v62 }
 0x9b4   :  { %v2766_v19 = vpop.eup %2765  ;;  %v2238_v46 = vsel %vm113_vm1, %v2764_v13, 0.0  ;;  %2596 = vmatprep.subr.mxu1 %v4410_v44 }
 0x9b5   :  { %v2237_v43 = vadd.f32 %v2236_v54, %v2235_v20  ;;  %v2768_v47 = vpop.eup %2767  ;;  %v2240_v1 = vsel %vm113_vm1, %v2766_v19, 0.0  ;;  %2597 = vmatpush3.msra.mxu1 %v2335_v42 }
 0x9b6   :  { %2269 = vperm.xlu1 %2628, %v2762_v8   ;;  %v2770_v17 = vpop.eup %2769  ;;  %v2242_v32 = vsel %vm113_vm1, %v2768_v47, 0.0  ;;  %2598 = vmatprep.subr.mxu1 %v4410_v44 }
 0x9b7   :  { %v2239_v18 = vadd.f32 %v2238_v46, %v2237_v43  ;;  %v2772_v33 = vpop.eup %2771  ;;  %v2244_v38 = vsel %vm113_vm1, %v2770_v17, 0.0  ;;  %2599 = vmatpush3.msra.mxu1 %v2334_v26 }
 0x9b8   :  { %v2774_v35 = vpop.eup %2773  ;;  %v2246_v63 = vsel %vm113_vm1, %v2772_v33, 0.0  ;;  %2600 = vmatprep.subr.mxu1 %v4410_v44 }
 0x9b9   :  { %v2241_v31 = vadd.f32 %v2240_v1, %v2239_v18  ;;  %v2231_v48 = vmul.f32 %v2774_v35, %v2230_v37  ;;  %2601 = vmatpush3.msra.mxu1 %v2333_v39 }
 0x9ba   :  { %2274 = vperm.xlu1 %2628, %v2764_v13   ;;  %2602 = vmatprep.subr.mxu1 %v4410_v44 }
 0x9bb   :  { %v2243_v34 = vadd.f32 %v2242_v32, %v2241_v31  ;;  %2603 = vmatpush3.msra.mxu1 %v2332_v21 }
 0x9bc   :  { %2604 = vmatprep.subr.mxu1 %v4410_v44 }
 0x9bd   :  { %v2245_v40 = vadd.f32 %v2244_v38, %v2243_v34  ;;  %2605 = vmatpush3.msra.mxu1 %v2331_v22 }
 0x9be   :  { %2279 = vperm.xlu1 %2628, %v2766_v19   ;;  %2606 = vmatprep.subr.mxu1 %v4410_v44 }
 0x9bf   :  { %v2247_v49 = vadd.f32 %v2246_v63, %v2245_v40  ;;  %2607 = vmatpush3.msra.mxu1 %v2330_v45 }
 0x9c1   :  { %v2248_v52 = vadd.f32 %v2247_v49, %v2231_v48 }
 0x9c2   :  { %2284 = vperm.xlu1 %2628, %v2768_v47  }
 0x9c3   :  { %2249 = vst.msk [vmem:[#allocation8] sm:$0xff] %vm113_vm1, %v2248_v52 }
 0x9c6   :  { %2289 = vperm.xlu1 %2628, %v2770_v17  }
 0x9ca   :  { %2294 = vperm.xlu1 %2628, %v2772_v33   ;;  %v2318_v58 = vld [vmem:[#allocation8] sm:$0xff] }
 0x9cb   :  { %2775 = vrcp.f32 %v2318_v58 }
 0x9ce   :  { %2253 = vperm.xlu1 %2628, %v2774_v35  }
 0x9d8   :  { %v2776_v30 = vpop.eup %2775 }
 0x9d9   :  { %v2320_v28 = vmul.f32 %v2776_v30, %v2318_v58 }
 0x9db   :  { %v2321_v24 = vsub.f32 2.0, %v2320_v28 }
 0x9dd   :  { %v2322_v23 = vmul.f32 %v2776_v30, %v2321_v24 }
 0x9df   :  { %2326 = vperm.xlu0 %2627, %v2322_v23  }
 0xa2c   :  { %v2260_v0 = vpop.permute.xlu0 %2259 }
 0xa2d   :  { %v2265_v15 = vpop.permute.xlu1 %2264  ;;  %v2297_v10 = vmul.f32 %v2260_v0, %v4416_v25 }
 0xa2e   :  { %v2298_v7 = vmul.f32 %v2265_v15, %v4417_v12 }
 0xa30   :  { %v2305_v8 = vadd.f32 %v2298_v7, %v2297_v10 }
 0xa31   :  { %v2270_v4 = vpop.permute.xlu1 %2269 }
 0xa32   :  { %v2299_v14 = vmul.f32 %v2270_v4, %v4418_v11 }
 0xa34   :  { %v2306_v44 = vadd.f32 %v2305_v8, %v2299_v14 }
 0xa35   :  { %v2275_v41 = vpop.permute.xlu1 %2274 }
 0xa36   :  { %v2300_v5 = vmul.f32 %v2275_v41, %v4419_v16 }
 0xa38   :  { %v2307_v54 = vadd.f32 %v2306_v44, %v2300_v5 }
 0xa39   :  { %v2280_v2 = vpop.permute.xlu1 %2279 }
 0xa3a   :  { %v2301_v20 = vmul.f32 %v2280_v2, %v4420_v6  ;;  %v2490_v6 = vld [vmem:[%s4133_s9] ss:$0 sm:$0xff] }
 0xa3c   :  { %v2308_v43 = vadd.f32 %v2307_v54, %v2301_v20 }
 0xa3d   :  { %v2285_v3 = vpop.permute.xlu1 %2284 }
 0xa3e   :  { %v2302_v19 = vmul.f32 %v2285_v3, %v3979_v36 }
 0xa40   :  { %v2309_v18 = vadd.f32 %v2308_v43, %v2302_v19 }
 0xa41   :  { %v2290_v27 = vpop.permute.xlu1 %2289 }
 0xa42   :  { %v2303_v46 = vmul.f32 %v2290_v27, %v4056_v29 }
 0xa44   :  { %v2310_v25 = vadd.f32 %v2309_v18, %v2303_v46 }
 0xa45   :  { %v2295_v13 = vpop.permute.xlu1 %2294 }
 0xa46   :  { %v2304_v12 = vmul.f32 %v2295_v13, %v4078_v9 }
 0xa48   :  { %v2311_v11 = vadd.f32 %v2310_v25, %v2304_v12 }
 0xa49   :  { %v2254_v47 = vpop.permute.xlu1 %2253 }
 0xa4a   :  { %v2256_v1 = vmul.f32 0.0, %v2254_v47 }
 0xa4c   :  { %v2312_v17 = vadd.f32 %v2311_v11, %v2256_v1 }
 0xa5a   :  { %v2327_v31 = vpop.permute.xlu0 %2326 }
 0xa5b   :  { %v2329_v16 = vmul.f32 %v2327_v31, %v2312_v17 }
 0xa5d   :  { %2609 = vmatmul.mubr.f32.vlgmr.msra.gmra.mxu1 %v2329_v16 }
 0xb1d   :  { %v2419_v36 = vpop.f32.mrf.mxu1 }
 0xb1e   :  { %v2420_v32 = vadd.f32 %v2490_v6, %v2419_v36 }
 0xb1f   :  { %v2610_v29 = vpop.f32.mrf.mxu1 }
 0xb20   :  { %2423 = vst [vmem:[#allocation19] sm:$0xff] %v2420_v32 }
 0xb21   :  { %2952 = shalt.err (!%p2949_p1)
}
 0xb22   :  { %2433 = dma.vmem_to_hbm [thread:$0]  %s2431_s24, 128, %s4134_s10, [#allocation12]  }
 0xb23   :  { %2967 = dma.done.wait [#allocation12], 128  }
 0xb24   :  { %2968 = vsyncadd [#allocation12], 4294967168 }
 0xb25   :  { %2437 = vsyncpa [#allocation11], 1 }
 0xb26   :  { %2438 = vsyncpa [#allocation14], 1 }
 0xb27   :  { %2439 = vsyncpa [#allocation17], 1 }
 0xb28   :  { %2440 = vsyncpa [#allocation12], 1 }

</bundles_post_ra>
